<compile_context>
chip_gen: v7x
topology: tpu7x:2x2x1
jax: 0.10.0
libtpu: 0.0.40
codegen_flags: <defaults>
</compile_context>

<pallas_src>
import numpy as np
import jax
import jax.numpy as jnp
from jax.experimental import pallas as pl
from jax.experimental.pallas import tpu as pltpu

EPS = 1e-5
_HIGH = jax.lax.Precision.HIGHEST    # used only by the pure-JAX reference


def _round_up(x, m):
    return (x + m - 1) // m * m


def _fold_bn(gamma, beta, mean, var):
    scale = gamma / jnp.sqrt(var + EPS)
    return scale, beta - mean * scale


def _pick_vmem_limit():
    """Per-generation VMEM budget: ~100 MiB on 128-MiB parts, ~48 MiB on v7x."""
    phys = 128 * 1024 * 1024
    try:
        info = pltpu.get_tpu_info()
        phys = int(getattr(info, "vmem_capacity_bytes", phys)) or phys
    except Exception:
        pass
    return int(max(32 << 20, min(phys - (16 << 20), 100 << 20)))


# ---------------------------------------------------------------------------
# Fused kernel: one grid step == B_tile images, everything stays in VMEM.
# All activations live on a flat zero-padded spatial grid of L rows per image
# (L = round_up((Ho+2)*(Wo+2), 8)); `mask` zeroes the conv2 halo rows.
# ---------------------------------------------------------------------------
def _make_kernel(B_tile, L, Wp, Cin_p, Cmid_p, Cexp_p, use_conv_shortcut):
    M = B_tile * L
    f32, bf16 = jnp.float32, jnp.bfloat16

    def kernel(mask_ref, x_ref, s1_ref, t1_ref, w1_ref, b1_ref,
               w2_ref, b2_ref, w3_ref, b3_ref, *rest):
        if use_conv_shortcut:
            wsc_ref, bsc_ref, o_ref = rest
        else:
            (o_ref,) = rest

        # bn1 + relu1 in f32 on the bf16 HBM input (batch folded into rows).
        x = x_ref[...].reshape(M, Cin_p).astype(f32)
        a1 = jnp.maximum(x * s1_ref[...] + t1_ref[...], 0.0)      # (M, Cin_p)
        a1b = a1.astype(bf16)

        # conv1 (1x1; stride folded into the input layout; bn2 folded) + relu2.
        h1 = jnp.dot(a1b, w1_ref[...], preferred_element_type=f32)
        a2 = jnp.maximum(h1 + b1_ref[...], 0.0) * mask_ref[...]   # halo -> 0
        a2b = a2.astype(bf16)

        # conv2 (3x3, pad 1; bn3 folded) + relu3: 9 full-slab matmuls on the
        # same contiguous slab; the tap offset is an XLU sublane roll of the
        # f32 partial (halo rows are zero, so this is exact zero padding; roll
        # wrap-around only ever lands on discarded halo rows).
        acc = jnp.dot(a2b, w2_ref[4], preferred_element_type=f32)  # center tap
        for k in range(9):
            if k == 4:
                continue
            dy, dx = k // 3 - 1, k % 3 - 1
            off = dy * Wp + dx
            part = jnp.dot(a2b, w2_ref[k], preferred_element_type=f32)
            acc = acc + pltpu.roll(part, shift=(-off) % M, axis=0)
        a3 = jnp.maximum(acc + b2_ref[...], 0.0).astype(bf16)

        # conv3 (1x1) + shortcut + residual add (dropout == identity in eval).
        out = jnp.dot(a3, w3_ref[...], preferred_element_type=f32) + b3_ref[...]
        if use_conv_shortcut:
            out = out + jnp.dot(a1b, wsc_ref[...], preferred_element_type=f32)
            out = out + bsc_ref[...]
        else:
            out = out + a1          # identity shortcut (stride 1, Cin == Cexp)
        o_ref[...] = out.reshape(B_tile, L, Cexp_p).astype(o_ref.dtype)

    return kernel


# ---------------------------------------------------------------------------
# Wrapper: layout plumbing + BN folding (tiny weight-sized JAX ops only).
# The NCHW<->NHWC conversion is interface plumbing for the PyTorch-shaped
# test; a channels-last pipeline would feed the padded NHWC slab directly.
# ---------------------------------------------------------------------------
def sew_preact_bottleneck_forward(x_nchw, p, stride, expansion=4):
    N, Cin, H, W = x_nchw.shape
    Cmid = p["w1"].shape[0]
    Cexp = expansion * Cmid
    Ho = (H - 1) // stride + 1
    Wo = (W - 1) // stride + 1
    use_conv_shortcut = (stride != 1) or (Cin != Cexp)

    Cin_p = _round_up(Cin, 128)
    Cmid_p = _round_up(Cmid, 128)
    Cexp_p = _round_up(Cexp, 128)
    Hp, Wp = Ho + 2, Wo + 2
    L = _round_up(Hp * Wp, 8)                     # flat padded rows per image

    # Input: NCHW f32 -> NHWC bf16, stride-subsampled (1x1 conv stride ==
    # subsample; bn1/relu commute), zero halo of 1 px, channels padded to 128.
    x = jnp.transpose(x_nchw, (0, 2, 3, 1))
    if stride != 1:
        x = x[:, ::stride, ::stride, :]
    x = jnp.pad(x, ((0, 0), (1, 1), (1, 1), (0, Cin_p - Cin)))
    x = x.astype(jnp.bfloat16).reshape(N, Hp * Wp, Cin_p)
    if L != Hp * Wp:
        x = jnp.pad(x, ((0, 0), (0, L - Hp * Wp), (0, 0)))

    # Batch tile: fold several images into one grid step (bigger matmul M,
    # fewer grid steps), bounded by a per-step VMEM activation budget.
    per_img = L * 4 * (Cin_p + 4 * Cmid_p + 2 * Cexp_p)
    B_tile = max(1, min(N, (6 << 20) // max(per_img, 1)))
    while N % B_tile:
        B_tile -= 1
    M = B_tile * L

    # Valid-row mask over the flat padded grid (zeroes the conv2 halo).
    r = np.arange(L)
    row, col = r // Wp, r % Wp
    valid = ((row >= 1) & (row <= Ho) & (col >= 1) & (col <= Wo))
    mask = jnp.asarray(np.tile(valid.astype(np.float32)[:, None], (B_tile, 1)))

    # Eval-mode BN folding (in f32, then cast to bf16).
    s1, t1 = _fold_bn(*p["bn1"])
    s2, t2 = _fold_bn(*p["bn2"])
    s3, t3 = _fold_bn(*p["bn3"])

    w1 = p["w1"].reshape(Cmid, Cin).T * s2[None, :]              # (Cin, Cmid)
    b1 = p["b1"] * s2 + t2
    w2 = jnp.stack([p["w2"][:, :, ky, kx].T
                    for ky in range(3) for kx in range(3)])      # (9, Cmid, Cmid)
    w2 = w2 * s3[None, None, :]
    b2 = p["b2"] * s3 + t3
    w3 = p["w3"].reshape(Cexp, Cmid).T                           # (Cmid, Cexp)
    b3 = p["b3"]

    bf16 = jnp.bfloat16

    def pad2(w, rows, cols):
        return jnp.pad(w, ((0, rows - w.shape[0]), (0, cols - w.shape[1])))

    def padv(v, cols):
        return jnp.pad(v, (0, cols - v.shape[0])).reshape(1, cols)

    def const_spec(*shape):
        zeros = (0,) * len(shape)
        return pl.BlockSpec(shape, lambda n, z=zeros: z)

    inputs = [
        mask,
        x,
        padv(s1, Cin_p), padv(t1, Cin_p),
        pad2(w1, Cin_p, Cmid_p).astype(bf16), padv(b1, Cmid_p),
        jnp.pad(w2, ((0, 0), (0, Cmid_p - Cmid), (0, Cmid_p - Cmid))).astype(bf16),
        padv(b2, Cmid_p),
        pad2(w3, Cmid_p, Cexp_p).astype(bf16), padv(b3, Cexp_p),
    ]
    in_specs = [
        const_spec(M, 1),
        pl.BlockSpec((B_tile, L, Cin_p), lambda n: (n, 0, 0)),
        const_spec(1, Cin_p), const_spec(1, Cin_p),
        const_spec(Cin_p, Cmid_p), const_spec(1, Cmid_p),
        const_spec(9, Cmid_p, Cmid_p), const_spec(1, Cmid_p),
        const_spec(Cmid_p, Cexp_p), const_spec(1, Cexp_p),
    ]
    if use_conv_shortcut:
        wsc = p["wsc"].reshape(Cexp, Cin).T                      # (Cin, Cexp)
        inputs += [pad2(wsc, Cin_p, Cexp_p).astype(bf16), padv(p["bsc"], Cexp_p)]
        in_specs += [const_spec(Cin_p, Cexp_p), const_spec(1, Cexp_p)]

    mm = Cin_p * Cmid_p + 9 * Cmid_p * Cmid_p + Cmid_p * Cexp_p
    if use_conv_shortcut:
        mm += Cin_p * Cexp_p
    cost = pl.CostEstimate(
        flops=int(2 * N * L * mm),
        transcendentals=0,
        bytes_accessed=int(2 * N * L * (Cin_p + Cexp_p)      # bf16 in + out
                           + 2 * mm                          # bf16 weights
                           + 4 * M                           # mask
                           + 4 * 2 * (Cin_p + Cmid_p + Cexp_p)),
    )

    out_flat = pl.pallas_call(
        _make_kernel(B_tile, L, Wp, Cin_p, Cmid_p, Cexp_p, use_conv_shortcut),
        out_shape=jax.ShapeDtypeStruct((N, L, Cexp_p), jnp.bfloat16),
        grid=(N // B_tile,),
        in_specs=in_specs,
        out_specs=pl.BlockSpec((B_tile, L, Cexp_p), lambda n: (n, 0, 0)),
        compiler_params=pltpu.CompilerParams(
            dimension_semantics=("parallel",),     # batch axis -> both TCs on v7x
            vmem_limit_bytes=_pick_vmem_limit()),
        cost_estimate=cost,
    )(*inputs)

    # Crop halo rows/cols + padded channels, back to NCHW f32 (one XLA fusion).
    out = out_flat[:, :Hp * Wp, :].reshape(N, Hp, Wp, Cexp_p)
    out = out[:, 1:Ho + 1, 1:Wo + 1, :Cexp].astype(jnp.float32)
    return jnp.transpose(out, (0, 3, 1, 2))


# ---------------------------------------------------------------------------
# Pure-JAX f32 reference (mirrors the PyTorch forward exactly, NCHW).
# ---------------------------------------------------------------------------
def _ref_forward(x, p, stride, expansion=4):
    def bn(x, g, b, m, v):
        inv = g / jnp.sqrt(v + EPS)
        return (x - m[None, :, None, None]) * inv[None, :, None, None] \
            + b[None, :, None, None]

    def conv(x, w, b, stride=1, padding=0):
        y = jax.lax.conv_general_dilated(
            x, w, (stride, stride), [(padding, padding)] * 2,
            dimension_numbers=("NCHW", "OIHW", "NCHW"), precision=_HIGH)
        return y + b[None, :, None, None]

    Cin = x.shape[1]
    Cexp = expansion * p["w1"].shape[0]
    a1 = jax.nn.relu(bn(x, *p["bn1"]))
    out = conv(a1, p["w1"], p["b1"], stride=stride)
    out = conv(jax.nn.relu(bn(out, *p["bn2"])), p["w2"], p["b2"], 1, 1)
    out = conv(jax.nn.relu(bn(out, *p["bn3"])), p["w3"], p["b3"])
    if stride != 1 or Cin != Cexp:
        sc = conv(a1, p["wsc"], p["bsc"], stride=stride)
    else:
        sc = a1
    return out + sc


def make_params(key, in_channels, out_channels, expansion=4):
    Cexp = expansion * out_channels
    ks = jax.random.split(key, 12)

    def bn_params(k, c):
        k1, k2, k3, k4 = jax.random.split(k, 4)
        gamma = 1.0 + 0.1 * jax.random.normal(k1, (c,), jnp.float32)
        beta = 0.1 * jax.random.normal(k2, (c,), jnp.float32)
        mean = 0.1 * jax.random.normal(k3, (c,), jnp.float32)
        var = 1.0 + 0.1 * jax.random.uniform(k4, (c,), jnp.float32)
        return (gamma, beta, mean, var)

    return {
        "bn1": bn_params(ks[0], in_channels),
        "w1": 0.2 * jax.random.normal(ks[1], (out_channels, in_channels, 1, 1), jnp.float32),
        "b1": 0.1 * jax.random.normal(ks[2], (out_channels,), jnp.float32),
        "bn2": bn_params(ks[3], out_channels),
        "w2": 0.2 * jax.random.normal(ks[4], (out_channels, out_channels, 3, 3), jnp.float32),
        "b2": 0.1 * jax.random.normal(ks[5], (out_channels,), jnp.float32),
        "bn3": bn_params(ks[6], out_channels),
        "w3": 0.2 * jax.random.normal(ks[7], (Cexp, out_channels, 1, 1), jnp.float32),
        "b3": 0.1 * jax.random.normal(ks[8], (Cexp,), jnp.float32),
        "wsc": 0.2 * jax.random.normal(ks[9], (Cexp, in_channels, 1, 1), jnp.float32),
        "bsc": 0.1 * jax.random.normal(ks[10], (Cexp,), jnp.float32),
    }


if __name__ == "__main__":
    key = jax.random.PRNGKey(0)
    kx1, kp1, kx2, kp2 = jax.random.split(key, 4)

    fwd = jax.jit(sew_preact_bottleneck_forward, static_argnums=(2,))

    # Config A: stride 2 -> conv shortcut branch.
    N, Cin, H, W, Cmid, stride = 2, 4, 16, 16, 4, 2
    x = jax.random.normal(kx1, (N, Cin, H, W), jnp.float32)
    params = make_params(kp1, Cin, Cmid)
    out = jax.block_until_ready(fwd(x, params, stride))
    ref = jax.block_until_ready(_ref_forward(x, params, stride))
    assert out.shape == ref.shape == (N, 4 * Cmid, H // stride, W // stride), out.shape
    # bf16 HBM activations + bf16 MXU inputs with f32 accumulation vs. an f32
    # HIGHEST-precision reference.
    np.testing.assert_allclose(np.asarray(out), np.asarray(ref), rtol=3e-2, atol=6e-2)

    # Config B: stride 1 with Cin == expansion*Cmid -> identity shortcut branch.
    Cin2 = 16
    x2 = jax.random.normal(kx2, (N, Cin2, H, W), jnp.float32)
    params2 = make_params(kp2, Cin2, Cmid)
    out2 = jax.block_until_ready(fwd(x2, params2, 1))
    ref2 = jax.block_until_ready(_ref_forward(x2, params2, 1))
    assert out2.shape == ref2.shape == (N, 4 * Cmid, H, W), out2.shape
    np.testing.assert_allclose(np.asarray(out2), np.asarray(ref2), rtol=3e-2, atol=6e-2)

    print("KERNEL_OK")
</pallas_src>

<mosaic_0001>
module attributes {stable_mosaic.version = 11 : i64} {
  func.func @kernel(%arg0: i32, %arg1: memref<208x1xf32, #tpu.memory_space<vmem>>, %arg2: memref<2x104x128xbf16, #tpu.memory_space<vmem>>, %arg3: memref<1x128xf32, #tpu.memory_space<vmem>>, %arg4: memref<1x128xf32, #tpu.memory_space<vmem>>, %arg5: memref<128x128xbf16, #tpu.memory_space<vmem>>, %arg6: memref<1x128xf32, #tpu.memory_space<vmem>>, %arg7: memref<9x128x128xbf16, #tpu.memory_space<vmem>>, %arg8: memref<1x128xf32, #tpu.memory_space<vmem>>, %arg9: memref<128x128xbf16, #tpu.memory_space<vmem>>, %arg10: memref<1x128xf32, #tpu.memory_space<vmem>>, %arg11: memref<128x128xbf16, #tpu.memory_space<vmem>>, %arg12: memref<1x128xf32, #tpu.memory_space<vmem>>, %arg13: memref<2x104x128xbf16, #tpu.memory_space<vmem>>) attributes {dimension_semantics = [#tpu.dimension_semantics<parallel>], iteration_bounds = array<i64: 1>, scalar_prefetch = 0 : i64, scratch_operands = 0 : i64, tpu.core_type = #tpu.core_type<tc>, window_params = [{pipeline_mode = #tpu.pipeline_mode<synchronous>, transform_indices = @transform_0, window_bounds = array<i64: 208, 1>}, {transform_indices = @transform_1, window_bounds = array<i64: 2, 104, 128>}, {pipeline_mode = #tpu.pipeline_mode<synchronous>, transform_indices = @transform_2, window_bounds = array<i64: 1, 128>}, {pipeline_mode = #tpu.pipeline_mode<synchronous>, transform_indices = @transform_3, window_bounds = array<i64: 1, 128>}, {pipeline_mode = #tpu.pipeline_mode<synchronous>, transform_indices = @transform_4, window_bounds = array<i64: 128, 128>}, {pipeline_mode = #tpu.pipeline_mode<synchronous>, transform_indices = @transform_5, window_bounds = array<i64: 1, 128>}, {pipeline_mode = #tpu.pipeline_mode<synchronous>, transform_indices = @transform_6, window_bounds = array<i64: 9, 128, 128>}, {pipeline_mode = #tpu.pipeline_mode<synchronous>, transform_indices = @transform_7, window_bounds = array<i64: 1, 128>}, {pipeline_mode = #tpu.pipeline_mode<synchronous>, transform_indices = @transform_8, window_bounds = array<i64: 128, 128>}, {pipeline_mode = #tpu.pipeline_mode<synchronous>, transform_indices = @transform_9, window_bounds = array<i64: 1, 128>}, {pipeline_mode = #tpu.pipeline_mode<synchronous>, transform_indices = @transform_10, window_bounds = array<i64: 128, 128>}, {pipeline_mode = #tpu.pipeline_mode<synchronous>, transform_indices = @transform_11, window_bounds = array<i64: 1, 128>}, {transform_indices = @transform_12, window_bounds = array<i64: 2, 104, 128>}]} {
    %c0 = arith.constant 0 : index
    %c0_0 = arith.constant 0 : index
    %c0_1 = arith.constant 0 : index
    %0 = vector.load %arg2[%c0, %c0_0, %c0_1] : memref<2x104x128xbf16, #tpu.memory_space<vmem>>, vector<2x104x128xbf16>
    %1 = vector.shape_cast %0 : vector<2x104x128xbf16> to vector<208x128xbf16>
    %2 = arith.extf %1 : vector<208x128xbf16> to vector<208x128xf32>
    %c0_2 = arith.constant 0 : index
    %c0_3 = arith.constant 0 : index
    %3 = vector.load %arg3[%c0_2, %c0_3] : memref<1x128xf32, #tpu.memory_space<vmem>>, vector<1x128xf32>
    %4 = vector.broadcast %3 : vector<1x128xf32> to vector<208x128xf32>
    %5 = arith.mulf %2, %4 : vector<208x128xf32>
    %c0_4 = arith.constant 0 : index
    %c0_5 = arith.constant 0 : index
    %6 = vector.load %arg4[%c0_4, %c0_5] : memref<1x128xf32, #tpu.memory_space<vmem>>, vector<1x128xf32>
    %7 = vector.broadcast %6 : vector<1x128xf32> to vector<208x128xf32>
    %8 = arith.addf %5, %7 : vector<208x128xf32>
    %cst = arith.constant 0.000000e+00 : f32
    %9 = vector.broadcast %cst : f32 to vector<208x128xf32>
    %10 = arith.maximumf %8, %9 : vector<208x128xf32>
    %11 = arith.truncf %10 : vector<208x128xf32> to vector<208x128xbf16>
    %c0_6 = arith.constant 0 : index
    %c0_7 = arith.constant 0 : index
    %12 = vector.load %arg5[%c0_6, %c0_7] : memref<128x128xbf16, #tpu.memory_space<vmem>>, vector<128x128xbf16>
    %cst_8 = arith.constant dense<0.000000e+00> : vector<208x128xf32>
    %13 = tpu.matmul %11, %12, %cst_8 {dimension_numbers = #tpu.dot_dimension_numbers<[1], [0], [0], [1], [0, 0, 1, 1], [], []>} : vector<208x128xbf16>, vector<128x128xbf16>, vector<208x128xf32> -> vector<208x128xf32>
    %c0_9 = arith.constant 0 : index
    %c0_10 = arith.constant 0 : index
    %14 = vector.load %arg6[%c0_9, %c0_10] : memref<1x128xf32, #tpu.memory_space<vmem>>, vector<1x128xf32>
    %15 = vector.broadcast %14 : vector<1x128xf32> to vector<208x128xf32>
    %16 = arith.addf %13, %15 : vector<208x128xf32>
    %cst_11 = arith.constant 0.000000e+00 : f32
    %17 = vector.broadcast %cst_11 : f32 to vector<208x128xf32>
    %18 = arith.maximumf %16, %17 : vector<208x128xf32>
    %c0_12 = arith.constant 0 : index
    %c0_13 = arith.constant 0 : index
    %19 = vector.load %arg1[%c0_12, %c0_13] : memref<208x1xf32, #tpu.memory_space<vmem>>, vector<208x1xf32>
    %20 = vector.broadcast %19 : vector<208x1xf32> to vector<208x128xf32>
    %21 = arith.mulf %18, %20 : vector<208x128xf32>
    %22 = arith.truncf %21 : vector<208x128xf32> to vector<208x128xbf16>
    %c4 = arith.constant 4 : index
    %c0_14 = arith.constant 0 : index
    %c0_15 = arith.constant 0 : index
    %23 = vector.load %arg7[%c4, %c0_14, %c0_15] : memref<9x128x128xbf16, #tpu.memory_space<vmem>>, vector<1x128x128xbf16>
    %24 = vector.shape_cast %23 : vector<1x128x128xbf16> to vector<128x128xbf16>
    %cst_16 = arith.constant dense<0.000000e+00> : vector<208x128xf32>
    %25 = tpu.matmul %22, %24, %cst_16 {dimension_numbers = #tpu.dot_dimension_numbers<[1], [0], [0], [1], [0, 0, 1, 1], [], []>} : vector<208x128xbf16>, vector<128x128xbf16>, vector<208x128xf32> -> vector<208x128xf32>
    %c0_17 = arith.constant 0 : index
    %c0_18 = arith.constant 0 : index
    %c0_19 = arith.constant 0 : index
    %26 = vector.load %arg7[%c0_17, %c0_18, %c0_19] : memref<9x128x128xbf16, #tpu.memory_space<vmem>>, vector<1x128x128xbf16>
    %27 = vector.shape_cast %26 : vector<1x128x128xbf16> to vector<128x128xbf16>
    %cst_20 = arith.constant dense<0.000000e+00> : vector<208x128xf32>
    %28 = tpu.matmul %22, %27, %cst_20 {dimension_numbers = #tpu.dot_dimension_numbers<[1], [0], [0], [1], [0, 0, 1, 1], [], []>} : vector<208x128xbf16>, vector<128x128xbf16>, vector<208x128xf32> -> vector<208x128xf32>
    %c11_i32 = arith.constant 11 : i32
    %29 = tpu.dynamic_rotate %28 by %c11_i32 dim 0 : vector<208x128xf32>, i32 -> vector<208x128xf32>
    %30 = arith.addf %25, %29 : vector<208x128xf32>
    %c1 = arith.constant 1 : index
    %c0_21 = arith.constant 0 : index
    %c0_22 = arith.constant 0 : index
    %31 = vector.load %arg7[%c1, %c0_21, %c0_22] : memref<9x128x128xbf16, #tpu.memory_space<vmem>>, vector<1x128x128xbf16>
    %32 = vector.shape_cast %31 : vector<1x128x128xbf16> to vector<128x128xbf16>
    %cst_23 = arith.constant dense<0.000000e+00> : vector<208x128xf32>
    %33 = tpu.matmul %22, %32, %cst_23 {dimension_numbers = #tpu.dot_dimension_numbers<[1], [0], [0], [1], [0, 0, 1, 1], [], []>} : vector<208x128xbf16>, vector<128x128xbf16>, vector<208x128xf32> -> vector<208x128xf32>
    %c10_i32 = arith.constant 10 : i32
    %34 = tpu.dynamic_rotate %33 by %c10_i32 dim 0 : vector<208x128xf32>, i32 -> vector<208x128xf32>
    %35 = arith.addf %30, %34 : vector<208x128xf32>
    %c2 = arith.constant 2 : index
    %c0_24 = arith.constant 0 : index
    %c0_25 = arith.constant 0 : index
    %36 = vector.load %arg7[%c2, %c0_24, %c0_25] : memref<9x128x128xbf16, #tpu.memory_space<vmem>>, vector<1x128x128xbf16>
    %37 = vector.shape_cast %36 : vector<1x128x128xbf16> to vector<128x128xbf16>
    %cst_26 = arith.constant dense<0.000000e+00> : vector<208x128xf32>
    %38 = tpu.matmul %22, %37, %cst_26 {dimension_numbers = #tpu.dot_dimension_numbers<[1], [0], [0], [1], [0, 0, 1, 1], [], []>} : vector<208x128xbf16>, vector<128x128xbf16>, vector<208x128xf32> -> vector<208x128xf32>
    %c9_i32 = arith.constant 9 : i32
    %39 = tpu.dynamic_rotate %38 by %c9_i32 dim 0 : vector<208x128xf32>, i32 -> vector<208x128xf32>
    %40 = arith.addf %35, %39 : vector<208x128xf32>
    %c3 = arith.constant 3 : index
    %c0_27 = arith.constant 0 : index
    %c0_28 = arith.constant 0 : index
    %41 = vector.load %arg7[%c3, %c0_27, %c0_28] : memref<9x128x128xbf16, #tpu.memory_space<vmem>>, vector<1x128x128xbf16>
    %42 = vector.shape_cast %41 : vector<1x128x128xbf16> to vector<128x128xbf16>
    %cst_29 = arith.constant dense<0.000000e+00> : vector<208x128xf32>
    %43 = tpu.matmul %22, %42, %cst_29 {dimension_numbers = #tpu.dot_dimension_numbers<[1], [0], [0], [1], [0, 0, 1, 1], [], []>} : vector<208x128xbf16>, vector<128x128xbf16>, vector<208x128xf32> -> vector<208x128xf32>
    %c1_i32 = arith.constant 1 : i32
    %44 = tpu.dynamic_rotate %43 by %c1_i32 dim 0 : vector<208x128xf32>, i32 -> vector<208x128xf32>
    %45 = arith.addf %40, %44 : vector<208x128xf32>
    %c5 = arith.constant 5 : index
    %c0_30 = arith.constant 0 : index
    %c0_31 = arith.constant 0 : index
    %46 = vector.load %arg7[%c5, %c0_30, %c0_31] : memref<9x128x128xbf16, #tpu.memory_space<vmem>>, vector<1x128x128xbf16>
    %47 = vector.shape_cast %46 : vector<1x128x128xbf16> to vector<128x128xbf16>
    %cst_32 = arith.constant dense<0.000000e+00> : vector<208x128xf32>
    %48 = tpu.matmul %22, %47, %cst_32 {dimension_numbers = #tpu.dot_dimension_numbers<[1], [0], [0], [1], [0, 0, 1, 1], [], []>} : vector<208x128xbf16>, vector<128x128xbf16>, vector<208x128xf32> -> vector<208x128xf32>
    %c207_i32 = arith.constant 207 : i32
    %49 = tpu.dynamic_rotate %48 by %c207_i32 dim 0 : vector<208x128xf32>, i32 -> vector<208x128xf32>
    %50 = arith.addf %45, %49 : vector<208x128xf32>
    %c6 = arith.constant 6 : index
    %c0_33 = arith.constant 0 : index
    %c0_34 = arith.constant 0 : index
    %51 = vector.load %arg7[%c6, %c0_33, %c0_34] : memref<9x128x128xbf16, #tpu.memory_space<vmem>>, vector<1x128x128xbf16>
    %52 = vector.shape_cast %51 : vector<1x128x128xbf16> to vector<128x128xbf16>
    %cst_35 = arith.constant dense<0.000000e+00> : vector<208x128xf32>
    %53 = tpu.matmul %22, %52, %cst_35 {dimension_numbers = #tpu.dot_dimension_numbers<[1], [0], [0], [1], [0, 0, 1, 1], [], []>} : vector<208x128xbf16>, vector<128x128xbf16>, vector<208x128xf32> -> vector<208x128xf32>
    %c199_i32 = arith.constant 199 : i32
    %54 = tpu.dynamic_rotate %53 by %c199_i32 dim 0 : vector<208x128xf32>, i32 -> vector<208x128xf32>
    %55 = arith.addf %50, %54 : vector<208x128xf32>
    %c7 = arith.constant 7 : index
    %c0_36 = arith.constant 0 : index
    %c0_37 = arith.constant 0 : index
    %56 = vector.load %arg7[%c7, %c0_36, %c0_37] : memref<9x128x128xbf16, #tpu.memory_space<vmem>>, vector<1x128x128xbf16>
    %57 = vector.shape_cast %56 : vector<1x128x128xbf16> to vector<128x128xbf16>
    %cst_38 = arith.constant dense<0.000000e+00> : vector<208x128xf32>
    %58 = tpu.matmul %22, %57, %cst_38 {dimension_numbers = #tpu.dot_dimension_numbers<[1], [0], [0], [1], [0, 0, 1, 1], [], []>} : vector<208x128xbf16>, vector<128x128xbf16>, vector<208x128xf32> -> vector<208x128xf32>
    %c198_i32 = arith.constant 198 : i32
    %59 = tpu.dynamic_rotate %58 by %c198_i32 dim 0 : vector<208x128xf32>, i32 -> vector<208x128xf32>
    %60 = arith.addf %55, %59 : vector<208x128xf32>
    %c8 = arith.constant 8 : index
    %c0_39 = arith.constant 0 : index
    %c0_40 = arith.constant 0 : index
    %61 = vector.load %arg7[%c8, %c0_39, %c0_40] : memref<9x128x128xbf16, #tpu.memory_space<vmem>>, vector<1x128x128xbf16>
    %62 = vector.shape_cast %61 : vector<1x128x128xbf16> to vector<128x128xbf16>
    %cst_41 = arith.constant dense<0.000000e+00> : vector<208x128xf32>
    %63 = tpu.matmul %22, %62, %cst_41 {dimension_numbers = #tpu.dot_dimension_numbers<[1], [0], [0], [1], [0, 0, 1, 1], [], []>} : vector<208x128xbf16>, vector<128x128xbf16>, vector<208x128xf32> -> vector<208x128xf32>
    %c197_i32 = arith.constant 197 : i32
    %64 = tpu.dynamic_rotate %63 by %c197_i32 dim 0 : vector<208x128xf32>, i32 -> vector<208x128xf32>
    %65 = arith.addf %60, %64 : vector<208x128xf32>
    %c0_42 = arith.constant 0 : index
    %c0_43 = arith.constant 0 : index
    %66 = vector.load %arg8[%c0_42, %c0_43] : memref<1x128xf32, #tpu.memory_space<vmem>>, vector<1x128xf32>
    %67 = vector.broadcast %66 : vector<1x128xf32> to vector<208x128xf32>
    %68 = arith.addf %65, %67 : vector<208x128xf32>
    %cst_44 = arith.constant 0.000000e+00 : f32
    %69 = vector.broadcast %cst_44 : f32 to vector<208x128xf32>
    %70 = arith.maximumf %68, %69 : vector<208x128xf32>
    %71 = arith.truncf %70 : vector<208x128xf32> to vector<208x128xbf16>
    %c0_45 = arith.constant 0 : index
    %c0_46 = arith.constant 0 : index
    %72 = vector.load %arg9[%c0_45, %c0_46] : memref<128x128xbf16, #tpu.memory_space<vmem>>, vector<128x128xbf16>
    %cst_47 = arith.constant dense<0.000000e+00> : vector<208x128xf32>
    %73 = tpu.matmul %71, %72, %cst_47 {dimension_numbers = #tpu.dot_dimension_numbers<[1], [0], [0], [1], [0, 0, 1, 1], [], []>} : vector<208x128xbf16>, vector<128x128xbf16>, vector<208x128xf32> -> vector<208x128xf32>
    %c0_48 = arith.constant 0 : index
    %c0_49 = arith.constant 0 : index
    %74 = vector.load %arg10[%c0_48, %c0_49] : memref<1x128xf32, #tpu.memory_space<vmem>>, vector<1x128xf32>
    %75 = vector.broadcast %74 : vector<1x128xf32> to vector<208x128xf32>
    %76 = arith.addf %73, %75 : vector<208x128xf32>
    %c0_50 = arith.constant 0 : index
    %c0_51 = arith.constant 0 : index
    %77 = vector.load %arg11[%c0_50, %c0_51] : memref<128x128xbf16, #tpu.memory_space<vmem>>, vector<128x128xbf16>
    %cst_52 = arith.constant dense<0.000000e+00> : vector<208x128xf32>
    %78 = tpu.matmul %11, %77, %cst_52 {dimension_numbers = #tpu.dot_dimension_numbers<[1], [0], [0], [1], [0, 0, 1, 1], [], []>} : vector<208x128xbf16>, vector<128x128xbf16>, vector<208x128xf32> -> vector<208x128xf32>
    %79 = arith.addf %76, %78 : vector<208x128xf32>
    %c0_53 = arith.constant 0 : index
    %c0_54 = arith.constant 0 : index
    %80 = vector.load %arg12[%c0_53, %c0_54] : memref<1x128xf32, #tpu.memory_space<vmem>>, vector<1x128xf32>
    %81 = vector.broadcast %80 : vector<1x128xf32> to vector<208x128xf32>
    %82 = arith.addf %79, %81 : vector<208x128xf32>
    %83 = vector.shape_cast %82 : vector<208x128xf32> to vector<2x104x128xf32>
    %84 = arith.truncf %83 : vector<2x104x128xf32> to vector<2x104x128xbf16>
    %c0_55 = arith.constant 0 : index
    %c0_56 = arith.constant 0 : index
    %c0_57 = arith.constant 0 : index
    %85 = vector.load %arg13[%c0_55, %c0_56, %c0_57] : memref<2x104x128xbf16, #tpu.memory_space<vmem>>, vector<2x104x128xbf16>
    tpu.vector_store %arg13[%c0_55, %c0_56, %c0_57], %84 {strides = array<i32>} : memref<2x104x128xbf16, #tpu.memory_space<vmem>>, vector<2x104x128xbf16>,
    return
  }
  func.func @transform_0(%arg0: i32) -> (i32, i32) {
    %c0_i32 = arith.constant 0 : i32
    %c0_i32_0 = arith.constant 0 : i32
    %c0_i32_1 = arith.constant 0 : i32
    return %c0_i32, %c0_i32_0 : i32, i32
  }
  func.func @transform_1(%arg0: i32) -> (i32, i32, i32) {
    %c0_i32 = arith.constant 0 : i32
    %c0_i32_0 = arith.constant 0 : i32
    %c0_i32_1 = arith.constant 0 : i32
    return %arg0, %c0_i32, %c0_i32_0 : i32, i32, i32
  }
  func.func @transform_2(%arg0: i32) -> (i32, i32) {
    %c0_i32 = arith.constant 0 : i32
    %c0_i32_0 = arith.constant 0 : i32
    %c0_i32_1 = arith.constant 0 : i32
    return %c0_i32, %c0_i32_0 : i32, i32
  }
  func.func @transform_3(%arg0: i32) -> (i32, i32) {
    %c0_i32 = arith.constant 0 : i32
    %c0_i32_0 = arith.constant 0 : i32
    %c0_i32_1 = arith.constant 0 : i32
    return %c0_i32, %c0_i32_0 : i32, i32
  }
  func.func @transform_4(%arg0: i32) -> (i32, i32) {
    %c0_i32 = arith.constant 0 : i32
    %c0_i32_0 = arith.constant 0 : i32
    %c0_i32_1 = arith.constant 0 : i32
    return %c0_i32, %c0_i32_0 : i32, i32
  }
  func.func @transform_5(%arg0: i32) -> (i32, i32) {
    %c0_i32 = arith.constant 0 : i32
    %c0_i32_0 = arith.constant 0 : i32
    %c0_i32_1 = arith.constant 0 : i32
    return %c0_i32, %c0_i32_0 : i32, i32
  }
  func.func @transform_6(%arg0: i32) -> (i32, i32, i32) {
    %c0_i32 = arith.constant 0 : i32
    %c0_i32_0 = arith.constant 0 : i32
    %c0_i32_1 = arith.constant 0 : i32
    %c0_i32_2 = arith.constant 0 : i32
    return %c0_i32, %c0_i32_0, %c0_i32_1 : i32, i32, i32
  }
  func.func @transform_7(%arg0: i32) -> (i32, i32) {
    %c0_i32 = arith.constant 0 : i32
    %c0_i32_0 = arith.constant 0 : i32
    %c0_i32_1 = arith.constant 0 : i32
    return %c0_i32, %c0_i32_0 : i32, i32
  }
  func.func @transform_8(%arg0: i32) -> (i32, i32) {
    %c0_i32 = arith.constant 0 : i32
    %c0_i32_0 = arith.constant 0 : i32
    %c0_i32_1 = arith.constant 0 : i32
    return %c0_i32, %c0_i32_0 : i32, i32
  }
  func.func @transform_9(%arg0: i32) -> (i32, i32) {
    %c0_i32 = arith.constant 0 : i32
    %c0_i32_0 = arith.constant 0 : i32
    %c0_i32_1 = arith.constant 0 : i32
    return %c0_i32, %c0_i32_0 : i32, i32
  }
  func.func @transform_10(%arg0: i32) -> (i32, i32) {
    %c0_i32 = arith.constant 0 : i32
    %c0_i32_0 = arith.constant 0 : i32
    %c0_i32_1 = arith.constant 0 : i32
    return %c0_i32, %c0_i32_0 : i32, i32
  }
  func.func @transform_11(%arg0: i32) -> (i32, i32) {
    %c0_i32 = arith.constant 0 : i32
    %c0_i32_0 = arith.constant 0 : i32
    %c0_i32_1 = arith.constant 0 : i32
    return %c0_i32, %c0_i32_0 : i32, i32
  }
  func.func @transform_12(%arg0: i32) -> (i32, i32, i32) {
    %c0_i32 = arith.constant 0 : i32
    %c0_i32_0 = arith.constant 0 : i32
    %c0_i32_1 = arith.constant 0 : i32
    return %arg0, %c0_i32, %c0_i32_0 : i32, i32, i32
  }
}

</mosaic_0001>

<bundles_post_ra>
// kernel: sew_preact_bottleneck_forward.1
= control target key start
LH: loop header
LB: loop body
LE: loop exit
PB: predicated region body
PF: predicated region fallthrough
CT: control target
= control target key end

     0   :  { %17 = vsyncpa [#allocation3], 0  ;;  %s7645_s0 = inlined_call_operand.hbm [shape: f32[208,1], index: 0, kind: input, shape index: {}]   ;;  %s7646_s1 = inlined_call_operand.hbm [shape: bf16[2,104,128], index: 1, kind: input, shape index: {}]   ;;  %s7647_s2 = inlined_call_operand.hbm [shape: f32[1,128], index: 2, kind: input, shape index: {}]   ;;  %s7648_s3 = inlined_call_operand.hbm [shape: f32[1,128], index: 3, kind: input, shape index: {}]   ;;  %s7649_s4 = inlined_call_operand.hbm [shape: bf16[128,128], index: 4, kind: input, shape index: {}]   ;;  %s7650_s5 = inlined_call_operand.hbm [shape: f32[1,128], index: 5, kind: input, shape index: {}]   ;;  %s7651_s6 = inlined_call_operand.hbm [shape: bf16[9,128,128], index: 6, kind: input, shape index: {}]   ;;  %s7652_s7 = inlined_call_operand.hbm [shape: f32[1,128], index: 7, kind: input, shape index: {}]   ;;  %s7653_s8 = inlined_call_operand.hbm [shape: bf16[128,128], index: 8, kind: input, shape index: {}]   ;;  %s7654_s9 = inlined_call_operand.hbm [shape: f32[1,128], index: 9, kind: input, shape index: {}]   ;;  %s7655_s10 = inlined_call_operand.hbm [shape: bf16[128,128], index: 10, kind: input, shape index: {}]   ;;  %s7656_s11 = inlined_call_operand.hbm [shape: f32[1,128], index: 11, kind: input, shape index: {}]   ;;  %s7657_s12 = inlined_call_operand.hbm [shape: bf16[2,104,128], index: 12, kind: output, shape index: {}]  }
   0x1   :  { %18 = vsyncpa [#allocation6], 0 }
   0x2   :  { %19 = vsyncpa [#allocation9], 0 }
   0x3   :  { %20 = vsyncpa [#allocation12], 0 }
   0x4   :  { %21 = vsyncpa [#allocation15], 0 }
   0x5   :  { %22 = vsyncpa [#allocation18], 0 }
   0x6   :  { %23 = vsyncpa [#allocation21], 0 }
   0x7   :  { %24 = vsyncpa [#allocation4], 0  ;;  %s5681_s21 = smov [#allocation5]   ;;  %s5379_s25 = scalar_lea.hbm %s7646_s1, 1664 }
   0x8   :  { %s42_s22 = sshll.u32 %s5681_s21, 4  ;;  %p5380_p0 = scmp.ne.s32.totalorder %s7646_s1, %s5379_s25  ;;  %s43_s22 = int_to_ptr.vmem [resolvable:$true] %s42_s22 }
   0x9   :  { %p5383_p1 = scmp.lt.u32.totalorder %s5379_s25, %s7646_s1 }
   0xb   :  { %p5385_p2 = pnand %p5383_p1, %p5380_p0 }
   0xd   :  { %5388 = shalt.err (!%p5385_p2)
}
   0xe   :  { %s5389_s30 = scalar_lea.vmem %s43_s22, 1664  ;;  %p5394_p4 = scmp.lt.s32.totalorder %s43_s22, %s43_s22 }
   0xf   :  { %p5390_p3 = scmp.ne.s32.totalorder %s43_s22, %s5389_s30  ;;  %p5395_p5 = scmp.lt.s32.totalorder %s5389_s30, %s5389_s30 }
  0x11   :  { %p5396_p6 = por %p5395_p5, %p5394_p4 }
  0x13   :  { %p5397_p7 = pnand %p5396_p6, %p5390_p3 }
  0x15   :  { %5400 = shalt.err (!%p5397_p7)
}
  0x16   :  { %s5682_s13 = smov 64   ;;  %s5683_s14 = smov 4  }
  0x17   :  { %48 = dma.hbm_to_vmem [thread:$0]  %s7646_s1, 1664, %s43_s22, [#allocation6], %s5682_s13, %s5682_s13, %s5683_s14  }
  0x18   :  { %s5684_s17 = smov [#allocation8]   ;;  %s5685_s19 = smov [#allocation11]  }
  0x19   :  { %s65_s18 = sshll.u32 %s5684_s17, 4  ;;  %s87_s20 = sshll.u32 %s5685_s19, 4  ;;  %s66_s18 = int_to_ptr.vmem [resolvable:$true] %s65_s18  ;;  %s88_s20 = int_to_ptr.vmem [resolvable:$true] %s87_s20 }
  0x1a   :  { %s5401_s24 = scalar_lea.hbm %s7648_s3, 16 }
  0x1b   :  { %p5402_p8 = scmp.ne.s32.totalorder %s7648_s3, %s5401_s24  ;;  %p5405_p9 = scmp.lt.u32.totalorder %s5401_s24, %s7648_s3 }
  0x1d   :  { %p5407_p10 = pnand %p5405_p9, %p5402_p8 }
  0x1f   :  { %5410 = shalt.err (!%p5407_p10)
}
  0x20   :  { %s5411_s1 = scalar_lea.vmem %s66_s18, 16  ;;  %s5415_s22 = scalar_lea.vmem %s66_s18, 32 }
  0x21   :  { %p5412_p11 = scmp.ne.s32.totalorder %s66_s18, %s5411_s1  ;;  %p5416_p12 = scmp.lt.s32.totalorder %s66_s18, %s66_s18 }
  0x22   :  { %p5417_p13 = scmp.lt.s32.totalorder %s5415_s22, %s5411_s1 }
  0x24   :  { %p5418_p0 = por %p5417_p13, %p5416_p12 }
  0x26   :  { %p5419_p1 = pnand %p5418_p0, %p5412_p11 }
  0x28   :  { %5422 = shalt.err (!%p5419_p1)
}
  0x29   :  { %68 = dma.hbm_to_vmem [thread:$0]  %s7648_s3, 16, %s66_s18, [#allocation9]  }
  0x2a   :  { %s5423_s17 = scalar_lea.hbm %s7650_s5, 16 }
  0x2b   :  { %p5424_p2 = scmp.ne.s32.totalorder %s7650_s5, %s5423_s17  ;;  %p5427_p3 = scmp.lt.u32.totalorder %s5423_s17, %s7650_s5 }
  0x2d   :  { %p5429_p4 = pnand %p5427_p3, %p5424_p2 }
  0x2f   :  { %5432 = shalt.err (!%p5429_p4)
}
  0x30   :  { %s5433_s25 = scalar_lea.vmem %s88_s20, 16  ;;  %s5437_s26 = scalar_lea.vmem %s88_s20, 32 }
  0x31   :  { %p5434_p5 = scmp.ne.s32.totalorder %s88_s20, %s5433_s25  ;;  %p5438_p6 = scmp.lt.s32.totalorder %s88_s20, %s88_s20 }
  0x32   :  { %p5439_p7 = scmp.lt.s32.totalorder %s5437_s26, %s5433_s25 }
  0x34   :  { %p5440_p8 = por %p5439_p7, %p5438_p6 }
  0x36   :  { %p5441_p9 = pnand %p5440_p8, %p5434_p5 }
  0x38   :  { %5444 = shalt.err (!%p5441_p9)
}
  0x39   :  { %90 = dma.hbm_to_vmem [thread:$0]  %s7650_s5, 16, %s88_s20, [#allocation12]  }
  0x3a   :  { %s5686_s27 = smov [#allocation14]   ;;  %s5687_s1 = smov [#allocation17]  }
  0x3b   :  { %s109_s28 = sshll.u32 %s5686_s27, 4  ;;  %s131_s22 = sshll.u32 %s5687_s1, 4  ;;  %s110_s28 = int_to_ptr.vmem [resolvable:$true] %s109_s28  ;;  %s132_s22 = int_to_ptr.vmem [resolvable:$true] %s131_s22 }
  0x3c   :  { %s5445_s15 = scalar_lea.hbm %s7652_s7, 16 }
  0x3d   :  { %p5446_p10 = scmp.ne.s32.totalorder %s7652_s7, %s5445_s15  ;;  %p5449_p11 = scmp.lt.u32.totalorder %s5445_s15, %s7652_s7 }
  0x3f   :  { %p5451_p12 = pnand %p5449_p11, %p5446_p10 }
  0x41   :  { %5454 = shalt.err (!%p5451_p12)
}
  0x42   :  { %s5455_s5 = scalar_lea.vmem %s110_s28, 16  ;;  %s5459_s20 = scalar_lea.vmem %s110_s28, 32 }
  0x43   :  { %p5456_p13 = scmp.ne.s32.totalorder %s110_s28, %s5455_s5  ;;  %p5460_p0 = scmp.lt.s32.totalorder %s110_s28, %s110_s28 }
  0x44   :  { %p5461_p1 = scmp.lt.s32.totalorder %s5459_s20, %s5455_s5 }
  0x46   :  { %p5462_p2 = por %p5461_p1, %p5460_p0 }
  0x48   :  { %p5463_p3 = pnand %p5462_p2, %p5456_p13 }
  0x4a   :  { %5466 = shalt.err (!%p5463_p3)
}
  0x4b   :  { %112 = dma.hbm_to_vmem [thread:$0]  %s7652_s7, 16, %s110_s28, [#allocation15]  }
  0x4c   :  { %s5467_s3 = scalar_lea.hbm %s7654_s9, 16 }
  0x4d   :  { %p5468_p4 = scmp.ne.s32.totalorder %s7654_s9, %s5467_s3  ;;  %p5471_p5 = scmp.lt.u32.totalorder %s5467_s3, %s7654_s9 }
  0x4f   :  { %p5473_p6 = pnand %p5471_p5, %p5468_p4 }
  0x51   :  { %5476 = shalt.err (!%p5473_p6)
}
  0x52   :  { %s5477_s30 = scalar_lea.vmem %s132_s22, 16  ;;  %s5481_s15 = scalar_lea.vmem %s132_s22, 32 }
  0x53   :  { %p5478_p7 = scmp.ne.s32.totalorder %s132_s22, %s5477_s30  ;;  %p5482_p8 = scmp.lt.s32.totalorder %s132_s22, %s132_s22 }
  0x54   :  { %p5483_p9 = scmp.lt.s32.totalorder %s5481_s15, %s5477_s30 }
  0x56   :  { %p5484_p10 = por %p5483_p9, %p5482_p8 }
  0x58   :  { %p5485_p11 = pnand %p5484_p10, %p5478_p7 }
  0x5a   :  { %5488 = shalt.err (!%p5485_p11)
}
  0x5b   :  { %134 = dma.hbm_to_vmem [thread:$0]  %s7654_s9, 16, %s132_s22, [#allocation18]  }
  0x5c   :  { %s5688_s16 = smov [#allocation2]   ;;  %s5489_s5 = scalar_lea.hbm %s7645_s0, 3328 }
  0x5d   :  { %s30_s17 = sshll.u32 %s5688_s16, 4  ;;  %p5490_p12 = scmp.ne.s32.totalorder %s7645_s0, %s5489_s5  ;;  %s31_s17 = int_to_ptr.vmem [resolvable:$true] %s30_s17 }
  0x5e   :  { %p5493_p13 = scmp.lt.u32.totalorder %s5489_s5, %s7645_s0 }
  0x60   :  { %p5495_p0 = pnand %p5493_p13, %p5490_p12 }
  0x62   :  { %5498 = shalt.err (!%p5495_p0)
}
  0x63   :  { %s5499_s26 = scalar_lea.vmem %s31_s17, 3328  ;;  %p5504_p2 = scmp.lt.s32.totalorder %s31_s17, %s31_s17 }
  0x64   :  { %p5500_p1 = scmp.ne.s32.totalorder %s31_s17, %s5499_s26  ;;  %p5505_p3 = scmp.lt.s32.totalorder %s5499_s26, %s5499_s26 }
  0x66   :  { %p5506_p4 = por %p5505_p3, %p5504_p2 }
  0x68   :  { %p5507_p5 = pnand %p5506_p4, %p5500_p1 }
  0x6a   :  { %5510 = shalt.err (!%p5507_p5)
}
  0x6b   :  { %s5689_s9 = smov 128   ;;  %s5690_s22 = smov 8  }
  0x6c   :  { %36 = dma.hbm_to_vmem [thread:$0]  %s7645_s0, 3328, %s31_s17, [#allocation3], %s5689_s9, %s5689_s9, %s5690_s22  }
  0x6d   :  { %s5691_s27 = smov [#allocation7]   ;;  %s5692_s29 = smov [#allocation10]  }
  0x6e   :  { %s55_s1 = sshll.u32 %s5691_s27, 4  ;;  %s74_s30 = sshll.u32 %s5692_s29, 4  ;;  %s56_s1 = int_to_ptr.vmem [resolvable:$true] %s55_s1  ;;  %s5841_s30 = int_to_ptr.vmem [resolvable:$true] %s74_s30 }
  0x6f   :  { %s5511_s28 = scalar_lea.hbm %s7647_s2, 16 }
  0x70   :  { %p5512_p6 = scmp.ne.s32.totalorder %s7647_s2, %s5511_s28  ;;  %p5515_p7 = scmp.lt.u32.totalorder %s5511_s28, %s7647_s2 }
  0x72   :  { %p5517_p8 = pnand %p5515_p7, %p5512_p6 }
  0x74   :  { %5520 = shalt.err (!%p5517_p8)
}
  0x75   :  { %s5521_s0 = scalar_lea.vmem %s56_s1, 16  ;;  %s5525_s17 = scalar_lea.vmem %s56_s1, 32 }
  0x76   :  { %p5522_p9 = scmp.ne.s32.totalorder %s56_s1, %s5521_s0  ;;  %p5526_p10 = scmp.lt.s32.totalorder %s56_s1, %s56_s1 }
  0x77   :  { %p5527_p11 = scmp.lt.s32.totalorder %s5525_s17, %s5521_s0 }
  0x79   :  { %p5528_p12 = por %p5527_p11, %p5526_p10 }
  0x7b   :  { %p5529_p13 = pnand %p5528_p12, %p5522_p9 }
  0x7d   :  { %5532 = shalt.err (!%p5529_p13)
}
  0x7e   :  { %58 = dma.hbm_to_vmem [thread:$0]  %s7647_s2, 16, %s56_s1, [#allocation6]  }
  0x7f   :  { %s5533_s26 = scalar_lea.hbm %s7649_s4, 1024 }
  0x80   :  { %p5534_p0 = scmp.ne.s32.totalorder %s7649_s4, %s5533_s26  ;;  %p5537_p1 = scmp.lt.u32.totalorder %s5533_s26, %s7649_s4 }
  0x82   :  { %p5539_p2 = pnand %p5537_p1, %p5534_p0 }
  0x84   :  { %5542 = shalt.err (!%p5539_p2)
}
  0x85   :  { %s5543_s27 = scalar_lea.vmem %s5841_s30, 1024  ;;  %p5548_p4 = scmp.lt.s32.totalorder %s5841_s30, %s5841_s30 }
  0x86   :  { %p5544_p3 = scmp.ne.s32.totalorder %s5841_s30, %s5543_s27  ;;  %p5549_p5 = scmp.lt.s32.totalorder %s5543_s27, %s5543_s27 }
  0x88   :  { %p5550_p6 = por %p5549_p5, %p5548_p4 }
  0x8a   :  { %p5551_p7 = pnand %p5550_p6, %p5544_p3 }
  0x8c   :  { %5554 = shalt.err (!%p5551_p7)
}
  0x8d   :  { %80 = dma.hbm_to_vmem [thread:$0]  %s7649_s4, 1024, %s5841_s30, [#allocation9], %s5682_s13, %s5682_s13, %s5683_s14  }
  0x8e   :  { %s5693_s29 = smov [#allocation13]   ;;  %s5694_s7 = smov [#allocation16]  }
  0x8f   :  { %s96_s15 = sshll.u32 %s5693_s29, 4  ;;  %s118_s28 = sshll.u32 %s5694_s7, 4  ;;  %s97_s15 = int_to_ptr.vmem [resolvable:$true] %s96_s15  ;;  %s5875_s28 = int_to_ptr.vmem [resolvable:$true] %s118_s28 }
  0x90   :  { %s5555_s21 = scalar_lea.hbm %s7651_s6, 9216 }
  0x91   :  { %p5556_p8 = scmp.ne.s32.totalorder %s7651_s6, %s5555_s21  ;;  %p5559_p9 = scmp.lt.u32.totalorder %s5555_s21, %s7651_s6 }
  0x93   :  { %p5561_p10 = pnand %p5559_p9, %p5556_p8 }
  0x95   :  { %5564 = shalt.err (!%p5561_p10)
}
  0x96   :  { %s5565_s4 = scalar_lea.vmem %s97_s15, 9216  ;;  %p5570_p12 = scmp.lt.s32.totalorder %s97_s15, %s97_s15 }
  0x97   :  { %p5566_p11 = scmp.ne.s32.totalorder %s97_s15, %s5565_s4  ;;  %p5571_p13 = scmp.lt.s32.totalorder %s5565_s4, %s5565_s4 }
  0x99   :  { %p5572_p0 = por %p5571_p13, %p5570_p12 }
  0x9b   :  { %p5573_p1 = pnand %p5572_p0, %p5566_p11 }
  0x9d   :  { %5576 = shalt.err (!%p5573_p1)
}
  0x9e   :  { %102 = dma.hbm_to_vmem [thread:$0]  %s7651_s6, 9216, %s97_s15, [#allocation12], %s5682_s13, %s5682_s13, %s5683_s14  }
  0x9f   :  { %s5577_s26 = scalar_lea.hbm %s7653_s8, 1024 }
  0xa0   :  { %p5578_p2 = scmp.ne.s32.totalorder %s7653_s8, %s5577_s26  ;;  %p5581_p3 = scmp.lt.u32.totalorder %s5577_s26, %s7653_s8 }
  0xa2   :  { %p5583_p4 = pnand %p5581_p3, %p5578_p2 }
  0xa4   :  { %5586 = shalt.err (!%p5583_p4)
}
  0xa5   :  { %s5587_s27 = scalar_lea.vmem %s5875_s28, 1024  ;;  %p5592_p6 = scmp.lt.s32.totalorder %s5875_s28, %s5875_s28 }
  0xa6   :  { %p5588_p5 = scmp.ne.s32.totalorder %s5875_s28, %s5587_s27  ;;  %p5593_p7 = scmp.lt.s32.totalorder %s5587_s27, %s5587_s27 }
  0xa8   :  { %p5594_p8 = por %p5593_p7, %p5592_p6 }
  0xaa   :  { %p5595_p9 = pnand %p5594_p8, %p5588_p5 }
  0xac   :  { %5598 = shalt.err (!%p5595_p9)
}
  0xad   :  { %124 = dma.hbm_to_vmem [thread:$0]  %s7653_s8, 1024, %s5875_s28, [#allocation15], %s5682_s13, %s5682_s13, %s5683_s14  }
  0xae   :  { %s5695_s1 = smov [#allocation19]   ;;  %s5696_s15 = smov [#allocation20]  }
  0xaf   :  { %s140_s29 = sshll.u32 %s5695_s1, 4  ;;  %s153_s7 = sshll.u32 %s5696_s15, 4  ;;  %s141_s29 = int_to_ptr.vmem [resolvable:$true] %s140_s29  ;;  %s154_s7 = int_to_ptr.vmem [resolvable:$true] %s153_s7 }
  0xb0   :  { %s5599_s21 = scalar_lea.hbm %s7655_s10, 1024 }
  0xb1   :  { %p5600_p10 = scmp.ne.s32.totalorder %s7655_s10, %s5599_s21  ;;  %p5603_p11 = scmp.lt.u32.totalorder %s5599_s21, %s7655_s10 }
  0xb3   :  { %p5605_p12 = pnand %p5603_p11, %p5600_p10 }
  0xb5   :  { %5608 = shalt.err (!%p5605_p12)
}
  0xb6   :  { %s5609_s8 = scalar_lea.vmem %s141_s29, 1024  ;;  %p5614_p0 = scmp.lt.s32.totalorder %s141_s29, %s141_s29 }
  0xb7   :  { %p5610_p13 = scmp.ne.s32.totalorder %s141_s29, %s5609_s8  ;;  %p5615_p1 = scmp.lt.s32.totalorder %s5609_s8, %s5609_s8 }
  0xb9   :  { %p5616_p2 = por %p5615_p1, %p5614_p0 }
  0xbb   :  { %p5617_p3 = pnand %p5616_p2, %p5610_p13 }
  0xbd   :  { %5620 = shalt.err (!%p5617_p3)
}
  0xbe   :  { %146 = dma.hbm_to_vmem [thread:$0]  %s7655_s10, 1024, %s141_s29, [#allocation18], %s5682_s13, %s5682_s13, %s5683_s14  }
  0xbf   :  { %s5621_s24 = scalar_lea.hbm %s7656_s11, 16 }
  0xc0   :  { %p5622_p4 = scmp.ne.s32.totalorder %s7656_s11, %s5621_s24  ;;  %p5625_p5 = scmp.lt.u32.totalorder %s5621_s24, %s7656_s11 }
  0xc2   :  { %p5627_p6 = pnand %p5625_p5, %p5622_p4 }
  0xc4   :  { %5630 = shalt.err (!%p5627_p6)
}
  0xc5   :  { %s5631_s3 = scalar_lea.vmem %s154_s7, 16  ;;  %s5635_s18 = scalar_lea.vmem %s154_s7, 32 }
  0xc6   :  { %p5632_p7 = scmp.ne.s32.totalorder %s154_s7, %s5631_s3  ;;  %p5636_p8 = scmp.lt.s32.totalorder %s154_s7, %s154_s7 }
  0xc7   :  { %p5637_p9 = scmp.lt.s32.totalorder %s5635_s18, %s5631_s3 }
  0xc9   :  { %p5638_p10 = por %p5637_p9, %p5636_p8 }
  0xcb   :  { %p5639_p11 = pnand %p5638_p10, %p5632_p7 }
  0xcd   :  { %5642 = shalt.err (!%p5639_p11)
}
  0xce   :  { %156 = dma.hbm_to_vmem [thread:$0]  %s7656_s11, 16, %s154_s7, [#allocation21]  }
  0xcf   :  { %5665 = dma.done.wait [#allocation3], 3328  }
  0xd0   :  { %5666 = vsyncadd [#allocation3], 4294963968 }
  0xd1   :  { %5667 = dma.done.wait [#allocation6], 1680  }
  0xd2   :  { %5668 = vsyncadd [#allocation6], 4294965616 }
  0xd3   :  { %5669 = dma.done.wait [#allocation9], 1040  }
  0xd4   :  { %5670 = vsyncadd [#allocation9], 4294966256 }
  0xd5   :  { %5671 = dma.done.wait [#allocation12], 9232  }
  0xd6   :  { %5672 = vsyncadd [#allocation12], 4294958064 }
  0xd7   :  { %5673 = dma.done.wait [#allocation15], 1040  }
  0xd8   :  { %5674 = vsyncadd [#allocation15], 4294966256 }
  0xd9   :  { %5675 = dma.done.wait [#allocation18], 1040  }
  0xda   :  { %5676 = vsyncadd [#allocation18], 4294966256 }
  0xdb   :  { %5677 = dma.done.wait [#allocation21], 16  }
  0xdc   :  { %5678 = vsyncadd [#allocation21], 4294967280  ;;  %v7664_v0 = vmov 0.0   ;;  %vm5698_vm0 = vmmov 0   ;;  %v5699_v1 = vmov 0   ;;  %v5283_v2 = vld [vmem:[#allocation10] sm:$0xff]  }
  0xdd   :  { %4445 = vmatprep.subr.bf16.mxu0 %v7664_v0  ;;  %4461 = vmatprep.mubr.msk.bf16.mxu0 %vm5698_vm0, %v7664_v0  ;;  %v5284_v3 = vld [vmem:[#allocation10 + $0x8] sm:$0xff]   ;;  %v5285_v4 = vld [vmem:[#allocation10 + $0x10] sm:$0xff]   ;;  %v5286_v6 = vld [vmem:[#allocation10 + $0x18] sm:$0xff]   ;;  %s5700_s11 = smov [#allocation22]  }
  0xde   :  { %5281 = vset.pattern.permute.xlu0 %v5699_v1  ;;  %5282 = vset.pattern.permute.xlu1 %v5699_v1  ;;  %v4053_v5 = vld [vmem:[#allocation5] sm:$0xff]   ;;  %v4169_v9 = vld [vmem:[#allocation5 + $0x8] sm:$0xff]   ;;  %v4170_v11 = vld [vmem:[#allocation5 + $0x10] sm:$0xff]   ;;  %s3880_s6 = sshll.u32 %s5700_s11, 4  ;;  %s3881_s6 = int_to_ptr.vmem [resolvable:$true] %s3880_s6 }
  0xdf   :  { %4513 = vmatprep.subr.bf16.mxu1 %v7664_v0  ;;  %4529 = vmatprep.mubr.msk.bf16.mxu1 %vm5698_vm0, %v7664_v0  ;;  %v4054_v7 = vunpack.c.l.bf16 %v4053_v5  ;;  %v4055_v8 = vunpack.c.h.bf16 %v4053_v5  ;;  %v5947_v10 = vld [vmem:[#allocation7] ss:$0 sm:$0xff]  ;;  %v585_v12 = vld [vmem:[#allocation2] sm:$0xff]  ;;  %v4058_v13 = vunpack.c.l.bf16 %v4169_v9  ;;  %v4059_v14 = vunpack.c.h.bf16 %v4169_v9  ;;  %v4171_v15 = vld [vmem:[#allocation5 + $0x18] sm:$0xff]   ;;  %s5643_s2 = scalar_lea.vmem %s3881_s6, 1664  ;;  %p5648_p13 = scmp.lt.s32.totalorder %s3881_s6, %s3881_s6 }
  0xe0   :  { %4446 = vmatpush3.bf16.msra.mxu0 %v5283_v2  ;;  %613 = vperm.xlu0 %5281, %v585_v12   ;;  %v587_v16 = vld [vmem:[#allocation2 + $0x10] sm:$0xff]  ;;  %v586_v17 = vld [vmem:[#allocation2 + $0x8] sm:$0xff]  ;;  %v4062_v20 = vunpack.c.l.bf16 %v4170_v11  ;;  %v588_v21 = vld [vmem:[#allocation2 + $0x18] sm:$0xff]  ;;  %v4063_v24 = vunpack.c.h.bf16 %v4170_v11  ;;  %v4066_v25 = vunpack.c.l.bf16 %v4171_v15  ;;  %v4067_v32 = vunpack.c.h.bf16 %v4171_v15  ;;  %p5644_p12 = scmp.ne.s32.totalorder %s3881_s6, %s5643_s2  ;;  %p5649_p0 = scmp.lt.s32.totalorder %s5643_s2, %s5643_s2 }
  0xe1   :  { %4447 = vmatprep.subr.bf16.mxu0 %v7664_v0  ;;  %623 = vperm.xlu1 %5282, %v587_v16   ;;  %v253_v18 = vmul.f32 %v4054_v7, %v5947_v10  ;;  %v254_v19 = vmul.f32 %v4055_v8, %v5947_v10  ;;  %v5287_v22 = vld [vmem:[#allocation10 + $0x20] sm:$0xff]   ;;  %v5952_v23 = vld [vmem:[#allocation8] ss:$0 sm:$0xff]  ;;  %v255_v26 = vmul.f32 %v4058_v13, %v5947_v10  ;;  %v590_v33 = vld [vmem:[#allocation2 + $0x28] sm:$0xff] }
  0xe2   :  { %v256_v27 = vmul.f32 %v4059_v14, %v5947_v10  ;;  %v589_v28 = vld [vmem:[#allocation2 + $0x20] sm:$0xff]  ;;  %v257_v31 = vmul.f32 %v4062_v20, %v5947_v10  ;;  %v258_v35 = vmul.f32 %v4063_v24, %v5947_v10  ;;  %v259_v36 = vmul.f32 %v4066_v25, %v5947_v10  ;;  %v5289_v39 = vld [vmem:[#allocation10 + $0x30] sm:$0xff]   ;;  %v592_v46 = vld [vmem:[#allocation2 + $0x38] sm:$0xff]  ;;  %p5650_p1 = por %p5649_p0, %p5648_p13 }
  0xe3   :  { %v286_v29 = vadd.f32 %v5952_v23, %v253_v18  ;;  %v287_v30 = vadd.f32 %v5952_v23, %v254_v19  ;;  %v5288_v34 = vld [vmem:[#allocation10 + $0x28] sm:$0xff]   ;;  %v288_v37 = vadd.f32 %v5952_v23, %v255_v26  ;;  %v591_v40 = vld [vmem:[#allocation2 + $0x30] sm:$0xff]  ;;  %v260_v44 = vmul.f32 %v4067_v32, %v5947_v10  ;;  %v5978_v53 = vld [vmem:[#allocation5 + $0x28] sm:$0xff]  }
  0xe4   :  { %4448 = vmatpush3.bf16.msra.mxu0 %v5284_v3  ;;  %618 = vperm.xlu0 %5281, %v586_v17   ;;  %v289_v38 = vadd.f32 %v5952_v23, %v256_v27  ;;  %v5966_v43 = vadd.f32 %v5952_v23, %v257_v31  ;;  %v5969_v45 = vld [vmem:[#allocation5 + $0x20] sm:$0xff]   ;;  %v5972_v48 = vadd.f32 %v5952_v23, %v258_v35  ;;  %v593_v50 = vld [vmem:[#allocation2 + $0x40] sm:$0xff]  ;;  %v594_v54 = vld [vmem:[#allocation2 + $0x48] sm:$0xff]  ;;  %v4074_v11 = vunpack.c.l.bf16 %v5978_v53  ;;  %p5651_p2 = pnand %p5650_p1, %p5644_p12 }
  0xe5   :  { %4449 = vmatprep.subr.bf16.mxu0 %v7664_v0  ;;  %628 = vperm.xlu1 %5282, %v588_v21   ;;  %v312_v41 = vmax.f32 %v286_v29, 0.0  ;;  %v313_v42 = vmax.f32 %v287_v30, 0.0  ;;  %v4176_v47 = vld [vmem:[#allocation5 + $0x40] sm:$0xff]   ;;  %v5975_v49 = vadd.f32 %v5952_v23, %v259_v36  ;;  %v314_v51 = vmax.f32 %v288_v37, 0.0  ;;  %v4177_v56 = vld [vmem:[#allocation5 + $0x48] sm:$0xff]   ;;  %v4178_v61 = vld [vmem:[#allocation5 + $0x50] sm:$0xff]  }
  0xe6   :  { %v315_v52 = vmax.f32 %v289_v38, 0.0  ;;  %v5290_v55 = vld [vmem:[#allocation10 + $0x38] sm:$0xff]   ;;  %v316_v57 = vmax.f32 %v5966_v43, 0.0  ;;  %v5982_v58 = vadd.f32 %v5952_v23, %v260_v44  ;;  %v4070_v59 = vunpack.c.l.bf16 %v5969_v45  ;;  %v4179_v9 = vld [vmem:[#allocation5 + $0x58] sm:$0xff]   ;;  %v6002_v25 = vld [vmem:[#allocation5 + $0x30] sm:$0xff]  }
  0xe7   :  { %v4086_v60 = vunpack.c.l.bf16 %v4176_v47  ;;  %v5985_v62 = vpack.c.bf16 %v313_v42, %v312_v41  ;;  %v317_v63 = vmax.f32 %v5972_v48, 0.0  ;;  %v318_v1 = vmax.f32 %v5975_v49, 0.0  ;;  %v595_v2 = vld [vmem:[#allocation2 + $0x50] sm:$0xff]  ;;  %v596_v7 = vld [vmem:[#allocation2 + $0x58] sm:$0xff]  ;;  %v597_v30 = vld [vmem:[#allocation2 + $0x60] sm:$0xff] }
  0xe8   :  { %4450 = vmatpush3.bf16.msra.mxu0 %v5285_v4  ;;  %633 = vperm.xlu0 %5281, %v589_v28   ;;  %v4087_v3 = vunpack.c.h.bf16 %v4176_v47  ;;  %v5990_v4 = vpack.c.bf16 %v315_v52, %v314_v51  ;;  %v4071_v5 = vunpack.c.h.bf16 %v5969_v45  ;;  %v4090_v8 = vunpack.c.l.bf16 %v4177_v56  ;;  %v4180_v15 = vld [vmem:[#allocation5 + $0x60] sm:$0xff]   ;;  %v598_v35 = vld [vmem:[#allocation2 + $0x68] sm:$0xff]  ;;  %v5292_v47 = vld [vmem:[#allocation13 + $0x100] sm:$0xff]  }
  0xe9   :  { %4451 = vmatprep.subr.bf16.mxu0 %v7664_v0  ;;  %638 = vperm.xlu1 %5282, %v590_v33   ;;  %v4091_v13 = vunpack.c.h.bf16 %v4177_v56  ;;  %v4094_v14 = vunpack.c.l.bf16 %v4178_v61  ;;  %v261_v16 = vmul.f32 %v4070_v59, %v5947_v10  ;;  %v4095_v19 = vunpack.c.h.bf16 %v4178_v61  ;;  %v4175_v59 = vld [vmem:[#allocation5 + $0x38] sm:$0xff]   ;;  %v5297_v48 = vld [vmem:[#allocation13 + $0x18] sm:$0xff]  }
  0xea   :  { %v270_v12 = vmul.f32 %v4087_v3, %v5947_v10  ;;  %v271_v18 = vmul.f32 %v4090_v8, %v5947_v10  ;;  %v4098_v24 = vunpack.c.l.bf16 %v4179_v9  ;;  %v4099_v29 = vunpack.c.h.bf16 %v4179_v9  ;;  %v600_v3 = vld [vmem:[#allocation2 + $0x78] sm:$0xff] }
  0xeb   :  { %v272_v21 = vmul.f32 %v4091_v13, %v5947_v10  ;;  %v274_v28 = vmul.f32 %v4095_v19, %v5947_v10  ;;  %v4103_v52 = vunpack.c.h.bf16 %v4180_v15  ;;  %v4078_v56 = vunpack.c.l.bf16 %v6002_v25  ;;  %v601_v19 = vld [vmem:[#allocation2 + $0x80] sm:$0xff] }
  0xec   :  { %4452 = vmatpush3.bf16.msra.mxu0 %v5286_v6  ;;  %643 = vperm.xlu0 %5281, %v591_v40   ;;  %v269_v6 = vmul.f32 %v4086_v60, %v5947_v10  ;;  %v303_v20 = vadd.f32 %v5952_v23, %v270_v12  ;;  %v304_v27 = vadd.f32 %v5952_v23, %v271_v18  ;;  %v599_v60 = vld [vmem:[#allocation2 + $0x70] sm:$0xff]  ;;  %v319_v12 = vmax.f32 %v5982_v58, 0.0  ;;  %v5294_v18 = vld [vmem:[#allocation13 + $0x108] sm:$0xff]  }
  0xed   :  { %4453 = vmatprep.subr.bf16.mxu0 %v7664_v0  ;;  %648 = vperm.xlu1 %5282, %v592_v46   ;;  %v305_v32 = vadd.f32 %v5952_v23, %v272_v21  ;;  %v307_v37 = vadd.f32 %v5952_v23, %v274_v28  ;;  %v276_v38 = vmul.f32 %v4099_v29, %v5947_v10  ;;  %v5291_v46 = vld [vmem:[#allocation13] sm:$0xff]   ;;  %v4079_v45 = vunpack.c.h.bf16 %v6002_v25  ;;  %v603_v29 = vld [vmem:[#allocation2 + $0x90] sm:$0xff] }
  0xee   :  { %v302_v17 = vadd.f32 %v5952_v23, %v269_v6  ;;  %v329_v31 = vmax.f32 %v303_v20, 0.0  ;;  %v330_v36 = vmax.f32 %v304_v27, 0.0  ;;  %4514 = vmatpush3.bf16.msra.mxu1 %v5291_v46  ;;  %v278_v8 = vmul.f32 %v4103_v52, %v5947_v10  ;;  %v5299_v52 = vld [vmem:[#allocation13 + $0x20] sm:$0xff]  }
  0xef   :  { %v331_v41 = vmax.f32 %v305_v32, 0.0  ;;  %v309_v51 = vadd.f32 %v5952_v23, %v276_v38  ;;  %4515 = vmatprep.subr.bf16.mxu1 %v7664_v0  ;;  %v262_v13 = vmul.f32 %v4071_v5, %v5947_v10  ;;  %v265_v5 = vmul.f32 %v4078_v56, %v5947_v10  ;;  %v604_v32 = vld [vmem:[#allocation2 + $0x98] sm:$0xff] }
  0xf0   :  { %4454 = vmatpush3.bf16.msra.mxu0 %v5287_v22  ;;  %653 = vperm.xlu0 %5281, %v593_v50   ;;  %v273_v22 = vmul.f32 %v4094_v14, %v5947_v10  ;;  %v328_v26 = vmax.f32 %v302_v17, 0.0  ;;  %v333_v50 = vmax.f32 %v307_v37, 0.0  ;;  %v6034_v14 = vadd.f32 %v5952_v23, %v261_v16  ;;  %v5293_v17 = vld [vmem:[#allocation13 + $0x8] sm:$0xff]  }
  0xf1   :  { %4455 = vmatprep.subr.bf16.mxu0 %v7664_v0  ;;  %658 = vperm.xlu1 %5282, %v594_v54   ;;  %v6022_v61 = vpack.c.bf16 %v331_v41, %v330_v36  ;;  %v311_v21 = vadd.f32 %v5952_v23, %v278_v8  ;;  %v602_v16 = vld [vmem:[#allocation2 + $0x88] sm:$0xff]  ;;  %v4083_v28 = vunpack.c.h.bf16 %v4175_v59  ;;  %v266_v36 = vmul.f32 %v4079_v45, %v5947_v10 }
  0xf2   :  { %v306_v33 = vadd.f32 %v5952_v23, %v273_v22  ;;  %v6015_v40 = vpack.c.bf16 %v329_v31, %v328_v26  ;;  %4516 = vmatpush3.bf16.msra.mxu1 %v5293_v17  ;;  %v6051_v26 = vadd.f32 %v5952_v23, %v262_v13  ;;  %v320_v25 = vmax.f32 %v6034_v14, 0.0  ;;  %v5296_v31 = vld [vmem:[#allocation13 + $0x110] sm:$0xff]   ;;  %v5305_v14 = vld [vmem:[#allocation13 + $0x38] sm:$0xff]  }
  0xf3   :  { %7675 = vst [vmem:[#allocation32_spill] sm:$0xff] %v6022_v61  ;;  %4517 = vmatprep.subr.bf16.mxu1 %v7664_v0  ;;  %v298_v41 = vadd.f32 %v5952_v23, %v265_v5  ;;  %v268_v43 = vmul.f32 %v4083_v28, %v5947_v10  ;;  %v6087_v56 = vpack.c.bf16 %v319_v12, %v318_v1  ;;  %v5303_v12 = vld [vmem:[#allocation13 + $0x30] sm:$0xff]   ;;  %v6137_v17 = vld [vmem:[#allocation11] ss:$0 sm:$0xff] }
  0xf4   :  { %4456 = vmatpush3.bf16.msra.mxu0 %v5288_v34  ;;  %663 = vperm.xlu0 %5281, %v595_v2   ;;  %v275_v34 = vmul.f32 %v4098_v24, %v5947_v10  ;;  %7674 = vst [vmem:[#allocation31_spill] sm:$0xff] %v6015_v40  ;;  %v332_v42 = vmax.f32 %v306_v33, 0.0  ;;  %v337_v24 = vmax.f32 %v311_v21, 0.0  ;;  %v321_v38 = vmax.f32 %v6051_v26, 0.0  ;;  %v5304_v13 = vld [vmem:[#allocation13 + $0x130] sm:$0xff]  }
  0xf5   :  { %4457 = vmatprep.subr.bf16.mxu0 %v7664_v0  ;;  %668 = vperm.xlu1 %5282, %v596_v7   ;;  %v335_v7 = vmax.f32 %v309_v51, 0.0  ;;  %v324_v46 = vmax.f32 %v298_v41, 0.0  ;;  %v607_v51 = vld [vmem:[#allocation2 + $0xb0] sm:$0xff]  ;;  %7680 = vst [vmem:[#allocation37_spill] sm:$0xff] %v6087_v56  ;;  %v5308_v41 = vld [vmem:[#allocation13 + $0x48] sm:$0xff]  }
  0xf6   :  { %v308_v44 = vadd.f32 %v5952_v23, %v275_v34  ;;  %v6024_v6 = vpack.c.bf16 %v333_v50, %v332_v42  ;;  %v6064_v34 = vpack.c.bf16 %v317_v63, %v316_v57  ;;  %v605_v42 = vld [vmem:[#allocation2 + $0xa0] sm:$0xff]  ;;  %v5298_v57 = vld [vmem:[#allocation13 + $0x118] sm:$0xff]   ;;  %v606_v63 = vld [vmem:[#allocation2 + $0xa8] sm:$0xff]  ;;  %v301_v50 = vadd.f32 %v5952_v23, %v268_v43 }
  0xf7   :  { %v6097_v49 = vpack.c.bf16 %v321_v38, %v320_v25 }
  0xf8   :  { %4458 = vmatpush3.bf16.msra.mxu0 %v5289_v39  ;;  %v4102_v39 = vunpack.c.l.bf16 %v4180_v15  ;;  %673 = vperm.xlu0 %5281, %v597_v30   ;;  %v334_v2 = vmax.f32 %v308_v44, 0.0  ;;  %7676 = vst [vmem:[#allocation33_spill] sm:$0xff] %v6024_v6  ;;  %v263_v15 = vmul.f32 %v4074_v11, %v5947_v10  ;;  %v4082_v11 = vunpack.c.l.bf16 %v4175_v59  ;;  %v5295_v30 = vld [vmem:[#allocation13 + $0x10] sm:$0xff]   ;;  %7679 = vst [vmem:[#allocation36_spill] sm:$0xff] %v6064_v34 }
  0xf9   :  { %4459 = vmatprep.subr.bf16.mxu0 %v7664_v0  ;;  %678 = vperm.xlu1 %5282, %v598_v35   ;;  %v299_v44 = vadd.f32 %v5952_v23, %v266_v36  ;;  %7681 = vst [vmem:[#allocation38_spill] sm:$0xff] %v6097_v49  ;;  %v5313_v36 = vld [vmem:[#allocation13 + $0x80] sm:$0xff]  }
  0xfa   :  { %v277_v54 = vmul.f32 %v4102_v39, %v5947_v10  ;;  %v6040_v20 = vpack.c.bf16 %v335_v7, %v334_v2  ;;  %v6055_v27 = vadd.f32 %v5952_v23, %v263_v15  ;;  %4518 = vmatpush3.bf16.msra.mxu1 %v5295_v30  ;;  %v267_v37 = vmul.f32 %v4082_v11, %v5947_v10  ;;  %v609_v2 = vld [vmem:[#allocation2 + $0xc0] sm:$0xff]  ;;  %v610_v7 = vld [vmem:[#allocation2 + $0xc8] sm:$0xff]  ;;  %v5306_v15 = vld [vmem:[#allocation13 + $0x138] sm:$0xff]  }
  0xfb   :  { %4519 = vmatprep.subr.bf16.mxu1 %v7664_v0  ;;  %v325_v59 = vmax.f32 %v299_v44, 0.0 }
  0xfc   :  { %4460 = vmatpush3.bf16.msra.mxu0 %v5290_v55  ;;  %v4075_v55 = vunpack.c.h.bf16 %v5978_v53  ;;  %v310_v9 = vadd.f32 %v5952_v23, %v277_v54  ;;  %683 = vperm.xlu0 %5281, %v599_v60   ;;  %7677 = vst [vmem:[#allocation34_spill] sm:$0xff] %v6040_v20  ;;  %v322_v39 = vmax.f32 %v6055_v27, 0.0  ;;  %v5300_v54 = vld [vmem:[#allocation13 + $0x120] sm:$0xff]   ;;  %v327_v60 = vmax.f32 %v301_v50, 0.0  ;;  %v5309_v50 = vld [vmem:[#allocation13 + $0x50] sm:$0xff]  }
  0xfd   :  { %4581 = vmatprep.subr.bf16.mxu0 %v7664_v0  ;;  %688 = vperm.xlu1 %5282, %v600_v3   ;;  %v5301_v3 = vld [vmem:[#allocation13 + $0x28] sm:$0xff]   ;;  %v6107_v1 = vpack.c.bf16 %v325_v59, %v324_v46 }
  0xfe   :  { %v336_v22 = vmax.f32 %v310_v9, 0.0  ;;  %v264_v53 = vmul.f32 %v4075_v55, %v5947_v10  ;;  %4520 = vmatpush3.bf16.msra.mxu1 %v5297_v48  ;;  %v608_v55 = vld [vmem:[#allocation2 + $0xb8] sm:$0xff]  ;;  %v5302_v9 = vld [vmem:[#allocation13 + $0x128] sm:$0xff]  }
  0xff   :  { %4462 = vmatmul.mubr.bf16.vlgmr.msra.gmra.mrb[0].mxu0 %v5985_v62  ;;  %4521 = vmatprep.subr.bf16.mxu1 %v7664_v0  ;;  %7683 = vst [vmem:[#allocation40_spill] sm:$0xff] %v6107_v1  ;;  %v5314_v48 = vld [vmem:[#allocation13 + $0x88] sm:$0xff]  }
 0x100   :  { %4465 = vmatprep.mubr.msk.bf16.mxu0 %vm5698_vm0, %v7664_v0  ;;  %4582 = vmatpush3.bf16.msra.mxu0 %v5292_v47  ;;  %v6057_v33 = vpack.c.bf16 %v337_v24, %v336_v22  ;;  %v297_v35 = vadd.f32 %v5952_v23, %v264_v53  ;;  %v300_v47 = vadd.f32 %v5952_v23, %v267_v37 }
 0x101   :  { %4583 = vmatprep.subr.bf16.mxu0 %v7664_v0  ;;  %693 = vperm.xlu0 %5281, %v601_v19  }
 0x102   :  { %7678 = vst [vmem:[#allocation35_spill] sm:$0xff] %v6057_v33  ;;  %698 = vperm.xlu1 %5282, %v602_v16   ;;  %v323_v10 = vmax.f32 %v297_v35, 0.0  ;;  %4522 = vmatpush3.bf16.msra.mxu1 %v5299_v52  ;;  %v326_v23 = vmax.f32 %v300_v47, 0.0  ;;  %v5316_v52 = vld [vmem:[#allocation13 + $0x90] sm:$0xff]  }
 0x103   :  { %4523 = vmatprep.subr.bf16.mxu1 %v7664_v0 }
 0x104   :  { %4584 = vmatpush3.bf16.msra.mxu0 %v5294_v18  ;;  %v6102_v58 = vpack.c.bf16 %v323_v10, %v322_v39  ;;  %v6112_v8 = vpack.c.bf16 %v327_v60, %v326_v23  ;;  %v5310_v60 = vld [vmem:[#allocation13 + $0x58] sm:$0xff]  }
 0x105   :  { %4585 = vmatprep.subr.bf16.mxu0 %v7664_v0  ;;  %703 = vperm.xlu0 %5281, %v603_v29   ;;  %v5307_v29 = vld [vmem:[#allocation13 + $0x40] sm:$0xff]  }
 0x106   :  { %708 = vperm.xlu1 %5282, %v604_v32   ;;  %4524 = vmatpush3.bf16.msra.mxu1 %v5301_v3  ;;  %7682 = vst [vmem:[#allocation39_spill] sm:$0xff] %v6102_v58  ;;  %7684 = vst [vmem:[#allocation41_spill] sm:$0xff] %v6112_v8 }
 0x107   :  { %4466 = vmatmul.mubr.bf16.gmra.mrb[4].mxu0 %v5990_v4  ;;  %4525 = vmatprep.subr.bf16.mxu1 %v7664_v0 }
 0x108   :  { %4469 = vmatprep.mubr.msk.bf16.mxu0 %vm5698_vm0, %v7664_v0  ;;  %4586 = vmatpush3.bf16.msra.mxu0 %v5296_v31 }
 0x109   :  { %4587 = vmatprep.subr.bf16.mxu0 %v7664_v0  ;;  %713 = vperm.xlu0 %5281, %v605_v42  }
 0x10a   :  { %718 = vperm.xlu1 %5282, %v606_v63   ;;  %4526 = vmatpush3.bf16.msra.mxu1 %v5303_v12 }
 0x10b   :  { %4527 = vmatprep.subr.bf16.mxu1 %v7664_v0 }
 0x10c   :  { %4588 = vmatpush3.bf16.msra.mxu0 %v5298_v57 }
 0x10d   :  { %4589 = vmatprep.subr.bf16.mxu0 %v7664_v0  ;;  %723 = vperm.xlu0 %5281, %v607_v51  }
 0x10e   :  { %728 = vperm.xlu1 %5282, %v608_v55   ;;  %4528 = vmatpush3.bf16.msra.mxu1 %v5305_v14 }
 0x10f   :  { %4470 = vmatmul.mubr.bf16.gmra.mrb[8].mxu0 %v6064_v34  ;;  %4649 = vmatprep.subr.bf16.mxu1 %v7664_v0 }
 0x110   :  { %4473 = vmatprep.mubr.msk.bf16.mxu0 %vm5698_vm0, %v7664_v0  ;;  %4590 = vmatpush3.bf16.msra.mxu0 %v5300_v54 }
 0x111   :  { %4591 = vmatprep.subr.bf16.mxu0 %v7664_v0  ;;  %733 = vperm.xlu0 %5281, %v609_v2  }
 0x112   :  { %738 = vperm.xlu1 %5282, %v610_v7   ;;  %v5317_v7 = vld [vmem:[#allocation13 + $0x98] sm:$0xff]  }
 0x114   :  { %4592 = vmatpush3.bf16.msra.mxu0 %v5302_v9 }
 0x115   :  { %4593 = vmatprep.subr.bf16.mxu0 %v7664_v0 }
 0x117   :  { %4474 = vmatmul.mubr.bf16.gmra.mrb[12].mxu0 %v6087_v56  ;;  %v5359_v56 = vld [vmem:[#allocation13 + $0x220] sm:$0xff]  }
 0x118   :  { %4477 = vmatprep.mubr.msk.bf16.mxu0 %vm5698_vm0, %v7664_v0  ;;  %4594 = vmatpush3.bf16.msra.mxu0 %v5304_v13 }
 0x119   :  { %4595 = vmatprep.subr.bf16.mxu0 %v7664_v0 }
 0x11c   :  { %4596 = vmatpush3.bf16.msra.mxu0 %v5306_v15 }
 0x11d   :  { %4717 = vmatprep.subr.bf16.mxu0 %v7664_v0 }
 0x11f   :  { %4478 = vmatmul.mubr.bf16.gmra.mrb[16].mxu0 %v6097_v49 }
 0x120   :  { %4481 = vmatprep.mubr.msk.bf16.mxu0 %vm5698_vm0, %v7664_v0 }
 0x127   :  { %4482 = vmatmul.mubr.bf16.gmra.mrb[20].mxu0 %v6102_v58 }
 0x128   :  { %4485 = vmatprep.mubr.msk.bf16.mxu0 %vm5698_vm0, %v7664_v0 }
 0x12f   :  { %4486 = vmatmul.mubr.bf16.gmra.mrb[24].mxu0 %v6107_v1 }
 0x130   :  { %4489 = vmatprep.mubr.msk.bf16.mxu0 %vm5698_vm0, %v7664_v0 }
 0x137   :  { %4490 = vmatmul.mubr.bf16.gmra.mrb[28].mxu0 %v6112_v8 }
 0x138   :  { %4493 = vmatprep.mubr.msk.bf16.mxu0 %vm5698_vm0, %v7664_v0 }
 0x13f   :  { %4494 = vmatmul.mubr.bf16.gmra.mrb[32].mxu0 %v6015_v40 }
 0x140   :  { %4497 = vmatprep.mubr.msk.bf16.mxu0 %vm5698_vm0, %v7664_v0 }
 0x147   :  { %4498 = vmatmul.mubr.bf16.gmra.mrb[36].mxu0 %v6022_v61 }
 0x148   :  { %4501 = vmatprep.mubr.msk.bf16.mxu0 %vm5698_vm0, %v7664_v0 }
 0x14f   :  { %4502 = vmatmul.mubr.bf16.gmra.mrb[40].mxu0 %v6024_v6 }
 0x150   :  { %4505 = vmatprep.mubr.msk.bf16.mxu0 %vm5698_vm0, %v7664_v0 }
 0x157   :  { %4506 = vmatmul.mubr.bf16.gmra.mrb[44].mxu0 %v6040_v20 }
 0x158   :  { %4509 = vmatprep.mubr.msk.bf16.mxu0 %vm5698_vm0, %v7664_v0 }
 0x15f   :  { %4510 = vmatmul.mubr.bf16.gmra.mrb[48].mxu0 %v6057_v33  ;;  %v614_v18 = vpop.permute.xlu0 %613 }
 0x160   :  { %4597 = vmatprep.mubr.msk.bf16.mxu0 %vm5698_vm0, %v7664_v0  ;;  %v624_v27 = vpop.permute.xlu1 %623 }
 0x163   :  { %v619_v24 = vpop.permute.xlu0 %618 }
 0x164   :  { %v629_v42 = vpop.permute.xlu1 %628 }
 0x167   :  { %v634_v2 = vpop.permute.xlu0 %633 }
 0x168   :  { %v639_v3 = vpop.permute.xlu1 %638 }
 0x1d2   :  { %v456_v19 = vpop.f32.mrb[0].mxu0 }
 0x1d3   :  { %v457_v21 = vadd.f32 %v6137_v17, %v456_v19  ;;  %v4463_v22 = vpop.f32.mrb[1].mxu0  ;;  %v5311_v19 = vld [vmem:[#allocation13 + $0x60] sm:$0xff]  }
 0x1d4   :  { %v459_v45 = vpop.f32.mrb[2].mxu0  ;;  %v5318_v22 = vld [vmem:[#allocation13 + $0xa0] sm:$0xff]  }
 0x1d5   :  { %v559_v53 = vmax.f32 %v457_v21, 0.0  ;;  %v460_v5 = vadd.f32 %v6137_v17, %v459_v45  ;;  %v4464_v11 = vpop.f32.mrb[3].mxu0 }
 0x1d7   :  { %v560_v16 = vmax.f32 %v460_v5, 0.0  ;;  %v741_v26 = vmul.f32 %v614_v18, %v559_v53 }
 0x1d9   :  { %v742_v25 = vmul.f32 %v619_v24, %v560_v16  ;;  %v5312_v16 = vld [vmem:[#allocation13 + $0x68] sm:$0xff]   ;;  %v644_v24 = vpop.permute.xlu0 %643 }
 0x1da   :  { %v464_v28 = vpop.f32.mrb[4].mxu0 }
 0x1db   :  { %v6141_v30 = vpack.c.bf16 %v742_v25, %v741_v26  ;;  %v465_v31 = vadd.f32 %v6137_v17, %v464_v28  ;;  %v4467_v32 = vpop.f32.mrb[5].mxu0  ;;  %v649_v26 = vpop.permute.xlu1 %648  ;;  %v5320_v25 = vld [vmem:[#allocation13 + $0xa8] sm:$0xff]  }
 0x1dc   :  { %v467_v35 = vpop.f32.mrb[6].mxu0 }
 0x1dd   :  { %v561_v37 = vmax.f32 %v465_v31, 0.0  ;;  %v468_v38 = vadd.f32 %v6137_v17, %v467_v35  ;;  %v4468_v39 = vpop.f32.mrb[7].mxu0  ;;  %4530 = vmatmul.mubr.bf16.vlgmr.msra.gmra.mrb[0].mxu1 %v6141_v30  ;;  %4598 = vmatmul.mubr.bf16.vlgmr.msra.gmra.mrb[52].mxu0 %v6141_v30 }
 0x1de   :  { %4650 = vmatpush3.bf16.msra.mxu1 %v5307_v29  ;;  %4533 = vmatprep.mubr.msk.bf16.mxu1 %vm5698_vm0, %v7664_v0 }
 0x1df   :  { %v562_v43 = vmax.f32 %v468_v38, 0.0  ;;  %4601 = vmatprep.mubr.msk.bf16.mxu0 %vm5698_vm0, %v7664_v0  ;;  %4651 = vmatprep.subr.bf16.mxu1 %v7664_v0  ;;  %v743_v57 = vmul.f32 %v624_v27, %v561_v37  ;;  %v5321_v38 = vld [vmem:[#allocation13 + $0xb0] sm:$0xff]  }
 0x1e0   :  { %4718 = vmatpush3.bf16.msra.mxu0 %v5313_v36  ;;  %v5315_v36 = vld [vmem:[#allocation13 + $0x70] sm:$0xff]  }
 0x1e1   :  { %v744_v63 = vmul.f32 %v629_v42, %v562_v43  ;;  %4719 = vmatprep.subr.bf16.mxu0 %v7664_v0 }
 0x1e2   :  { %v472_v44 = vpop.f32.mrb[8].mxu0  ;;  %4652 = vmatpush3.bf16.msra.mxu1 %v5308_v41 }
 0x1e3   :  { %v6153_v10 = vpack.c.bf16 %v744_v63, %v743_v57  ;;  %v473_v46 = vadd.f32 %v6137_v17, %v472_v44  ;;  %v4471_v47 = vpop.f32.mrb[9].mxu0  ;;  %4653 = vmatprep.subr.bf16.mxu1 %v7664_v0  ;;  %v654_v57 = vpop.permute.xlu0 %653  ;;  %v5322_v44 = vld [vmem:[#allocation13 + $0xb8] sm:$0xff]  }
 0x1e4   :  { %v475_v51 = vpop.f32.mrb[10].mxu0  ;;  %4720 = vmatpush3.bf16.msra.mxu0 %v5314_v48  ;;  %v5319_v48 = vld [vmem:[#allocation13 + $0x78] sm:$0xff]   ;;  %v659_v63 = vpop.permute.xlu1 %658 }
 0x1e5   :  { %v563_v54 = vmax.f32 %v473_v46, 0.0  ;;  %v476_v55 = vadd.f32 %v6137_v17, %v475_v51  ;;  %v4472_v59 = vpop.f32.mrb[11].mxu0  ;;  %4534 = vmatmul.mubr.bf16.gmra.mrb[4].mxu1 %v6153_v10  ;;  %4602 = vmatmul.mubr.bf16.gmra.mrb[56].mxu0 %v6153_v10 }
 0x1e6   :  { %4537 = vmatprep.mubr.msk.bf16.mxu1 %vm5698_vm0, %v7664_v0  ;;  %4605 = vmatprep.mubr.msk.bf16.mxu0 %vm5698_vm0, %v7664_v0 }
 0x1e7   :  { %v564_v23 = vmax.f32 %v476_v55, 0.0  ;;  %4654 = vmatpush3.bf16.msra.mxu1 %v5309_v50  ;;  %4721 = vmatprep.subr.bf16.mxu0 %v7664_v0  ;;  %v745_v9 = vmul.f32 %v634_v2, %v563_v54 }
 0x1e8   :  { %4655 = vmatprep.subr.bf16.mxu1 %v7664_v0  ;;  %4722 = vmatpush3.bf16.msra.mxu0 %v5316_v52 }
 0x1e9   :  { %v746_v12 = vmul.f32 %v639_v3, %v564_v23  ;;  %4723 = vmatprep.subr.bf16.mxu0 %v7664_v0  ;;  %v664_v3 = vpop.permute.xlu0 %663 }
 0x1ea   :  { %v480_v13 = vpop.f32.mrb[12].mxu0 }
 0x1eb   :  { %v6167_v14 = vpack.c.bf16 %v746_v12, %v745_v9  ;;  %v481_v15 = vadd.f32 %v6137_v17, %v480_v13  ;;  %v4475_v18 = vpop.f32.mrb[13].mxu0  ;;  %4656 = vmatpush3.bf16.msra.mxu1 %v5310_v60 }
 0x1ec   :  { %v483_v21 = vpop.f32.mrb[14].mxu0  ;;  %4657 = vmatprep.subr.bf16.mxu1 %v7664_v0  ;;  %4724 = vmatpush3.bf16.msra.mxu0 %v5317_v7  ;;  %v669_v7 = vpop.permute.xlu1 %668 }
 0x1ed   :  { %v565_v45 = vmax.f32 %v481_v15, 0.0  ;;  %v484_v53 = vadd.f32 %v6137_v17, %v483_v21  ;;  %v4476_v5 = vpop.f32.mrb[15].mxu0  ;;  %4538 = vmatmul.mubr.bf16.gmra.mrb[8].mxu1 %v6167_v14  ;;  %4606 = vmatmul.mubr.bf16.gmra.mrb[60].mxu0 %v6167_v14 }
 0x1ee   :  { %4541 = vmatprep.mubr.msk.bf16.mxu1 %vm5698_vm0, %v7664_v0  ;;  %4609 = vmatprep.mubr.msk.bf16.mxu0 %vm5698_vm0, %v7664_v0 }
 0x1ef   :  { %v566_v11 = vmax.f32 %v484_v53, 0.0  ;;  %4658 = vmatpush3.bf16.msra.mxu1 %v5311_v19  ;;  %4725 = vmatprep.subr.bf16.mxu0 %v7664_v0  ;;  %v747_v27 = vmul.f32 %v644_v24, %v565_v45 }
 0x1f0   :  { %4659 = vmatprep.subr.bf16.mxu1 %v7664_v0  ;;  %4726 = vmatpush3.bf16.msra.mxu0 %v5318_v22 }
 0x1f1   :  { %v748_v28 = vmul.f32 %v649_v26, %v566_v11  ;;  %4727 = vmatprep.subr.bf16.mxu0 %v7664_v0  ;;  %v674_v11 = vpop.permute.xlu0 %673 }
 0x1f2   :  { %v488_v29 = vpop.f32.mrb[16].mxu0 }
 0x1f3   :  { %v6181_v31 = vpack.c.bf16 %v748_v28, %v747_v27  ;;  %v489_v32 = vadd.f32 %v6137_v17, %v488_v29  ;;  %v4479_v35 = vpop.f32.mrb[17].mxu0  ;;  %4660 = vmatpush3.bf16.msra.mxu1 %v5312_v16  ;;  %v679_v16 = vpop.permute.xlu1 %678 }
 0x1f4   :  { %v491_v37 = vpop.f32.mrb[18].mxu0  ;;  %4661 = vmatprep.subr.bf16.mxu1 %v7664_v0  ;;  %4728 = vmatpush3.bf16.msra.mxu0 %v5320_v25 }
 0x1f5   :  { %v567_v39 = vmax.f32 %v489_v32, 0.0  ;;  %v492_v41 = vadd.f32 %v6137_v17, %v491_v37  ;;  %v4480_v43 = vpop.f32.mrb[19].mxu0  ;;  %4542 = vmatmul.mubr.bf16.gmra.mrb[12].mxu1 %v6181_v31  ;;  %4610 = vmatmul.mubr.bf16.gmra.mrb[64].mxu0 %v6181_v31 }
 0x1f6   :  { %4545 = vmatprep.mubr.msk.bf16.mxu1 %vm5698_vm0, %v7664_v0  ;;  %4613 = vmatprep.mubr.msk.bf16.mxu0 %vm5698_vm0, %v7664_v0 }
 0x1f7   :  { %v568_v42 = vmax.f32 %v492_v41, 0.0  ;;  %4662 = vmatpush3.bf16.msra.mxu1 %v5315_v36  ;;  %4729 = vmatprep.subr.bf16.mxu0 %v7664_v0  ;;  %v749_v46 = vmul.f32 %v654_v57, %v567_v39  ;;  %v684_v39 = vpop.permute.xlu0 %683  ;;  %v689_v41 = vpop.permute.xlu1 %688 }
 0x1f8   :  { %4663 = vmatprep.subr.bf16.mxu1 %v7664_v0  ;;  %4730 = vmatpush3.bf16.msra.mxu0 %v5321_v38 }
 0x1f9   :  { %v750_v47 = vmul.f32 %v659_v63, %v568_v42  ;;  %4731 = vmatprep.subr.bf16.mxu0 %v7664_v0 }
 0x1fa   :  { %v496_v50 = vpop.f32.mrb[20].mxu0 }
 0x1fb   :  { %v6195_v51 = vpack.c.bf16 %v750_v47, %v749_v46  ;;  %v497_v52 = vadd.f32 %v6137_v17, %v496_v50  ;;  %v4483_v54 = vpop.f32.mrb[21].mxu0  ;;  %4664 = vmatpush3.bf16.msra.mxu1 %v5319_v48 }
 0x1fc   :  { %v499_v55 = vpop.f32.mrb[22].mxu0  ;;  %4732 = vmatpush3.bf16.msra.mxu0 %v5322_v44  ;;  %4785 = vmatprep.subr.bf16.mxu1 %v7664_v0 }
 0x1fd   :  { %v569_v59 = vmax.f32 %v497_v52, 0.0  ;;  %v500_v23 = vadd.f32 %v6137_v17, %v499_v55  ;;  %v4484_v60 = vpop.f32.mrb[23].mxu0  ;;  %4546 = vmatmul.mubr.bf16.gmra.mrb[16].mxu1 %v6195_v51  ;;  %4614 = vmatmul.mubr.bf16.gmra.mrb[68].mxu0 %v6195_v51  ;;  %v694_v55 = vpop.permute.xlu0 %693 }
 0x1fe   :  { %4549 = vmatprep.mubr.msk.bf16.mxu1 %vm5698_vm0, %v7664_v0  ;;  %4617 = vmatprep.mubr.msk.bf16.mxu0 %vm5698_vm0, %v7664_v0 }
 0x1ff   :  { %v570_v2 = vmax.f32 %v500_v23, 0.0  ;;  %4853 = vmatprep.subr.bf16.mxu0 %v7664_v0  ;;  %v751_v9 = vmul.f32 %v664_v3, %v569_v59  ;;  %v699_v59 = vpop.permute.xlu1 %698 }
 0x201   :  { %v752_v12 = vmul.f32 %v669_v7, %v570_v2 }
 0x202   :  { %v504_v13 = vpop.f32.mrb[24].mxu0 }
 0x203   :  { %v6207_v15 = vpack.c.bf16 %v752_v12, %v751_v9  ;;  %v505_v18 = vadd.f32 %v6137_v17, %v504_v13  ;;  %v4487_v19 = vpop.f32.mrb[25].mxu0 }
 0x204   :  { %v507_v21 = vpop.f32.mrb[26].mxu0 }
 0x205   :  { %v571_v22 = vmax.f32 %v505_v18, 0.0  ;;  %v508_v45 = vadd.f32 %v6137_v17, %v507_v21  ;;  %v4488_v53 = vpop.f32.mrb[27].mxu0  ;;  %4550 = vmatmul.mubr.bf16.gmra.mrb[20].mxu1 %v6207_v15  ;;  %4618 = vmatmul.mubr.bf16.gmra.mrb[72].mxu0 %v6207_v15 }
 0x206   :  { %4553 = vmatprep.mubr.msk.bf16.mxu1 %vm5698_vm0, %v7664_v0  ;;  %4621 = vmatprep.mubr.msk.bf16.mxu0 %vm5698_vm0, %v7664_v0 }
 0x207   :  { %v572_v5 = vmax.f32 %v508_v45, 0.0  ;;  %v753_v24 = vmul.f32 %v674_v11, %v571_v22  ;;  %v704_v22 = vpop.permute.xlu0 %703  ;;  %v709_v45 = vpop.permute.xlu1 %708 }
 0x209   :  { %v754_v26 = vmul.f32 %v679_v16, %v572_v5 }
 0x20a   :  { %v512_v25 = vpop.f32.mrb[28].mxu0 }
 0x20b   :  { %v6217_v27 = vpack.c.bf16 %v754_v26, %v753_v24  ;;  %v513_v28 = vadd.f32 %v6137_v17, %v512_v25  ;;  %v4491_v29 = vpop.f32.mrb[29].mxu0 }
 0x20c   :  { %v515_v32 = vpop.f32.mrb[30].mxu0 }
 0x20d   :  { %v573_v35 = vmax.f32 %v513_v28, 0.0  ;;  %v516_v36 = vadd.f32 %v6137_v17, %v515_v32  ;;  %v4492_v37 = vpop.f32.mrb[31].mxu0  ;;  %4554 = vmatmul.mubr.bf16.gmra.mrb[24].mxu1 %v6217_v27  ;;  %4622 = vmatmul.mubr.bf16.gmra.mrb[76].mxu0 %v6217_v27 }
 0x20e   :  { %4557 = vmatprep.mubr.msk.bf16.mxu1 %vm5698_vm0, %v7664_v0  ;;  %4625 = vmatprep.mubr.msk.bf16.mxu0 %vm5698_vm0, %v7664_v0  ;;  %v719_v37 = vpop.permute.xlu1 %718 }
 0x20f   :  { %v574_v38 = vmax.f32 %v516_v36, 0.0  ;;  %v755_v43 = vmul.f32 %v684_v39, %v573_v35  ;;  %v714_v36 = vpop.permute.xlu0 %713 }
 0x211   :  { %v756_v42 = vmul.f32 %v689_v41, %v574_v38 }
 0x212   :  { %v520_v48 = vpop.f32.mrb[32].mxu0 }
 0x213   :  { %v6227_v57 = vpack.c.bf16 %v756_v42, %v755_v43  ;;  %v521_v63 = vadd.f32 %v6137_v17, %v520_v48  ;;  %v4495_v44 = vpop.f32.mrb[33].mxu0 }
 0x214   :  { %v523_v46 = vpop.f32.mrb[34].mxu0 }
 0x215   :  { %v575_v47 = vmax.f32 %v521_v63, 0.0  ;;  %v524_v50 = vadd.f32 %v6137_v17, %v523_v46  ;;  %v4496_v52 = vpop.f32.mrb[35].mxu0  ;;  %4558 = vmatmul.mubr.bf16.gmra.mrb[28].mxu1 %v6227_v57  ;;  %4626 = vmatmul.mubr.bf16.gmra.mrb[80].mxu0 %v6227_v57 }
 0x216   :  { %4561 = vmatprep.mubr.msk.bf16.mxu1 %vm5698_vm0, %v7664_v0  ;;  %4629 = vmatprep.mubr.msk.bf16.mxu0 %vm5698_vm0, %v7664_v0  ;;  %v724_v52 = vpop.permute.xlu0 %723 }
 0x217   :  { %v576_v54 = vmax.f32 %v524_v50, 0.0  ;;  %v757_v23 = vmul.f32 %v694_v55, %v575_v47 }
 0x219   :  { %v758_v60 = vmul.f32 %v699_v59, %v576_v54  ;;  %v729_v54 = vpop.permute.xlu1 %728 }
 0x21a   :  { %v528_v2 = vpop.f32.mrb[36].mxu0 }
 0x21b   :  { %v6237_v3 = vpack.c.bf16 %v758_v60, %v757_v23  ;;  %v529_v7 = vadd.f32 %v6137_v17, %v528_v2  ;;  %v4499_v9 = vpop.f32.mrb[37].mxu0 }
 0x21c   :  { %v531_v12 = vpop.f32.mrb[38].mxu0 }
 0x21d   :  { %v577_v13 = vmax.f32 %v529_v7, 0.0  ;;  %v532_v18 = vadd.f32 %v6137_v17, %v531_v12  ;;  %v4500_v19 = vpop.f32.mrb[39].mxu0  ;;  %4562 = vmatmul.mubr.bf16.gmra.mrb[32].mxu1 %v6237_v3  ;;  %4630 = vmatmul.mubr.bf16.gmra.mrb[84].mxu0 %v6237_v3 }
 0x21e   :  { %4565 = vmatprep.mubr.msk.bf16.mxu1 %vm5698_vm0, %v7664_v0  ;;  %4633 = vmatprep.mubr.msk.bf16.mxu0 %vm5698_vm0, %v7664_v0 }
 0x21f   :  { %v578_v21 = vmax.f32 %v532_v18, 0.0  ;;  %v759_v53 = vmul.f32 %v704_v22, %v577_v13  ;;  %v739_v22 = vpop.permute.xlu1 %738 }
 0x221   :  { %v760_v5 = vmul.f32 %v709_v45, %v578_v21  ;;  %v734_v21 = vpop.permute.xlu0 %733 }
 0x222   :  { %v536_v11 = vpop.f32.mrb[40].mxu0 }
 0x223   :  { %v6247_v16 = vpack.c.bf16 %v760_v5, %v759_v53  ;;  %v537_v24 = vadd.f32 %v6137_v17, %v536_v11  ;;  %v4503_v26 = vpop.f32.mrb[41].mxu0  ;;  %v5329_v11 = vld [vmem:[#allocation13 + $0x140] sm:$0xff]  }
 0x224   :  { %v539_v25 = vpop.f32.mrb[42].mxu0  ;;  %v5330_v26 = vld [vmem:[#allocation13 + $0x148] sm:$0xff]  }
 0x225   :  { %v579_v28 = vmax.f32 %v537_v24, 0.0  ;;  %v540_v29 = vadd.f32 %v6137_v17, %v539_v25  ;;  %v4504_v32 = vpop.f32.mrb[43].mxu0  ;;  %4566 = vmatmul.mubr.bf16.gmra.mrb[36].mxu1 %v6247_v16  ;;  %4634 = vmatmul.mubr.bf16.gmra.mrb[88].mxu0 %v6247_v16  ;;  %v5324_v24 = vld [vmem:[#allocation13 + $0xc8] sm:$0xff]   ;;  %v5325_v25 = vld [vmem:[#allocation13 + $0xd0] sm:$0xff]  }
 0x226   :  { %4569 = vmatprep.mubr.msk.bf16.mxu1 %vm5698_vm0, %v7664_v0  ;;  %4637 = vmatprep.mubr.msk.bf16.mxu0 %vm5698_vm0, %v7664_v0  ;;  %v5333_v32 = vld [vmem:[#allocation13 + $0x158] sm:$0xff]  }
 0x227   :  { %v580_v35 = vmax.f32 %v540_v29, 0.0  ;;  %v761_v38 = vmul.f32 %v714_v36, %v579_v28  ;;  %v5332_v28 = vld [vmem:[#allocation13 + $0x150] sm:$0xff]   ;;  %v5326_v29 = vld [vmem:[#allocation13 + $0xd8] sm:$0xff]   ;;  %v5334_v36 = vld [vmem:[#allocation13 + $0x160] sm:$0xff]  }
 0x229   :  { %v762_v39 = vmul.f32 %v719_v37, %v580_v35  ;;  %v5327_v35 = vld [vmem:[#allocation13 + $0xe0] sm:$0xff]   ;;  %v5328_v37 = vld [vmem:[#allocation13 + $0xe8] sm:$0xff]  }
 0x22a   :  { %v544_v41 = vpop.f32.mrb[44].mxu0 }
 0x22b   :  { %v6257_v43 = vpack.c.bf16 %v762_v39, %v761_v38  ;;  %v545_v42 = vadd.f32 %v6137_v17, %v544_v41  ;;  %v4507_v48 = vpop.f32.mrb[45].mxu0  ;;  %v5336_v38 = vld [vmem:[#allocation13 + $0x168] sm:$0xff]   ;;  %v5331_v39 = vld [vmem:[#allocation13 + $0xf0] sm:$0xff]  }
 0x22c   :  { %v547_v63 = vpop.f32.mrb[46].mxu0  ;;  %v5337_v41 = vld [vmem:[#allocation13 + $0x170] sm:$0xff]   ;;  %v5338_v48 = vld [vmem:[#allocation13 + $0x178] sm:$0xff]  }
 0x22d   :  { %v581_v44 = vmax.f32 %v545_v42, 0.0  ;;  %v548_v46 = vadd.f32 %v6137_v17, %v547_v63  ;;  %v4508_v47 = vpop.f32.mrb[47].mxu0  ;;  %4570 = vmatmul.mubr.bf16.gmra.mrb[40].mxu1 %v6257_v43  ;;  %4638 = vmatmul.mubr.bf16.gmra.mrb[92].mxu0 %v6257_v43  ;;  %v5335_v42 = vld [vmem:[#allocation13 + $0xf8] sm:$0xff]   ;;  %v5339_v63 = vld [vmem:[#allocation13 + $0x180] sm:$0xff]  }
 0x22e   :  { %4573 = vmatprep.mubr.msk.bf16.mxu1 %vm5698_vm0, %v7664_v0  ;;  %4641 = vmatprep.mubr.msk.bf16.mxu0 %vm5698_vm0, %v7664_v0 }
 0x22f   :  { %v582_v50 = vmax.f32 %v548_v46, 0.0  ;;  %v763_v55 = vmul.f32 %v724_v52, %v581_v44  ;;  %v1024_v44 = vlaneseq  ;;  %v5345_v46 = vld [vmem:[#allocation13 + $0x1c0] sm:$0xff]  }
 0x231   :  { %v764_v59 = vmul.f32 %v729_v54, %v582_v50  ;;  %v6383_v47 = vshrl.u32 %v1024_v44, 7  ;;  %v5340_v50 = vld [vmem:[#allocation13 + $0x188] sm:$0xff]  }
 0x232   :  { %v552_v23 = vpop.f32.mrb[48].mxu0 }
 0x233   :  { %v6267_v60 = vpack.c.bf16 %v764_v59, %v763_v55  ;;  %v553_v2 = vadd.f32 %v6137_v17, %v552_v23  ;;  %v4511_v7 = vpop.f32.mrb[49].mxu0  ;;  %v5346_v55 = vld [vmem:[#allocation13 + $0x1c8] sm:$0xff]   ;;  %vm1026_vm1 = vcmp.lt.s32.totalorder %v6383_v47, 3  ;;  %vm1747_vm2 = vcmp.lt.s32.totalorder %v6383_v47, 1 }
 0x234   :  { %v555_v9 = vpop.f32.mrb[50].mxu0  ;;  %vm1466_vm3 = vcmp.lt.s32.totalorder %v6383_v47, 2  ;;  %vm2308_vm4 = vcmp.lt.s32.totalorder %v6383_v47, 7  ;;  %vm2869_vm5 = vcmp.lt.s32.totalorder %v6383_v47, 6  ;;  %vm3150_vm6 = vcmp.lt.s32.totalorder %v6383_v47, 5 }
 0x235   :  { %v583_v12 = vmax.f32 %v553_v2, 0.0  ;;  %v556_v13 = vadd.f32 %v6137_v17, %v555_v9  ;;  %v4512_v18 = vpop.f32.mrb[51].mxu0  ;;  %4574 = vmatmul.mubr.bf16.gmra.mrb[44].mxu1 %v6267_v60  ;;  %4642 = vmatmul.mubr.bf16.gmra.mrb[96].mxu0 %v6267_v60  ;;  %v5323_v17 = vld [vmem:[#allocation13 + $0xc0] sm:$0xff]  }
 0x236   :  { %4577 = vmatprep.mubr.msk.bf16.mxu1 %vm5698_vm0, %v7664_v0  ;;  %4645 = vmatprep.mubr.msk.bf16.mxu0 %vm5698_vm0, %v7664_v0 }
 0x237   :  { %v584_v19 = vmax.f32 %v556_v13, 0.0  ;;  %v765_v45 = vmul.f32 %v734_v21, %v583_v12  ;;  %v5348_v21 = vld [vmem:[#allocation13 + $0x1d0] sm:$0xff]  }
 0x239   :  { %v766_v53 = vmul.f32 %v739_v22, %v584_v19  ;;  %v5341_v19 = vld [vmem:[#allocation13 + $0x190] sm:$0xff]  }
 0x23b   :  { %v6277_v5 = vpack.c.bf16 %v766_v53, %v765_v45  ;;  %v5342_v45 = vld [vmem:[#allocation13 + $0x198] sm:$0xff]  }
 0x23d   :  { %4578 = vmatmul.mubr.bf16.gmra.mrb[48].mxu1 %v6277_v5  ;;  %4646 = vmatmul.mubr.bf16.gmra.mrb[100].mxu0 %v6277_v5 }
 0x23e   :  { %4665 = vmatprep.mubr.msk.bf16.mxu1 %vm5698_vm0, %v7664_v0  ;;  %4733 = vmatprep.mubr.msk.bf16.mxu0 %vm5698_vm0, %v7664_v0 }
 0x245   :  { %4666 = vmatmul.mubr.bf16.vlgmr.msra.gmra.mrb[52].mxu1 %v6141_v30  ;;  %4734 = vmatmul.mubr.bf16.vlgmr.msra.gmra.mrb[104].mxu0 %v6141_v30 }
 0x246   :  { %4786 = vmatpush3.bf16.msra.mxu1 %v5323_v17  ;;  %4669 = vmatprep.mubr.msk.bf16.mxu1 %vm5698_vm0, %v7664_v0 }
 0x247   :  { %4737 = vmatprep.mubr.msk.bf16.mxu0 %vm5698_vm0, %v7664_v0  ;;  %4787 = vmatprep.subr.bf16.mxu1 %v7664_v0 }
 0x248   :  { %4854 = vmatpush3.bf16.msra.mxu0 %v5329_v11  ;;  %v5349_v11 = vld [vmem:[#allocation13 + $0x1d8] sm:$0xff]  }
 0x249   :  { %4855 = vmatprep.subr.bf16.mxu0 %v7664_v0 }
 0x24a   :  { %4788 = vmatpush3.bf16.msra.mxu1 %v5324_v24 }
 0x24b   :  { %4789 = vmatprep.subr.bf16.mxu1 %v7664_v0 }
 0x24c   :  { %4856 = vmatpush3.bf16.msra.mxu0 %v5330_v26 }
 0x24d   :  { %4670 = vmatmul.mubr.bf16.gmra.mrb[56].mxu1 %v6153_v10  ;;  %4738 = vmatmul.mubr.bf16.gmra.mrb[108].mxu0 %v6153_v10 }
 0x24e   :  { %4673 = vmatprep.mubr.msk.bf16.mxu1 %vm5698_vm0, %v7664_v0  ;;  %4741 = vmatprep.mubr.msk.bf16.mxu0 %vm5698_vm0, %v7664_v0 }
 0x24f   :  { %4790 = vmatpush3.bf16.msra.mxu1 %v5325_v25  ;;  %4857 = vmatprep.subr.bf16.mxu0 %v7664_v0 }
 0x250   :  { %4791 = vmatprep.subr.bf16.mxu1 %v7664_v0  ;;  %4858 = vmatpush3.bf16.msra.mxu0 %v5332_v28 }
 0x251   :  { %4859 = vmatprep.subr.bf16.mxu0 %v7664_v0 }
 0x253   :  { %4792 = vmatpush3.bf16.msra.mxu1 %v5326_v29 }
 0x254   :  { %4793 = vmatprep.subr.bf16.mxu1 %v7664_v0  ;;  %4860 = vmatpush3.bf16.msra.mxu0 %v5333_v32 }
 0x255   :  { %4674 = vmatmul.mubr.bf16.gmra.mrb[60].mxu1 %v6167_v14  ;;  %4742 = vmatmul.mubr.bf16.gmra.mrb[112].mxu0 %v6167_v14 }
 0x256   :  { %4677 = vmatprep.mubr.msk.bf16.mxu1 %vm5698_vm0, %v7664_v0  ;;  %4745 = vmatprep.mubr.msk.bf16.mxu0 %vm5698_vm0, %v7664_v0 }
 0x257   :  { %4794 = vmatpush3.bf16.msra.mxu1 %v5327_v35  ;;  %4861 = vmatprep.subr.bf16.mxu0 %v7664_v0 }
 0x258   :  { %4795 = vmatprep.subr.bf16.mxu1 %v7664_v0  ;;  %4862 = vmatpush3.bf16.msra.mxu0 %v5334_v36 }
 0x259   :  { %4863 = vmatprep.subr.bf16.mxu0 %v7664_v0 }
 0x25b   :  { %4796 = vmatpush3.bf16.msra.mxu1 %v5328_v37 }
 0x25c   :  { %4797 = vmatprep.subr.bf16.mxu1 %v7664_v0  ;;  %4864 = vmatpush3.bf16.msra.mxu0 %v5336_v38 }
 0x25d   :  { %4678 = vmatmul.mubr.bf16.gmra.mrb[64].mxu1 %v6181_v31  ;;  %4746 = vmatmul.mubr.bf16.gmra.mrb[116].mxu0 %v6181_v31 }
 0x25e   :  { %4681 = vmatprep.mubr.msk.bf16.mxu1 %vm5698_vm0, %v7664_v0  ;;  %4749 = vmatprep.mubr.msk.bf16.mxu0 %vm5698_vm0, %v7664_v0 }
 0x25f   :  { %4798 = vmatpush3.bf16.msra.mxu1 %v5331_v39  ;;  %4865 = vmatprep.subr.bf16.mxu0 %v7664_v0  ;;  %v5343_v39 = vld [vmem:[#allocation13 + $0x1a0] sm:$0xff]  }
 0x260   :  { %4799 = vmatprep.subr.bf16.mxu1 %v7664_v0  ;;  %4866 = vmatpush3.bf16.msra.mxu0 %v5337_v41 }
 0x261   :  { %4867 = vmatprep.subr.bf16.mxu0 %v7664_v0 }
 0x263   :  { %4800 = vmatpush3.bf16.msra.mxu1 %v5335_v42  ;;  %v5350_v42 = vld [vmem:[#allocation13 + $0x1e0] sm:$0xff]  }
 0x264   :  { %4868 = vmatpush3.bf16.msra.mxu0 %v5338_v48  ;;  %4921 = vmatprep.subr.bf16.mxu1 %v7664_v0 }
 0x265   :  { %4682 = vmatmul.mubr.bf16.gmra.mrb[68].mxu1 %v6195_v51  ;;  %4750 = vmatmul.mubr.bf16.gmra.mrb[120].mxu0 %v6195_v51 }
 0x266   :  { %4685 = vmatprep.mubr.msk.bf16.mxu1 %vm5698_vm0, %v7664_v0  ;;  %4753 = vmatprep.mubr.msk.bf16.mxu0 %vm5698_vm0, %v7664_v0 }
 0x267   :  { %4989 = vmatprep.subr.bf16.mxu0 %v7664_v0 }
 0x26d   :  { %4686 = vmatmul.mubr.bf16.gmra.mrb[72].mxu1 %v6207_v15  ;;  %4754 = vmatmul.mubr.bf16.gmra.mrb[124].mxu0 %v6207_v15 }
 0x26e   :  { %4689 = vmatprep.mubr.msk.bf16.mxu1 %vm5698_vm0, %v7664_v0  ;;  %4757 = vmatprep.mubr.msk.bf16.mxu0 %vm5698_vm0, %v7664_v0 }
 0x275   :  { %4690 = vmatmul.mubr.bf16.gmra.mrb[76].mxu1 %v6217_v27  ;;  %4758 = vmatmul.mubr.bf16.gmra.mrb[128].mxu0 %v6217_v27 }
 0x276   :  { %4693 = vmatprep.mubr.msk.bf16.mxu1 %vm5698_vm0, %v7664_v0  ;;  %4761 = vmatprep.mubr.msk.bf16.mxu0 %vm5698_vm0, %v7664_v0 }
 0x27d   :  { %4694 = vmatmul.mubr.bf16.gmra.mrb[80].mxu1 %v6227_v57  ;;  %4762 = vmatmul.mubr.bf16.gmra.mrb[132].mxu0 %v6227_v57 }
 0x27e   :  { %4697 = vmatprep.mubr.msk.bf16.mxu1 %vm5698_vm0, %v7664_v0  ;;  %4765 = vmatprep.mubr.msk.bf16.mxu0 %vm5698_vm0, %v7664_v0 }
 0x285   :  { %4698 = vmatmul.mubr.bf16.gmra.mrb[84].mxu1 %v6237_v3  ;;  %4766 = vmatmul.mubr.bf16.gmra.mrb[136].mxu0 %v6237_v3 }
 0x286   :  { %4701 = vmatprep.mubr.msk.bf16.mxu1 %vm5698_vm0, %v7664_v0  ;;  %4769 = vmatprep.mubr.msk.bf16.mxu0 %vm5698_vm0, %v7664_v0 }
 0x28d   :  { %4702 = vmatmul.mubr.bf16.gmra.mrb[88].mxu1 %v6247_v16  ;;  %4770 = vmatmul.mubr.bf16.gmra.mrb[140].mxu0 %v6247_v16 }
 0x28e   :  { %4705 = vmatprep.mubr.msk.bf16.mxu1 %vm5698_vm0, %v7664_v0  ;;  %4773 = vmatprep.mubr.msk.bf16.mxu0 %vm5698_vm0, %v7664_v0 }
 0x295   :  { %4706 = vmatmul.mubr.bf16.gmra.mrb[92].mxu1 %v6257_v43  ;;  %4774 = vmatmul.mubr.bf16.gmra.mrb[144].mxu0 %v6257_v43 }
 0x296   :  { %4709 = vmatprep.mubr.msk.bf16.mxu1 %vm5698_vm0, %v7664_v0  ;;  %4777 = vmatprep.mubr.msk.bf16.mxu0 %vm5698_vm0, %v7664_v0 }
 0x29d   :  { %4710 = vmatmul.mubr.bf16.gmra.mrb[96].mxu1 %v6267_v60  ;;  %4778 = vmatmul.mubr.bf16.gmra.mrb[148].mxu0 %v6267_v60 }
 0x29e   :  { %4713 = vmatprep.mubr.msk.bf16.mxu1 %vm5698_vm0, %v7664_v0  ;;  %4781 = vmatprep.mubr.msk.bf16.mxu0 %vm5698_vm0, %v7664_v0 }
 0x2a5   :  { %4714 = vmatmul.mubr.bf16.gmra.mrb[100].mxu1 %v6277_v5  ;;  %4782 = vmatmul.mubr.bf16.gmra.mrb[152].mxu0 %v6277_v5 }
 0x2a6   :  { %4801 = vmatprep.mubr.msk.bf16.mxu1 %vm5698_vm0, %v7664_v0  ;;  %4869 = vmatprep.mubr.msk.bf16.mxu0 %vm5698_vm0, %v7664_v0 }
 0x2ad   :  { %4802 = vmatmul.mubr.bf16.vlgmr.msra.gmra.mrb[104].mxu1 %v6141_v30  ;;  %4870 = vmatmul.mubr.bf16.vlgmr.msra.gmra.mrb[156].mxu0 %v6141_v30 }
 0x2ae   :  { %4922 = vmatpush3.bf16.msra.mxu1 %v5339_v63  ;;  %4805 = vmatprep.mubr.msk.bf16.mxu1 %vm5698_vm0, %v7664_v0  ;;  %v5344_v63 = vld [vmem:[#allocation13 + $0x1a8] sm:$0xff]  }
 0x2af   :  { %4873 = vmatprep.mubr.msk.bf16.mxu0 %vm5698_vm0, %v7664_v0  ;;  %4923 = vmatprep.subr.bf16.mxu1 %v7664_v0 }
 0x2b0   :  { %v6388_v52 = vpop.f32.mrb[0].mxu1  ;;  %v6390_v54 = vpop.f32.mrb[52].mxu0  ;;  %4990 = vmatpush3.bf16.msra.mxu0 %v5345_v46 }
 0x2b1   :  { %v4531_v59 = vpop.f32.mrb[1].mxu1  ;;  %v4599_v23 = vpop.f32.mrb[53].mxu0  ;;  %4991 = vmatprep.subr.bf16.mxu0 %v7664_v0  ;;  %v7658_v9 = vrot.slane %v6388_v52, 5 }
 0x2b2   :  { %v898_v2 = vpop.f32.mrb[2].mxu1  ;;  %v6393_v7 = vpop.f32.mrb[54].mxu0  ;;  %4924 = vmatpush3.bf16.msra.mxu1 %v5340_v50  ;;  %v5352_v50 = vld [vmem:[#allocation13 + $0x1e8] sm:$0xff]  }
 0x2b3   :  { %v999_v12 = vrot.slane %v898_v2, 5  ;;  %v4532_v13 = vpop.f32.mrb[3].mxu1  ;;  %v4600_v18 = vpop.f32.mrb[55].mxu0  ;;  %4925 = vmatprep.subr.bf16.mxu1 %v7664_v0 }
 0x2b4   :  { %4992 = vmatpush3.bf16.msra.mxu0 %v5346_v55 }
 0x2b5   :  { %4806 = vmatmul.mubr.bf16.gmra.mrb[108].mxu1 %v6153_v10  ;;  %4874 = vmatmul.mubr.bf16.gmra.mrb[160].mxu0 %v6153_v10  ;;  %v1051_v22 = vsel %vm1026_vm1, %v7658_v9, %v999_v12 }
 0x2b6   :  { %4809 = vmatprep.mubr.msk.bf16.mxu1 %vm5698_vm0, %v7664_v0  ;;  %4877 = vmatprep.mubr.msk.bf16.mxu0 %vm5698_vm0, %v7664_v0 }
 0x2b7   :  { %4926 = vmatpush3.bf16.msra.mxu1 %v5341_v19  ;;  %4993 = vmatprep.subr.bf16.mxu0 %v7664_v0 }
 0x2b8   :  { %v903_v53 = vpop.f32.mrb[4].mxu1  ;;  %v1143_v17 = vpop.f32.mrb[56].mxu0  ;;  %4927 = vmatprep.subr.bf16.mxu1 %v7664_v0  ;;  %4994 = vmatpush3.bf16.msra.mxu0 %v5348_v21 }
 0x2b9   :  { %v1000_v24 = vrot.slane %v903_v53, 5  ;;  %v6410_v26 = vadd.f32 %v1143_v17, %v1051_v22  ;;  %v4535_v25 = vpop.f32.mrb[5].mxu1  ;;  %v4603_v28 = vpop.f32.mrb[57].mxu0  ;;  %4995 = vmatprep.subr.bf16.mxu0 %v7664_v0  ;;  %v5353_v17 = vld [vmem:[#allocation13 + $0x1f0] sm:$0xff]  }
 0x2ba   :  { %v906_v29 = vpop.f32.mrb[6].mxu1  ;;  %v1146_v32 = vpop.f32.mrb[58].mxu0 }
 0x2bb   :  { %v1001_v35 = vrot.slane %v906_v29, 5  ;;  %v1050_v36 = vsel %vm1026_vm1, %v999_v12, %v1000_v24  ;;  %v4536_v37 = vpop.f32.mrb[7].mxu1  ;;  %v4604_v38 = vpop.f32.mrb[59].mxu0  ;;  %4928 = vmatpush3.bf16.msra.mxu1 %v5342_v45  ;;  %v5347_v45 = vld [vmem:[#allocation13 + $0x1b0] sm:$0xff]   ;;  %v5354_v29 = vld [vmem:[#allocation13 + $0x1f8] sm:$0xff]  }
 0x2bc   :  { %v6415_v41 = vadd.f32 %v1146_v32, %v1050_v36  ;;  %4929 = vmatprep.subr.bf16.mxu1 %v7664_v0  ;;  %4996 = vmatpush3.bf16.msra.mxu0 %v5349_v11 }
 0x2bd   :  { %4810 = vmatmul.mubr.bf16.gmra.mrb[112].mxu1 %v6167_v14  ;;  %4878 = vmatmul.mubr.bf16.gmra.mrb[164].mxu0 %v6167_v14  ;;  %v1049_v48 = vsel %vm1026_vm1, %v1000_v24, %v1001_v35  ;;  %v5351_v24 = vld [vmem:[#allocation13 + $0x1b8] sm:$0xff]  }
 0x2be   :  { %4813 = vmatprep.mubr.msk.bf16.mxu1 %vm5698_vm0, %v7664_v0  ;;  %4881 = vmatprep.mubr.msk.bf16.mxu0 %vm5698_vm0, %v7664_v0 }
 0x2bf   :  { %4930 = vmatpush3.bf16.msra.mxu1 %v5343_v39  ;;  %4997 = vmatprep.subr.bf16.mxu0 %v7664_v0 }
 0x2c0   :  { %v911_v44 = vpop.f32.mrb[8].mxu1  ;;  %v1151_v46 = vpop.f32.mrb[60].mxu0  ;;  %4931 = vmatprep.subr.bf16.mxu1 %v7664_v0  ;;  %4998 = vmatpush3.bf16.msra.mxu0 %v5350_v42 }
 0x2c1   :  { %v1002_v55 = vrot.slane %v911_v44, 5  ;;  %v6428_v59 = vadd.f32 %v1151_v46, %v1049_v48  ;;  %v4539_v23 = vpop.f32.mrb[9].mxu1  ;;  %v4607_v2 = vpop.f32.mrb[61].mxu0  ;;  %4999 = vmatprep.subr.bf16.mxu0 %v7664_v0 }
 0x2c2   :  { %v914_v12 = vpop.f32.mrb[10].mxu1  ;;  %v1154_v13 = vpop.f32.mrb[62].mxu0 }
 0x2c3   :  { %v1003_v18 = vrot.slane %v914_v12, 5  ;;  %v1048_v19 = vsel %vm1026_vm1, %v1001_v35, %v1002_v55  ;;  %v4540_v21 = vpop.f32.mrb[11].mxu1  ;;  %v4608_v22 = vpop.f32.mrb[63].mxu0  ;;  %4932 = vmatpush3.bf16.msra.mxu1 %v5344_v63 }
 0x2c4   :  { %v6433_v53 = vadd.f32 %v1154_v13, %v1048_v19  ;;  %4933 = vmatprep.subr.bf16.mxu1 %v7664_v0  ;;  %5000 = vmatpush3.bf16.msra.mxu0 %v5352_v50 }
 0x2c5   :  { %4814 = vmatmul.mubr.bf16.gmra.mrb[116].mxu1 %v6181_v31  ;;  %4882 = vmatmul.mubr.bf16.gmra.mrb[168].mxu0 %v6181_v31  ;;  %v1047_v11 = vsel %vm1026_vm1, %v1002_v55, %v1003_v18 }
 0x2c6   :  { %4817 = vmatprep.mubr.msk.bf16.mxu1 %vm5698_vm0, %v7664_v0  ;;  %4885 = vmatprep.mubr.msk.bf16.mxu0 %vm5698_vm0, %v7664_v0 }
 0x2c7   :  { %4934 = vmatpush3.bf16.msra.mxu1 %v5347_v45  ;;  %5001 = vmatprep.subr.bf16.mxu0 %v7664_v0 }
 0x2c8   :  { %v919_v25 = vpop.f32.mrb[12].mxu1  ;;  %v1159_v28 = vpop.f32.mrb[64].mxu0  ;;  %4935 = vmatprep.subr.bf16.mxu1 %v7664_v0  ;;  %5002 = vmatpush3.bf16.msra.mxu0 %v5353_v17 }
 0x2c9   :  { %v1004_v32 = vrot.slane %v919_v25, 5  ;;  %v6446_v35 = vadd.f32 %v1159_v28, %v1047_v11  ;;  %v4543_v36 = vpop.f32.mrb[13].mxu1  ;;  %v4611_v37 = vpop.f32.mrb[65].mxu0  ;;  %5003 = vmatprep.subr.bf16.mxu0 %v7664_v0 }
 0x2ca   :  { %v922_v38 = vpop.f32.mrb[14].mxu1  ;;  %v1162_v39 = vpop.f32.mrb[66].mxu0 }
 0x2cb   :  { %v1005_v42 = vrot.slane %v922_v38, 5  ;;  %v1046_v48 = vsel %vm1026_vm1, %v1003_v18, %v1004_v32  ;;  %v4544_v63 = vpop.f32.mrb[15].mxu1  ;;  %v4612_v44 = vpop.f32.mrb[67].mxu0  ;;  %4936 = vmatpush3.bf16.msra.mxu1 %v5351_v24 }
 0x2cc   :  { %v6451_v46 = vadd.f32 %v1162_v39, %v1046_v48  ;;  %5004 = vmatpush3.bf16.msra.mxu0 %v5354_v29  ;;  %5057 = vmatprep.subr.bf16.mxu1 %v7664_v0 }
 0x2cd   :  { %4818 = vmatmul.mubr.bf16.gmra.mrb[120].mxu1 %v6195_v51  ;;  %4886 = vmatmul.mubr.bf16.gmra.mrb[172].mxu0 %v6195_v51  ;;  %v1045_v50 = vsel %vm1026_vm1, %v1004_v32, %v1005_v42 }
 0x2ce   :  { %4821 = vmatprep.mubr.msk.bf16.mxu1 %vm5698_vm0, %v7664_v0  ;;  %4889 = vmatprep.mubr.msk.bf16.mxu0 %vm5698_vm0, %v7664_v0 }
 0x2cf   :  { %5125 = vmatprep.subr.bf16.mxu0 %v7664_v0 }
 0x2d0   :  { %v927_v55 = vpop.f32.mrb[16].mxu1  ;;  %v1167_v23 = vpop.f32.mrb[68].mxu0 }
 0x2d1   :  { %v1006_v2 = vrot.slane %v927_v55, 5  ;;  %v6463_v12 = vadd.f32 %v1167_v23, %v1045_v50  ;;  %v4547_v13 = vpop.f32.mrb[17].mxu1  ;;  %v4615_v18 = vpop.f32.mrb[69].mxu0 }
 0x2d2   :  { %v930_v19 = vpop.f32.mrb[18].mxu1  ;;  %v1170_v21 = vpop.f32.mrb[70].mxu0 }
 0x2d3   :  { %v1007_v22 = vrot.slane %v930_v19, 5  ;;  %v1044_v45 = vsel %vm1026_vm1, %v1005_v42, %v1006_v2  ;;  %v4548_v17 = vpop.f32.mrb[19].mxu1  ;;  %v4616_v11 = vpop.f32.mrb[71].mxu0 }
 0x2d4   :  { %v6467_v24 = vadd.f32 %v1170_v21, %v1044_v45 }
 0x2d5   :  { %4822 = vmatmul.mubr.bf16.gmra.mrb[124].mxu1 %v6207_v15  ;;  %4890 = vmatmul.mubr.bf16.gmra.mrb[176].mxu0 %v6207_v15  ;;  %v1043_v25 = vsel %vm1026_vm1, %v1006_v2, %v1007_v22 }
 0x2d6   :  { %4825 = vmatprep.mubr.msk.bf16.mxu1 %vm5698_vm0, %v7664_v0  ;;  %4893 = vmatprep.mubr.msk.bf16.mxu0 %vm5698_vm0, %v7664_v0 }
 0x2d8   :  { %v935_v28 = vpop.f32.mrb[20].mxu1  ;;  %v1175_v29 = vpop.f32.mrb[72].mxu0 }
 0x2d9   :  { %v1008_v32 = vrot.slane %v935_v28, 5  ;;  %v6477_v36 = vadd.f32 %v1175_v29, %v1043_v25  ;;  %v4551_v37 = vpop.f32.mrb[21].mxu1  ;;  %v4619_v38 = vpop.f32.mrb[73].mxu0 }
 0x2da   :  { %v938_v39 = vpop.f32.mrb[22].mxu1  ;;  %v1178_v42 = vpop.f32.mrb[74].mxu0 }
 0x2db   :  { %v1009_v48 = vrot.slane %v938_v39, 5  ;;  %v1042_v63 = vsel %vm1026_vm1, %v1007_v22, %v1008_v32  ;;  %v4552_v44 = vpop.f32.mrb[23].mxu1  ;;  %v4620_v50 = vpop.f32.mrb[75].mxu0 }
 0x2dc   :  { %v6481_v55 = vadd.f32 %v1178_v42, %v1042_v63 }
 0x2dd   :  { %4826 = vmatmul.mubr.bf16.gmra.mrb[128].mxu1 %v6217_v27  ;;  %4894 = vmatmul.mubr.bf16.gmra.mrb[180].mxu0 %v6217_v27  ;;  %v1041_v23 = vsel %vm1026_vm1, %v1008_v32, %v1009_v48 }
 0x2de   :  { %4829 = vmatprep.mubr.msk.bf16.mxu1 %vm5698_vm0, %v7664_v0  ;;  %4897 = vmatprep.mubr.msk.bf16.mxu0 %vm5698_vm0, %v7664_v0 }
 0x2e0   :  { %v943_v2 = vpop.f32.mrb[24].mxu1  ;;  %v1183_v13 = vpop.f32.mrb[76].mxu0 }
 0x2e1   :  { %v1010_v18 = vrot.slane %v943_v2, 5  ;;  %v6491_v19 = vadd.f32 %v1183_v13, %v1041_v23  ;;  %v4555_v21 = vpop.f32.mrb[25].mxu1  ;;  %v4623_v22 = vpop.f32.mrb[77].mxu0 }
 0x2e2   :  { %v946_v45 = vpop.f32.mrb[26].mxu1  ;;  %v1186_v17 = vpop.f32.mrb[78].mxu0 }
 0x2e3   :  { %v1011_v11 = vrot.slane %v946_v45, 5  ;;  %v1040_v25 = vsel %vm1026_vm1, %v1009_v48, %v1010_v18  ;;  %v4556_v28 = vpop.f32.mrb[27].mxu1  ;;  %v4624_v29 = vpop.f32.mrb[79].mxu0 }
 0x2e4   :  { %v6495_v32 = vadd.f32 %v1186_v17, %v1040_v25 }
 0x2e5   :  { %4830 = vmatmul.mubr.bf16.gmra.mrb[132].mxu1 %v6227_v57  ;;  %4898 = vmatmul.mubr.bf16.gmra.mrb[184].mxu0 %v6227_v57  ;;  %v1039_v37 = vsel %vm1026_vm1, %v1010_v18, %v1011_v11 }
 0x2e6   :  { %4833 = vmatprep.mubr.msk.bf16.mxu1 %vm5698_vm0, %v7664_v0  ;;  %4901 = vmatprep.mubr.msk.bf16.mxu0 %vm5698_vm0, %v7664_v0 }
 0x2e8   :  { %v951_v38 = vpop.f32.mrb[28].mxu1  ;;  %v1191_v39 = vpop.f32.mrb[80].mxu0 }
 0x2e9   :  { %v1012_v42 = vrot.slane %v951_v38, 5  ;;  %v6505_v48 = vadd.f32 %v1191_v39, %v1039_v37  ;;  %v4559_v63 = vpop.f32.mrb[29].mxu1  ;;  %v4627_v44 = vpop.f32.mrb[81].mxu0 }
 0x2ea   :  { %v954_v50 = vpop.f32.mrb[30].mxu1  ;;  %v1194_v23 = vpop.f32.mrb[82].mxu0 }
 0x2eb   :  { %v1013_v2 = vrot.slane %v954_v50, 5  ;;  %v1038_v13 = vsel %vm1026_vm1, %v1011_v11, %v1012_v42  ;;  %v4560_v18 = vpop.f32.mrb[31].mxu1  ;;  %v4628_v21 = vpop.f32.mrb[83].mxu0 }
 0x2ec   :  { %v6509_v22 = vadd.f32 %v1194_v23, %v1038_v13 }
 0x2ed   :  { %4834 = vmatmul.mubr.bf16.gmra.mrb[136].mxu1 %v6237_v3  ;;  %4902 = vmatmul.mubr.bf16.gmra.mrb[188].mxu0 %v6237_v3  ;;  %v1037_v45 = vsel %vm1026_vm1, %v1012_v42, %v1013_v2 }
 0x2ee   :  { %4837 = vmatprep.mubr.msk.bf16.mxu1 %vm5698_vm0, %v7664_v0  ;;  %4905 = vmatprep.mubr.msk.bf16.mxu0 %vm5698_vm0, %v7664_v0 }
 0x2f0   :  { %v959_v17 = vpop.f32.mrb[32].mxu1  ;;  %v1199_v25 = vpop.f32.mrb[84].mxu0 }
 0x2f1   :  { %v1014_v11 = vrot.slane %v959_v17, 5  ;;  %v6519_v28 = vadd.f32 %v1199_v25, %v1037_v45  ;;  %v4563_v29 = vpop.f32.mrb[33].mxu1  ;;  %v4631_v37 = vpop.f32.mrb[85].mxu0 }
 0x2f2   :  { %v962_v38 = vpop.f32.mrb[34].mxu1  ;;  %v1202_v39 = vpop.f32.mrb[86].mxu0 }
 0x2f3   :  { %v1015_v63 = vrot.slane %v962_v38, 5  ;;  %v1036_v44 = vsel %vm1026_vm1, %v1013_v2, %v1014_v11  ;;  %v4564_v42 = vpop.f32.mrb[35].mxu1  ;;  %v4632_v50 = vpop.f32.mrb[87].mxu0 }
 0x2f4   :  { %v6523_v23 = vadd.f32 %v1202_v39, %v1036_v44 }
 0x2f5   :  { %4838 = vmatmul.mubr.bf16.gmra.mrb[140].mxu1 %v6247_v16  ;;  %4906 = vmatmul.mubr.bf16.gmra.mrb[192].mxu0 %v6247_v16  ;;  %v1035_v13 = vsel %vm1026_vm1, %v1014_v11, %v1015_v63 }
 0x2f6   :  { %4841 = vmatprep.mubr.msk.bf16.mxu1 %vm5698_vm0, %v7664_v0  ;;  %4909 = vmatprep.mubr.msk.bf16.mxu0 %vm5698_vm0, %v7664_v0 }
 0x2f8   :  { %v967_v18 = vpop.f32.mrb[36].mxu1  ;;  %v1207_v21 = vpop.f32.mrb[88].mxu0 }
 0x2f9   :  { %v1016_v2 = vrot.slane %v967_v18, 5  ;;  %v6533_v45 = vadd.f32 %v1207_v21, %v1035_v13  ;;  %v4567_v17 = vpop.f32.mrb[37].mxu1  ;;  %v4635_v25 = vpop.f32.mrb[89].mxu0 }
 0x2fa   :  { %v970_v29 = vpop.f32.mrb[38].mxu1  ;;  %v1210_v37 = vpop.f32.mrb[90].mxu0 }
 0x2fb   :  { %v1017_v38 = vrot.slane %v970_v29, 5  ;;  %v1034_v39 = vsel %vm1026_vm1, %v1015_v63, %v1016_v2  ;;  %v4568_v11 = vpop.f32.mrb[39].mxu1  ;;  %v4636_v44 = vpop.f32.mrb[91].mxu0 }
 0x2fc   :  { %v6537_v42 = vadd.f32 %v1210_v37, %v1034_v39 }
 0x2fd   :  { %4842 = vmatmul.mubr.bf16.gmra.mrb[144].mxu1 %v6257_v43  ;;  %4910 = vmatmul.mubr.bf16.gmra.mrb[196].mxu0 %v6257_v43  ;;  %v1033_v50 = vsel %vm1026_vm1, %v1016_v2, %v1017_v38 }
 0x2fe   :  { %4845 = vmatprep.mubr.msk.bf16.mxu1 %vm5698_vm0, %v7664_v0  ;;  %4913 = vmatprep.mubr.msk.bf16.mxu0 %vm5698_vm0, %v7664_v0 }
 0x300   :  { %v975_v13 = vpop.f32.mrb[40].mxu1  ;;  %v1215_v18 = vpop.f32.mrb[92].mxu0 }
 0x301   :  { %v1018_v63 = vrot.slane %v975_v13, 5  ;;  %v6547_v21 = vadd.f32 %v1215_v18, %v1033_v50  ;;  %v4571_v17 = vpop.f32.mrb[41].mxu1  ;;  %v4639_v25 = vpop.f32.mrb[93].mxu0 }
 0x302   :  { %v978_v29 = vpop.f32.mrb[42].mxu1  ;;  %v1218_v37 = vpop.f32.mrb[94].mxu0 }
 0x303   :  { %v1019_v39 = vrot.slane %v978_v29, 5  ;;  %v1032_v11 = vsel %vm1026_vm1, %v1017_v38, %v1018_v63  ;;  %v4572_v2 = vpop.f32.mrb[43].mxu1  ;;  %v4640_v44 = vpop.f32.mrb[95].mxu0 }
 0x304   :  { %v6551_v9 = vadd.f32 %v1218_v37, %v1032_v11 }
 0x305   :  { %4846 = vmatmul.mubr.bf16.gmra.mrb[148].mxu1 %v6267_v60  ;;  %4914 = vmatmul.mubr.bf16.gmra.mrb[200].mxu0 %v6267_v60  ;;  %v1031_v50 = vsel %vm1026_vm1, %v1018_v63, %v1019_v39 }
 0x306   :  { %4849 = vmatprep.mubr.msk.bf16.mxu1 %vm5698_vm0, %v7664_v0  ;;  %4917 = vmatprep.mubr.msk.bf16.mxu0 %vm5698_vm0, %v7664_v0 }
 0x308   :  { %v983_v13 = vpop.f32.mrb[44].mxu1  ;;  %v1223_v18 = vpop.f32.mrb[96].mxu0 }
 0x309   :  { %v1020_v38 = vrot.slane %v983_v13, 5  ;;  %v6561_v17 = vadd.f32 %v1223_v18, %v1031_v50  ;;  %v4575_v25 = vpop.f32.mrb[45].mxu1  ;;  %v4643_v29 = vpop.f32.mrb[97].mxu0 }
 0x30a   :  { %v986_v37 = vpop.f32.mrb[46].mxu1  ;;  %v1226_v11 = vpop.f32.mrb[98].mxu0 }
 0x30b   :  { %v1021_v2 = vrot.slane %v986_v37, 5  ;;  %v1030_v44 = vsel %vm1026_vm1, %v1019_v39, %v1020_v38  ;;  %v4576_v63 = vpop.f32.mrb[47].mxu1  ;;  %v4644_v33 = vpop.f32.mrb[99].mxu0 }
 0x30c   :  { %v6565_v20 = vadd.f32 %v1226_v11, %v1030_v44  ;;  %v5355_v44 = vld [vmem:[#allocation13 + $0x200] sm:$0xff]  }
 0x30d   :  { %4850 = vmatmul.mubr.bf16.gmra.mrb[152].mxu1 %v6277_v5  ;;  %4918 = vmatmul.mubr.bf16.gmra.mrb[204].mxu0 %v6277_v5  ;;  %v1029_v50 = vsel %vm1026_vm1, %v1020_v38, %v1021_v2 }
 0x30e   :  { %4937 = vmatprep.mubr.msk.bf16.mxu1 %vm5698_vm0, %v7664_v0  ;;  %5005 = vmatprep.mubr.msk.bf16.mxu0 %vm5698_vm0, %v7664_v0 }
 0x310   :  { %v991_v13 = vpop.f32.mrb[48].mxu1  ;;  %v1231_v18 = vpop.f32.mrb[100].mxu0 }
 0x311   :  { %v1022_v39 = vrot.slane %v991_v13, 5  ;;  %v6575_v25 = vadd.f32 %v1231_v18, %v1029_v50  ;;  %v4579_v33 = vpop.f32.mrb[49].mxu1  ;;  %v4647_v29 = vpop.f32.mrb[101].mxu0  ;;  %v7685_v13 = vrot.slane %v6388_v52, 5  ;;  %v7686_v18 = vmov 0.0  }
 0x312   :  { %v994_v37 = vpop.f32.mrb[50].mxu1  ;;  %v1234_v11 = vpop.f32.mrb[102].mxu0 }
 0x313   :  { %v1023_v63 = vrot.slane %v994_v37, 5  ;;  %v1028_v38 = vsel %vm1026_vm1, %v1021_v2, %v1022_v39  ;;  %v4580_v6 = vpop.f32.mrb[51].mxu1  ;;  %v4648_v61 = vpop.f32.mrb[103].mxu0 }
 0x314   :  { %v6579_v40 = vadd.f32 %v1234_v11, %v1028_v38  ;;  %v5356_v6 = vld [vmem:[#allocation13 + $0x208] sm:$0xff]  }
 0x315   :  { %v1027_v0 = vsel %vm1026_vm1, %v1022_v39, %v1023_v63  ;;  %v1052_v50 = vsel %vm1026_vm1, %v1023_v63, %v7685_v13  ;;  %4938 = vmatmul.mubr.bf16.vlgmr.msra.gmra.mrb[156].mxu1 %v6141_v30  ;;  %5006 = vmatmul.mubr.bf16.vlgmr.msra.gmra.mrb[208].mxu0 %v6141_v30 }
 0x316   :  { %5058 = vmatpush3.bf16.msra.mxu1 %v5355_v44  ;;  %4941 = vmatprep.mubr.msk.bf16.mxu1 %vm5698_vm0, %v7686_v18  ;;  %v6592_v61 = vadd.f32 %v6390_v54, %v1027_v0  ;;  %v6595_v2 = vadd.f32 %v6393_v7, %v1052_v50  ;;  %v5357_v54 = vld [vmem:[#allocation13 + $0x210] sm:$0xff]  }
 0x317   :  { %5009 = vmatprep.mubr.msk.bf16.mxu0 %vm5698_vm0, %v7686_v18  ;;  %5059 = vmatprep.subr.bf16.mxu1 %v7686_v18 }
 0x318   :  { %v6600_v52 = vpop.f32.mrb[52].mxu1  ;;  %v6602_v39 = vpop.f32.mrb[104].mxu0 }
 0x319   :  { %v4667_v33 = vpop.f32.mrb[53].mxu1  ;;  %v4735_v29 = vpop.f32.mrb[105].mxu0  ;;  %v7667_v7 = vrot.slane %v6600_v52, 6  ;;  %v7666_v11 = vrot.slane %v6602_v39, 7 }
 0x31a   :  { %v1340_v37 = vpop.f32.mrb[54].mxu1  ;;  %v1621_v0 = vpop.f32.mrb[106].mxu0  ;;  %5060 = vmatpush3.bf16.msra.mxu1 %v5356_v6  ;;  %v5358_v29 = vld [vmem:[#allocation13 + $0x218] sm:$0xff]  }
 0x31b   :  { %v1441_v44 = vrot.slane %v1340_v37, 6  ;;  %v1722_v63 = vrot.slane %v1621_v0, 7  ;;  %v4668_v38 = vpop.f32.mrb[55].mxu1  ;;  %v4736_v13 = vpop.f32.mrb[107].mxu0  ;;  %5061 = vmatprep.subr.bf16.mxu1 %v7686_v18 }
 0x31d   :  { %v1491_v50 = vsel %vm1466_vm3, %v7667_v7, %v1441_v44  ;;  %v1772_v6 = vsel %vm1747_vm2, %v7666_v11, %v1722_v63  ;;  %4942 = vmatmul.mubr.bf16.gmra.mrb[160].mxu1 %v6153_v10  ;;  %5010 = vmatmul.mubr.bf16.gmra.mrb[212].mxu0 %v6153_v10 }
 0x31e   :  { %v1495_v33 = vadd.f32 %v1491_v50, %v6410_v26  ;;  %4945 = vmatprep.mubr.msk.bf16.mxu1 %vm5698_vm0, %v7686_v18  ;;  %5013 = vmatprep.mubr.msk.bf16.mxu0 %vm5698_vm0, %v7686_v18 }
 0x31f   :  { %5062 = vmatpush3.bf16.msra.mxu1 %v5357_v54 }
 0x320   :  { %v6624_v37 = vadd.f32 %v1772_v6, %v1495_v33  ;;  %v1345_v0 = vpop.f32.mrb[56].mxu1  ;;  %v1626_v38 = vpop.f32.mrb[108].mxu0  ;;  %5063 = vmatprep.subr.bf16.mxu1 %v7686_v18 }
 0x321   :  { %v1442_v13 = vrot.slane %v1345_v0, 6  ;;  %v1723_v11 = vrot.slane %v1626_v38, 7  ;;  %v4671_v7 = vpop.f32.mrb[57].mxu1  ;;  %v4739_v8 = vpop.f32.mrb[109].mxu0 }
 0x322   :  { %v1348_v1 = vpop.f32.mrb[58].mxu1  ;;  %v1629_v26 = vpop.f32.mrb[110].mxu0 }
 0x323   :  { %v1490_v50 = vsel %vm1466_vm3, %v1441_v44, %v1442_v13  ;;  %v1771_v58 = vsel %vm1747_vm2, %v1722_v63, %v1723_v11  ;;  %v1443_v54 = vrot.slane %v1348_v1, 6  ;;  %v1724_v49 = vrot.slane %v1629_v26, 7  ;;  %v4672_v6 = vpop.f32.mrb[59].mxu1  ;;  %v4740_v33 = vpop.f32.mrb[111].mxu0  ;;  %5064 = vmatpush3.bf16.msra.mxu1 %v5358_v29 }
 0x324   :  { %v1496_v34 = vadd.f32 %v1490_v50, %v6415_v41  ;;  %5065 = vmatprep.subr.bf16.mxu1 %v7686_v18  ;;  %v5360_v41 = vld [vmem:[#allocation13 + $0x228] sm:$0xff]  }
 0x325   :  { %v1489_v8 = vsel %vm1466_vm3, %v1442_v13, %v1443_v54  ;;  %v1770_v7 = vsel %vm1747_vm2, %v1723_v11, %v1724_v49  ;;  %4946 = vmatmul.mubr.bf16.gmra.mrb[164].mxu1 %v6167_v14  ;;  %5014 = vmatmul.mubr.bf16.gmra.mrb[216].mxu0 %v6167_v14 }
 0x326   :  { %v6639_v1 = vadd.f32 %v1771_v58, %v1496_v34  ;;  %v1497_v44 = vadd.f32 %v1489_v8, %v6428_v59  ;;  %4949 = vmatprep.mubr.msk.bf16.mxu1 %vm5698_vm0, %v7686_v18  ;;  %5017 = vmatprep.mubr.msk.bf16.mxu0 %vm5698_vm0, %v7686_v18 }
 0x327   :  { %5066 = vmatpush3.bf16.msra.mxu1 %v5359_v56 }
 0x328   :  { %v6646_v63 = vadd.f32 %v1770_v7, %v1497_v44  ;;  %v1353_v29 = vpop.f32.mrb[60].mxu1  ;;  %v1634_v11 = vpop.f32.mrb[112].mxu0  ;;  %5067 = vmatprep.subr.bf16.mxu1 %v7686_v18  ;;  %v5361_v7 = vld [vmem:[#allocation13 + $0x230] sm:$0xff]  }
 0x329   :  { %v1444_v0 = vrot.slane %v1353_v29, 6  ;;  %v1725_v38 = vrot.slane %v1634_v11, 7  ;;  %v4675_v34 = vpop.f32.mrb[61].mxu1  ;;  %v4743_v58 = vpop.f32.mrb[113].mxu0 }
 0x32a   :  { %v1356_v13 = vpop.f32.mrb[62].mxu1  ;;  %v1637_v59 = vpop.f32.mrb[114].mxu0 }
 0x32b   :  { %v1488_v26 = vsel %vm1466_vm3, %v1443_v54, %v1444_v0  ;;  %v1769_v50 = vsel %vm1747_vm2, %v1724_v49, %v1725_v38  ;;  %v1445_v56 = vrot.slane %v1356_v13, 6  ;;  %v1726_v6 = vrot.slane %v1637_v59, 7  ;;  %v4676_v33 = vpop.f32.mrb[63].mxu1  ;;  %v4744_v8 = vpop.f32.mrb[115].mxu0  ;;  %5068 = vmatpush3.bf16.msra.mxu1 %v5360_v41 }
 0x32c   :  { %v1498_v44 = vadd.f32 %v1488_v26, %v6433_v53  ;;  %5069 = vmatprep.subr.bf16.mxu1 %v7686_v18  ;;  %v5362_v53 = vld [vmem:[#allocation13 + $0x238] sm:$0xff]  }
 0x32d   :  { %v1487_v29 = vsel %vm1466_vm3, %v1444_v0, %v1445_v56  ;;  %v1768_v11 = vsel %vm1747_vm2, %v1725_v38, %v1726_v6  ;;  %4950 = vmatmul.mubr.bf16.gmra.mrb[168].mxu1 %v6181_v31  ;;  %5018 = vmatmul.mubr.bf16.gmra.mrb[220].mxu0 %v6181_v31 }
 0x32e   :  { %v6661_v49 = vadd.f32 %v1769_v50, %v1498_v44  ;;  %v1499_v54 = vadd.f32 %v1487_v29, %v6446_v35  ;;  %4953 = vmatprep.mubr.msk.bf16.mxu1 %vm5698_vm0, %v7686_v18  ;;  %5021 = vmatprep.mubr.msk.bf16.mxu0 %vm5698_vm0, %v7686_v18 }
 0x32f   :  { %5070 = vmatpush3.bf16.msra.mxu1 %v5361_v7 }
 0x330   :  { %v6668_v41 = vadd.f32 %v1768_v11, %v1499_v54  ;;  %v1361_v0 = vpop.f32.mrb[64].mxu1  ;;  %v1642_v38 = vpop.f32.mrb[116].mxu0  ;;  %5071 = vmatprep.subr.bf16.mxu1 %v7686_v18 }
 0x331   :  { %v1446_v34 = vrot.slane %v1361_v0, 6  ;;  %v1727_v58 = vrot.slane %v1642_v38, 7  ;;  %v4679_v13 = vpop.f32.mrb[65].mxu1  ;;  %v4747_v59 = vpop.f32.mrb[117].mxu0 }
 0x332   :  { %v1364_v26 = vpop.f32.mrb[66].mxu1  ;;  %v1645_v35 = vpop.f32.mrb[118].mxu0 }
 0x333   :  { %v1486_v50 = vsel %vm1466_vm3, %v1445_v56, %v1446_v34  ;;  %v1767_v33 = vsel %vm1747_vm2, %v1726_v6, %v1727_v58  ;;  %v1447_v8 = vrot.slane %v1364_v26, 6  ;;  %v1728_v7 = vrot.slane %v1645_v35, 7  ;;  %v4680_v44 = vpop.f32.mrb[67].mxu1  ;;  %v4748_v29 = vpop.f32.mrb[119].mxu0  ;;  %5072 = vmatpush3.bf16.msra.mxu1 %v5362_v53 }
 0x334   :  { %v1500_v11 = vadd.f32 %v1486_v50, %v6451_v46  ;;  %5193 = vmatprep.subr.bf16.mxu1 %v7686_v18 }
 0x335   :  { %v1485_v54 = vsel %vm1466_vm3, %v1446_v34, %v1447_v8  ;;  %v1766_v0 = vsel %vm1747_vm2, %v1727_v58, %v1728_v7  ;;  %4954 = vmatmul.mubr.bf16.gmra.mrb[172].mxu1 %v6195_v51  ;;  %5022 = vmatmul.mubr.bf16.gmra.mrb[224].mxu0 %v6195_v51 }
 0x336   :  { %v6683_v56 = vadd.f32 %v1767_v33, %v1500_v11  ;;  %v1501_v6 = vadd.f32 %v1485_v54, %v6463_v12  ;;  %4957 = vmatprep.mubr.msk.bf16.mxu1 %vm5698_vm0, %v7686_v18  ;;  %5025 = vmatprep.mubr.msk.bf16.mxu0 %vm5698_vm0, %v7686_v18 }
 0x338   :  { %v6690_v46 = vadd.f32 %v1766_v0, %v1501_v6  ;;  %v1369_v53 = vpop.f32.mrb[68].mxu1  ;;  %v1650_v38 = vpop.f32.mrb[120].mxu0 }
 0x339   :  { %v1448_v34 = vrot.slane %v1369_v53, 6  ;;  %v1729_v58 = vrot.slane %v1650_v38, 7  ;;  %v4683_v13 = vpop.f32.mrb[69].mxu1  ;;  %v4751_v59 = vpop.f32.mrb[121].mxu0 }
 0x33a   :  { %v1372_v26 = vpop.f32.mrb[70].mxu1  ;;  %v1653_v35 = vpop.f32.mrb[122].mxu0 }
 0x33b   :  { %v1484_v50 = vsel %vm1466_vm3, %v1447_v8, %v1448_v34  ;;  %v1765_v12 = vsel %vm1747_vm2, %v1728_v7, %v1729_v58  ;;  %v1449_v33 = vrot.slane %v1372_v26, 6  ;;  %v1730_v44 = vrot.slane %v1653_v35, 7  ;;  %v4684_v29 = vpop.f32.mrb[71].mxu1  ;;  %v4752_v11 = vpop.f32.mrb[123].mxu0 }
 0x33c   :  { %v1502_v54 = vadd.f32 %v1484_v50, %v6467_v24 }
 0x33d   :  { %v1483_v0 = vsel %vm1466_vm3, %v1448_v34, %v1449_v33  ;;  %v1764_v6 = vsel %vm1747_vm2, %v1729_v58, %v1730_v44  ;;  %4958 = vmatmul.mubr.bf16.gmra.mrb[176].mxu1 %v6207_v15  ;;  %5026 = vmatmul.mubr.bf16.gmra.mrb[228].mxu0 %v6207_v15 }
 0x33e   :  { %v6703_v8 = vadd.f32 %v1765_v12, %v1502_v54  ;;  %v1503_v7 = vadd.f32 %v1483_v0, %v6477_v36  ;;  %4961 = vmatprep.mubr.msk.bf16.mxu1 %vm5698_vm0, %v7686_v18  ;;  %5029 = vmatprep.mubr.msk.bf16.mxu0 %vm5698_vm0, %v7686_v18 }
 0x340   :  { %v6710_v24 = vadd.f32 %v1764_v6, %v1503_v7  ;;  %v1377_v53 = vpop.f32.mrb[72].mxu1  ;;  %v1658_v38 = vpop.f32.mrb[124].mxu0 }
 0x341   :  { %v1450_v34 = vrot.slane %v1377_v53, 6  ;;  %v1731_v58 = vrot.slane %v1658_v38, 7  ;;  %v4687_v13 = vpop.f32.mrb[73].mxu1  ;;  %v4755_v59 = vpop.f32.mrb[125].mxu0 }
 0x342   :  { %v1380_v26 = vpop.f32.mrb[74].mxu1  ;;  %v1661_v35 = vpop.f32.mrb[126].mxu0 }
 0x343   :  { %v1482_v50 = vsel %vm1466_vm3, %v1449_v33, %v1450_v34  ;;  %v1763_v36 = vsel %vm1747_vm2, %v1730_v44, %v1731_v58  ;;  %v1451_v12 = vrot.slane %v1380_v26, 6  ;;  %v1732_v29 = vrot.slane %v1661_v35, 7  ;;  %v4688_v11 = vpop.f32.mrb[75].mxu1  ;;  %v4756_v54 = vpop.f32.mrb[127].mxu0 }
 0x344   :  { %v1504_v0 = vadd.f32 %v1482_v50, %v6481_v55 }
 0x345   :  { %v1481_v6 = vsel %vm1466_vm3, %v1450_v34, %v1451_v12  ;;  %v1762_v7 = vsel %vm1747_vm2, %v1731_v58, %v1732_v29  ;;  %4962 = vmatmul.mubr.bf16.gmra.mrb[180].mxu1 %v6217_v27  ;;  %5030 = vmatmul.mubr.bf16.gmra.mrb[232].mxu0 %v6217_v27 }
 0x346   :  { %v6723_v33 = vadd.f32 %v1763_v36, %v1504_v0  ;;  %v1505_v44 = vadd.f32 %v1481_v6, %v6491_v19  ;;  %4965 = vmatprep.mubr.msk.bf16.mxu1 %vm5698_vm0, %v7686_v18  ;;  %5033 = vmatprep.mubr.msk.bf16.mxu0 %vm5698_vm0, %v7686_v18 }
 0x348   :  { %v6730_v55 = vadd.f32 %v1762_v7, %v1505_v44  ;;  %v1385_v53 = vpop.f32.mrb[76].mxu1  ;;  %v1666_v38 = vpop.f32.mrb[128].mxu0 }
 0x349   :  { %v1452_v34 = vrot.slane %v1385_v53, 6  ;;  %v1733_v58 = vrot.slane %v1666_v38, 7  ;;  %v4691_v13 = vpop.f32.mrb[77].mxu1  ;;  %v4759_v59 = vpop.f32.mrb[129].mxu0 }
 0x34a   :  { %v1388_v26 = vpop.f32.mrb[78].mxu1  ;;  %v1669_v35 = vpop.f32.mrb[130].mxu0 }
 0x34b   :  { %v1480_v50 = vsel %vm1466_vm3, %v1451_v12, %v1452_v34  ;;  %v1761_v19 = vsel %vm1747_vm2, %v1732_v29, %v1733_v58  ;;  %v1453_v36 = vrot.slane %v1388_v26, 6  ;;  %v1734_v11 = vrot.slane %v1669_v35, 7  ;;  %v4692_v54 = vpop.f32.mrb[79].mxu1  ;;  %v4760_v0 = vpop.f32.mrb[131].mxu0 }
 0x34c   :  { %v1506_v6 = vadd.f32 %v1480_v50, %v6495_v32 }
 0x34d   :  { %v1479_v7 = vsel %vm1466_vm3, %v1452_v34, %v1453_v36  ;;  %v1760_v44 = vsel %vm1747_vm2, %v1733_v58, %v1734_v11  ;;  %4966 = vmatmul.mubr.bf16.gmra.mrb[184].mxu1 %v6227_v57  ;;  %5034 = vmatmul.mubr.bf16.gmra.mrb[236].mxu0 %v6227_v57 }
 0x34e   :  { %v6743_v12 = vadd.f32 %v1761_v19, %v1506_v6  ;;  %v1507_v29 = vadd.f32 %v1479_v7, %v6505_v48  ;;  %4969 = vmatprep.mubr.msk.bf16.mxu1 %vm5698_vm0, %v7686_v18  ;;  %5037 = vmatprep.mubr.msk.bf16.mxu0 %vm5698_vm0, %v7686_v18 }
 0x350   :  { %v6750_v32 = vadd.f32 %v1760_v44, %v1507_v29  ;;  %v1393_v53 = vpop.f32.mrb[80].mxu1  ;;  %v1674_v38 = vpop.f32.mrb[132].mxu0 }
 0x351   :  { %v1454_v34 = vrot.slane %v1393_v53, 6  ;;  %v1735_v58 = vrot.slane %v1674_v38, 7  ;;  %v4695_v13 = vpop.f32.mrb[81].mxu1  ;;  %v4763_v59 = vpop.f32.mrb[133].mxu0 }
 0x352   :  { %v1396_v26 = vpop.f32.mrb[82].mxu1  ;;  %v1677_v35 = vpop.f32.mrb[134].mxu0 }
 0x353   :  { %v1478_v50 = vsel %vm1466_vm3, %v1453_v36, %v1454_v34  ;;  %v1759_v48 = vsel %vm1747_vm2, %v1734_v11, %v1735_v58  ;;  %v1455_v19 = vrot.slane %v1396_v26, 6  ;;  %v1736_v54 = vrot.slane %v1677_v35, 7  ;;  %v4696_v0 = vpop.f32.mrb[83].mxu1  ;;  %v4764_v6 = vpop.f32.mrb[135].mxu0 }
 0x354   :  { %v1508_v7 = vadd.f32 %v1478_v50, %v6509_v22 }
 0x355   :  { %v1477_v44 = vsel %vm1466_vm3, %v1454_v34, %v1455_v19  ;;  %v1758_v29 = vsel %vm1747_vm2, %v1735_v58, %v1736_v54  ;;  %4970 = vmatmul.mubr.bf16.gmra.mrb[188].mxu1 %v6237_v3  ;;  %5038 = vmatmul.mubr.bf16.gmra.mrb[240].mxu0 %v6237_v3 }
 0x356   :  { %v6763_v36 = vadd.f32 %v1759_v48, %v1508_v7  ;;  %v1509_v11 = vadd.f32 %v1477_v44, %v6519_v28  ;;  %4973 = vmatprep.mubr.msk.bf16.mxu1 %vm5698_vm0, %v7686_v18  ;;  %5041 = vmatprep.mubr.msk.bf16.mxu0 %vm5698_vm0, %v7686_v18 }
 0x358   :  { %v6770_v22 = vadd.f32 %v1758_v29, %v1509_v11  ;;  %v1401_v53 = vpop.f32.mrb[84].mxu1  ;;  %v1682_v38 = vpop.f32.mrb[136].mxu0 }
 0x359   :  { %v1456_v34 = vrot.slane %v1401_v53, 6  ;;  %v1737_v58 = vrot.slane %v1682_v38, 7  ;;  %v4699_v13 = vpop.f32.mrb[85].mxu1  ;;  %v4767_v59 = vpop.f32.mrb[137].mxu0 }
 0x35a   :  { %v1404_v26 = vpop.f32.mrb[86].mxu1  ;;  %v1685_v35 = vpop.f32.mrb[138].mxu0 }
 0x35b   :  { %v1476_v50 = vsel %vm1466_vm3, %v1455_v19, %v1456_v34  ;;  %v1757_v28 = vsel %vm1747_vm2, %v1736_v54, %v1737_v58  ;;  %v1457_v48 = vrot.slane %v1404_v26, 6  ;;  %v1738_v0 = vrot.slane %v1685_v35, 7  ;;  %v4700_v6 = vpop.f32.mrb[87].mxu1  ;;  %v4768_v7 = vpop.f32.mrb[139].mxu0 }
 0x35c   :  { %v1510_v44 = vadd.f32 %v1476_v50, %v6523_v23 }
 0x35d   :  { %v1475_v29 = vsel %vm1466_vm3, %v1456_v34, %v1457_v48  ;;  %v1756_v11 = vsel %vm1747_vm2, %v1737_v58, %v1738_v0  ;;  %4974 = vmatmul.mubr.bf16.gmra.mrb[192].mxu1 %v6247_v16  ;;  %5042 = vmatmul.mubr.bf16.gmra.mrb[244].mxu0 %v6247_v16 }
 0x35e   :  { %v6783_v19 = vadd.f32 %v1757_v28, %v1510_v44  ;;  %v1511_v54 = vadd.f32 %v1475_v29, %v6533_v45  ;;  %4977 = vmatprep.mubr.msk.bf16.mxu1 %vm5698_vm0, %v7686_v18  ;;  %5045 = vmatprep.mubr.msk.bf16.mxu0 %vm5698_vm0, %v7686_v18 }
 0x360   :  { %v6790_v23 = vadd.f32 %v1756_v11, %v1511_v54  ;;  %v1409_v53 = vpop.f32.mrb[88].mxu1  ;;  %v1690_v38 = vpop.f32.mrb[140].mxu0 }
 0x361   :  { %v1458_v34 = vrot.slane %v1409_v53, 6  ;;  %v1739_v58 = vrot.slane %v1690_v38, 7  ;;  %v4703_v13 = vpop.f32.mrb[89].mxu1  ;;  %v4771_v59 = vpop.f32.mrb[141].mxu0 }
 0x362   :  { %v1412_v26 = vpop.f32.mrb[90].mxu1  ;;  %v1693_v35 = vpop.f32.mrb[142].mxu0 }
 0x363   :  { %v1474_v50 = vsel %vm1466_vm3, %v1457_v48, %v1458_v34  ;;  %v1755_v45 = vsel %vm1747_vm2, %v1738_v0, %v1739_v58  ;;  %v1459_v28 = vrot.slane %v1412_v26, 6  ;;  %v1740_v6 = vrot.slane %v1693_v35, 7  ;;  %v4704_v7 = vpop.f32.mrb[91].mxu1  ;;  %v4772_v44 = vpop.f32.mrb[143].mxu0 }
 0x364   :  { %v1512_v29 = vadd.f32 %v1474_v50, %v6537_v42 }
 0x365   :  { %v1473_v11 = vsel %vm1466_vm3, %v1458_v34, %v1459_v28  ;;  %v1754_v54 = vsel %vm1747_vm2, %v1739_v58, %v1740_v6  ;;  %4978 = vmatmul.mubr.bf16.gmra.mrb[196].mxu1 %v6257_v43  ;;  %5046 = vmatmul.mubr.bf16.gmra.mrb[248].mxu0 %v6257_v43 }
 0x366   :  { %v6803_v48 = vadd.f32 %v1755_v45, %v1512_v29  ;;  %v1513_v0 = vadd.f32 %v1473_v11, %v6547_v21  ;;  %4981 = vmatprep.mubr.msk.bf16.mxu1 %vm5698_vm0, %v7686_v18  ;;  %5049 = vmatprep.mubr.msk.bf16.mxu0 %vm5698_vm0, %v7686_v18 }
 0x368   :  { %v6810_v42 = vadd.f32 %v1754_v54, %v1513_v0  ;;  %v1417_v53 = vpop.f32.mrb[92].mxu1  ;;  %v1698_v38 = vpop.f32.mrb[144].mxu0 }
 0x369   :  { %v1460_v34 = vrot.slane %v1417_v53, 6  ;;  %v1741_v58 = vrot.slane %v1698_v38, 7  ;;  %v4707_v13 = vpop.f32.mrb[93].mxu1  ;;  %v4775_v59 = vpop.f32.mrb[145].mxu0 }
 0x36a   :  { %v1420_v26 = vpop.f32.mrb[94].mxu1  ;;  %v1701_v35 = vpop.f32.mrb[146].mxu0 }
 0x36b   :  { %v1472_v50 = vsel %vm1466_vm3, %v1459_v28, %v1460_v34  ;;  %v1753_v21 = vsel %vm1747_vm2, %v1740_v6, %v1741_v58  ;;  %v1461_v45 = vrot.slane %v1420_v26, 6  ;;  %v1742_v7 = vrot.slane %v1701_v35, 7  ;;  %v4708_v44 = vpop.f32.mrb[95].mxu1  ;;  %v4776_v29 = vpop.f32.mrb[147].mxu0 }
 0x36c   :  { %v1514_v11 = vadd.f32 %v1472_v50, %v6551_v9 }
 0x36d   :  { %v1471_v54 = vsel %vm1466_vm3, %v1460_v34, %v1461_v45  ;;  %v1752_v0 = vsel %vm1747_vm2, %v1741_v58, %v1742_v7  ;;  %4982 = vmatmul.mubr.bf16.gmra.mrb[200].mxu1 %v6267_v60  ;;  %5050 = vmatmul.mubr.bf16.gmra.mrb[252].mxu0 %v6267_v60 }
 0x36e   :  { %v6823_v28 = vadd.f32 %v1753_v21, %v1514_v11  ;;  %v1515_v6 = vadd.f32 %v1471_v54, %v6561_v17  ;;  %4985 = vmatprep.mubr.msk.bf16.mxu1 %vm5698_vm0, %v7686_v18  ;;  %5053 = vmatprep.mubr.msk.bf16.mxu0 %vm5698_vm0, %v7686_v18 }
 0x370   :  { %v6830_v9 = vadd.f32 %v1752_v0, %v1515_v6  ;;  %v1425_v53 = vpop.f32.mrb[96].mxu1  ;;  %v1706_v38 = vpop.f32.mrb[148].mxu0 }
 0x371   :  { %v1462_v34 = vrot.slane %v1425_v53, 6  ;;  %v1743_v58 = vrot.slane %v1706_v38, 7  ;;  %v4711_v13 = vpop.f32.mrb[97].mxu1  ;;  %v4779_v59 = vpop.f32.mrb[149].mxu0 }
 0x372   :  { %v1428_v26 = vpop.f32.mrb[98].mxu1  ;;  %v1709_v35 = vpop.f32.mrb[150].mxu0 }
 0x373   :  { %v1470_v50 = vsel %vm1466_vm3, %v1461_v45, %v1462_v34  ;;  %v1751_v17 = vsel %vm1747_vm2, %v1742_v7, %v1743_v58  ;;  %v1463_v21 = vrot.slane %v1428_v26, 6  ;;  %v1744_v44 = vrot.slane %v1709_v35, 7  ;;  %v4712_v29 = vpop.f32.mrb[99].mxu1  ;;  %v4780_v11 = vpop.f32.mrb[151].mxu0 }
 0x374   :  { %v1516_v54 = vadd.f32 %v1470_v50, %v6565_v20 }
 0x375   :  { %v1469_v0 = vsel %vm1466_vm3, %v1462_v34, %v1463_v21  ;;  %v1750_v6 = vsel %vm1747_vm2, %v1743_v58, %v1744_v44  ;;  %4986 = vmatmul.mubr.bf16.gmra.mrb[204].mxu1 %v6277_v5  ;;  %5054 = vmatmul.mubr.bf16.gmra.mrb[0].mxu0 %v6277_v5 }
 0x376   :  { %v6843_v45 = vadd.f32 %v1751_v17, %v1516_v54  ;;  %v1517_v7 = vadd.f32 %v1469_v0, %v6575_v25  ;;  %5073 = vmatprep.mubr.msk.bf16.mxu1 %vm5698_vm0, %v7686_v18  ;;  %5141 = vmatprep.mubr.msk.bf16.mxu0 %vm5698_vm0, %v7686_v18 }
 0x378   :  { %v6850_v20 = vadd.f32 %v1750_v6, %v1517_v7  ;;  %v1433_v53 = vpop.f32.mrb[100].mxu1  ;;  %v1714_v38 = vpop.f32.mrb[152].mxu0  ;;  %v7687_v7 = vrot.slane %v6600_v52, 6 }
 0x379   :  { %v1464_v34 = vrot.slane %v1433_v53, 6  ;;  %v1745_v58 = vrot.slane %v1714_v38, 7  ;;  %v4715_v13 = vpop.f32.mrb[101].mxu1  ;;  %v4783_v59 = vpop.f32.mrb[153].mxu0  ;;  %v7688_v38 = vrot.slane %v6602_v39, 7 }
 0x37a   :  { %v1436_v26 = vpop.f32.mrb[102].mxu1  ;;  %v1717_v35 = vpop.f32.mrb[154].mxu0 }
 0x37b   :  { %v1468_v50 = vsel %vm1466_vm3, %v1463_v21, %v1464_v34  ;;  %v1749_v25 = vsel %vm1747_vm2, %v1744_v44, %v1745_v58  ;;  %v1465_v17 = vrot.slane %v1436_v26, 6  ;;  %v1746_v29 = vrot.slane %v1717_v35, 7  ;;  %v4716_v11 = vpop.f32.mrb[103].mxu1  ;;  %v4784_v54 = vpop.f32.mrb[155].mxu0  ;;  %v5363_v26 = vld [vmem:[#allocation16] sm:$0xff]  }
 0x37c   :  { %v1518_v0 = vadd.f32 %v1468_v50, %v6579_v40  ;;  %5126 = vmatpush3.bf16.msra.mxu0 %v5363_v26 }
 0x37d   :  { %v1467_v6 = vsel %vm1466_vm3, %v1464_v34, %v1465_v17  ;;  %v1492_v53 = vsel %vm1466_vm3, %v1465_v17, %v7687_v7  ;;  %v1748_v21 = vsel %vm1747_vm2, %v1745_v58, %v1746_v29  ;;  %v1773_v44 = vsel %vm1747_vm2, %v1746_v29, %v7688_v38  ;;  %5074 = vmatmul.mubr.bf16.vlgmr.msra.gmra.mrb[208].mxu1 %v6141_v30 }
 0x37e   :  { %v6870_v13 = vadd.f32 %v1749_v25, %v1518_v0  ;;  %v1493_v40 = vadd.f32 %v1467_v6, %v6592_v61  ;;  %v1494_v34 = vadd.f32 %v1492_v53, %v6595_v2  ;;  %5077 = vmatprep.mubr.msk.bf16.mxu1 %vm5698_vm0, %v7686_v18  ;;  %5127 = vmatprep.subr.bf16.mxu0 %v7686_v18  ;;  %v5364_v0 = vld [vmem:[#allocation19] sm:$0xff]  }
 0x37f   :  { %5194 = vmatpush3.bf16.msra.mxu1 %v5364_v0 }
 0x380   :  { %v6876_v52 = vadd.f32 %v1748_v21, %v1493_v40  ;;  %v1775_v59 = vadd.f32 %v1773_v44, %v1494_v34  ;;  %v6878_v58 = vpop.f32.mrb[104].mxu1  ;;  %v6880_v39 = vpop.f32.mrb[156].mxu0  ;;  %5195 = vmatprep.subr.bf16.mxu1 %v7686_v18 }
 0x381   :  { %v4803_v35 = vpop.f32.mrb[105].mxu1  ;;  %v4871_v50 = vpop.f32.mrb[157].mxu0  ;;  %v2002_v61 = vrot.slane %v6878_v58, 7 }
 0x382   :  { %v1902_v30 = vpop.f32.mrb[106].mxu1  ;;  %v6882_v25 = vpop.f32.mrb[158].mxu0 }
 0x383   :  { %v2003_v2 = vrot.slane %v1902_v30, 7  ;;  %v4804_v17 = vpop.f32.mrb[107].mxu1  ;;  %v4872_v29 = vpop.f32.mrb[159].mxu0  ;;  %v2283_v53 = vrot.slane %v6882_v25, 1 }
 0x385   :  { %v2052_v11 = vsel %vm1747_vm2, %v2002_v61, %v2003_v2  ;;  %5078 = vmatmul.mubr.bf16.gmra.mrb[212].mxu1 %v6153_v10 }
 0x386   :  { %v2055_v54 = vadd.f32 %v2052_v11, %v1775_v59  ;;  %5081 = vmatprep.mubr.msk.bf16.mxu1 %vm5698_vm0, %v7686_v18 }
 0x388   :  { %v1907_v6 = vpop.f32.mrb[108].mxu1  ;;  %v2187_v7 = vpop.f32.mrb[160].mxu0 }
 0x389   :  { %v2004_v21 = vrot.slane %v1907_v6, 7  ;;  %v2284_v38 = vrot.slane %v2187_v7, 1  ;;  %v4807_v44 = vpop.f32.mrb[109].mxu1  ;;  %v4875_v40 = vpop.f32.mrb[161].mxu0 }
 0x38a   :  { %v1910_v34 = vpop.f32.mrb[110].mxu1  ;;  %v2190_v10 = vpop.f32.mrb[162].mxu0 }
 0x38b   :  { %v2051_v59 = vsel %vm1747_vm2, %v2003_v2, %v2004_v21  ;;  %v2332_v26 = vsel %vm2308_vm4, %v2283_v53, %v2284_v38  ;;  %v2005_v35 = vrot.slane %v1910_v34, 7  ;;  %v2285_v50 = vrot.slane %v2190_v10, 1  ;;  %v4808_v30 = vpop.f32.mrb[111].mxu1  ;;  %v4876_v17 = vpop.f32.mrb[163].mxu0 }
 0x38c   :  { %v2056_v29 = vadd.f32 %v2051_v59, %v6624_v37  ;;  %v6903_v11 = vadd.f32 %v2332_v26, %v2055_v54  ;;  %v5365_v37 = vld [vmem:[#allocation16 + $0x8] sm:$0xff]  }
 0x38d   :  { %v2050_v0 = vsel %vm1747_vm2, %v2004_v21, %v2005_v35  ;;  %v2331_v6 = vsel %vm2308_vm4, %v2284_v38, %v2285_v50  ;;  %5082 = vmatmul.mubr.bf16.gmra.mrb[216].mxu1 %v6167_v14  ;;  %v5366_v54 = vld [vmem:[#allocation19 + $0x8] sm:$0xff]   ;;  %5128 = vmatpush3.bf16.msra.mxu0 %v5365_v37 }
 0x38e   :  { %v2057_v2 = vadd.f32 %v2050_v0, %v6639_v1  ;;  %v6911_v7 = vadd.f32 %v2331_v6, %v2056_v29  ;;  %5085 = vmatprep.mubr.msk.bf16.mxu1 %vm5698_vm0, %v7686_v18  ;;  %5196 = vmatpush3.bf16.msra.mxu1 %v5366_v54 }
 0x38f   :  { %5129 = vmatprep.subr.bf16.mxu0 %v7686_v18  ;;  %5197 = vmatprep.subr.bf16.mxu1 %v7686_v18 }
 0x390   :  { %v1915_v44 = vpop.f32.mrb[112].mxu1  ;;  %v2195_v40 = vpop.f32.mrb[164].mxu0 }
 0x391   :  { %v2006_v34 = vrot.slane %v1915_v44, 7  ;;  %v2286_v10 = vrot.slane %v2195_v40, 1  ;;  %v4811_v59 = vpop.f32.mrb[113].mxu1  ;;  %v4879_v21 = vpop.f32.mrb[165].mxu0 }
 0x392   :  { %v1918_v26 = vpop.f32.mrb[114].mxu1  ;;  %v2198_v30 = vpop.f32.mrb[166].mxu0 }
 0x393   :  { %v2049_v14 = vsel %vm1747_vm2, %v2005_v35, %v2006_v34  ;;  %v2330_v1 = vsel %vm2308_vm4, %v2285_v50, %v2286_v10  ;;  %v2007_v38 = vrot.slane %v1918_v26, 7  ;;  %v2287_v17 = vrot.slane %v2198_v30, 1  ;;  %v4812_v29 = vpop.f32.mrb[115].mxu1  ;;  %v4880_v0 = vpop.f32.mrb[167].mxu0 }
 0x394   :  { %v2058_v6 = vadd.f32 %v2049_v14, %v6646_v63  ;;  %v6922_v44 = vadd.f32 %v2330_v1, %v2057_v2 }
 0x395   :  { %v2048_v40 = vsel %vm1747_vm2, %v2006_v34, %v2007_v38  ;;  %v2329_v35 = vsel %vm2308_vm4, %v2286_v10, %v2287_v17  ;;  %5086 = vmatmul.mubr.bf16.gmra.mrb[220].mxu1 %v6181_v31 }
 0x396   :  { %v2059_v50 = vadd.f32 %v2048_v40, %v6661_v49  ;;  %v6930_v37 = vadd.f32 %v2329_v35, %v2058_v6  ;;  %5089 = vmatprep.mubr.msk.bf16.mxu1 %vm5698_vm0, %v7686_v18 }
 0x398   :  { %v1923_v54 = vpop.f32.mrb[116].mxu1  ;;  %v2203_v59 = vpop.f32.mrb[168].mxu0 }
 0x399   :  { %v2008_v63 = vrot.slane %v1923_v54, 7  ;;  %v2288_v2 = vrot.slane %v2203_v59, 1  ;;  %v4815_v21 = vpop.f32.mrb[117].mxu1  ;;  %v4883_v26 = vpop.f32.mrb[169].mxu0 }
 0x39a   :  { %v1926_v30 = vpop.f32.mrb[118].mxu1  ;;  %v2206_v34 = vpop.f32.mrb[170].mxu0 }
 0x39b   :  { %v2047_v10 = vsel %vm1747_vm2, %v2007_v38, %v2008_v63  ;;  %v2328_v31 = vsel %vm2308_vm4, %v2287_v17, %v2288_v2  ;;  %v2009_v49 = vrot.slane %v1926_v30, 7  ;;  %v2289_v14 = vrot.slane %v2206_v34, 1  ;;  %v4816_v1 = vpop.f32.mrb[119].mxu1  ;;  %v4884_v29 = vpop.f32.mrb[171].mxu0  ;;  %v5367_v17 = vld [vmem:[#allocation16 + $0x10] sm:$0xff]  }
 0x39c   :  { %v2060_v0 = vadd.f32 %v2047_v10, %v6668_v41  ;;  %v6939_v6 = vadd.f32 %v2328_v31, %v2059_v50  ;;  %5130 = vmatpush3.bf16.msra.mxu0 %v5367_v17  ;;  %v5368_v50 = vld [vmem:[#allocation19 + $0x10] sm:$0xff]  }
 0x39d   :  { %v2046_v40 = vsel %vm1747_vm2, %v2008_v63, %v2009_v49  ;;  %v2327_v35 = vsel %vm2308_vm4, %v2288_v2, %v2289_v14  ;;  %5090 = vmatmul.mubr.bf16.gmra.mrb[224].mxu1 %v6195_v51  ;;  %5131 = vmatprep.subr.bf16.mxu0 %v7686_v18 }
 0x39e   :  { %v2061_v38 = vadd.f32 %v2046_v40, %v6683_v56  ;;  %v6947_v54 = vadd.f32 %v2327_v35, %v2060_v0  ;;  %5093 = vmatprep.mubr.msk.bf16.mxu1 %vm5698_vm0, %v7686_v18  ;;  %5198 = vmatpush3.bf16.msra.mxu1 %v5368_v50 }
 0x39f   :  { %5199 = vmatprep.subr.bf16.mxu1 %v7686_v18 }
 0x3a0   :  { %v1931_v59 = vpop.f32.mrb[120].mxu1  ;;  %v2211_v41 = vpop.f32.mrb[172].mxu0 }
 0x3a1   :  { %v2010_v21 = vrot.slane %v1931_v59, 7  ;;  %v2290_v26 = vrot.slane %v2211_v41, 1  ;;  %v4819_v63 = vpop.f32.mrb[121].mxu1  ;;  %v4887_v30 = vpop.f32.mrb[173].mxu0 }
 0x3a2   :  { %v1934_v2 = vpop.f32.mrb[122].mxu1  ;;  %v2214_v51 = vpop.f32.mrb[174].mxu0 }
 0x3a3   :  { %v2045_v56 = vsel %vm1747_vm2, %v2009_v49, %v2010_v21  ;;  %v2326_v34 = vsel %vm2308_vm4, %v2289_v14, %v2290_v26  ;;  %v2011_v10 = vrot.slane %v1934_v2, 7  ;;  %v2291_v31 = vrot.slane %v2214_v51, 1  ;;  %v4820_v1 = vpop.f32.mrb[123].mxu1  ;;  %v4888_v29 = vpop.f32.mrb[175].mxu0 }
 0x3a4   :  { %v2062_v0 = vadd.f32 %v2045_v56, %v6690_v46  ;;  %v6958_v40 = vadd.f32 %v2326_v34, %v2061_v38  ;;  %v5369_v46 = vld [vmem:[#allocation16 + $0x18] sm:$0xff]  }
 0x3a5   :  { %v2044_v35 = vsel %vm1747_vm2, %v2010_v21, %v2011_v10  ;;  %v2325_v17 = vsel %vm2308_vm4, %v2290_v26, %v2291_v31  ;;  %5094 = vmatmul.mubr.bf16.gmra.mrb[228].mxu1 %v6207_v15  ;;  %v5370_v38 = vld [vmem:[#allocation19 + $0x18] sm:$0xff]   ;;  %5132 = vmatpush3.bf16.msra.mxu0 %v5369_v46 }
 0x3a6   :  { %v2063_v49 = vadd.f32 %v2044_v35, %v6703_v8  ;;  %v6966_v14 = vadd.f32 %v2325_v17, %v2062_v0  ;;  %5097 = vmatprep.mubr.msk.bf16.mxu1 %vm5698_vm0, %v7686_v18  ;;  %5200 = vmatpush3.bf16.msra.mxu1 %v5370_v38 }
 0x3a7   :  { %5133 = vmatprep.subr.bf16.mxu0 %v7686_v18  ;;  %5201 = vmatprep.subr.bf16.mxu1 %v7686_v18 }
 0x3a8   :  { %v1939_v59 = vpop.f32.mrb[124].mxu1  ;;  %v2219_v41 = vpop.f32.mrb[176].mxu0 }
 0x3a9   :  { %v2012_v50 = vrot.slane %v1939_v59, 7  ;;  %v2292_v63 = vrot.slane %v2219_v41, 1  ;;  %v4823_v30 = vpop.f32.mrb[125].mxu1  ;;  %v4891_v21 = vpop.f32.mrb[177].mxu0 }
 0x3aa   :  { %v1942_v2 = vpop.f32.mrb[126].mxu1  ;;  %v2222_v51 = vpop.f32.mrb[178].mxu0 }
 0x3ab   :  { %v2043_v15 = vsel %vm1747_vm2, %v2011_v10, %v2012_v50  ;;  %v2324_v8 = vsel %vm2308_vm4, %v2291_v31, %v2292_v63  ;;  %v2013_v26 = vrot.slane %v1942_v2, 7  ;;  %v2293_v56 = vrot.slane %v2222_v51, 1  ;;  %v4824_v34 = vpop.f32.mrb[127].mxu1  ;;  %v4892_v1 = vpop.f32.mrb[179].mxu0 }
 0x3ac   :  { %v2064_v29 = vadd.f32 %v2043_v15, %v6710_v24  ;;  %v6977_v0 = vadd.f32 %v2324_v8, %v2063_v49 }
 0x3ad   :  { %v2042_v35 = vsel %vm1747_vm2, %v2012_v50, %v2013_v26  ;;  %v2323_v10 = vsel %vm2308_vm4, %v2292_v63, %v2293_v56  ;;  %5098 = vmatmul.mubr.bf16.gmra.mrb[232].mxu1 %v6217_v27 }
 0x3ae   :  { %v2065_v31 = vadd.f32 %v2042_v35, %v6723_v33  ;;  %v6985_v17 = vadd.f32 %v2323_v10, %v2064_v29  ;;  %5101 = vmatprep.mubr.msk.bf16.mxu1 %vm5698_vm0, %v7686_v18  ;;  %v5372_v10 = vld [vmem:[#allocation19 + $0x20] sm:$0xff]  }
 0x3af   :  { %5202 = vmatpush3.bf16.msra.mxu1 %v5372_v10 }
 0x3b0   :  { %v1947_v59 = vpop.f32.mrb[128].mxu1  ;;  %v2227_v41 = vpop.f32.mrb[180].mxu0  ;;  %5203 = vmatprep.subr.bf16.mxu1 %v7686_v18 }
 0x3b1   :  { %v2014_v24 = vrot.slane %v1947_v59, 7  ;;  %v2294_v49 = vrot.slane %v2227_v41, 1  ;;  %v4827_v46 = vpop.f32.mrb[129].mxu1  ;;  %v4895_v38 = vpop.f32.mrb[181].mxu0 }
 0x3b2   :  { %v1950_v30 = vpop.f32.mrb[130].mxu1  ;;  %v2230_v50 = vpop.f32.mrb[182].mxu0 }
 0x3b3   :  { %v2041_v63 = vsel %vm1747_vm2, %v2013_v26, %v2014_v24  ;;  %v2322_v27 = vsel %vm2308_vm4, %v2293_v56, %v2294_v49  ;;  %v2015_v33 = vrot.slane %v1950_v30, 7  ;;  %v2295_v21 = vrot.slane %v2230_v50, 1  ;;  %v4828_v2 = vpop.f32.mrb[131].mxu1  ;;  %v4896_v51 = vpop.f32.mrb[183].mxu0 }
 0x3b4   :  { %v2066_v15 = vadd.f32 %v2041_v63, %v6730_v55  ;;  %v6994_v8 = vadd.f32 %v2322_v27, %v2065_v31  ;;  %v5371_v55 = vld [vmem:[#allocation16 + $0x20] sm:$0xff]  }
 0x3b5   :  { %v2040_v34 = vsel %vm1747_vm2, %v2014_v24, %v2015_v33  ;;  %v2321_v1 = vsel %vm2308_vm4, %v2294_v49, %v2295_v21  ;;  %5102 = vmatmul.mubr.bf16.gmra.mrb[236].mxu1 %v6227_v57  ;;  %5134 = vmatpush3.bf16.msra.mxu0 %v5371_v55 }
 0x3b6   :  { %v2067_v26 = vadd.f32 %v2040_v34, %v6743_v12  ;;  %v7002_v29 = vadd.f32 %v2321_v1, %v2066_v15  ;;  %5105 = vmatprep.mubr.msk.bf16.mxu1 %vm5698_vm0, %v7686_v18  ;;  %5135 = vmatprep.subr.bf16.mxu0 %v7686_v18 }
 0x3b8   :  { %v1955_v56 = vpop.f32.mrb[132].mxu1  ;;  %v2235_v35 = vpop.f32.mrb[184].mxu0 }
 0x3b9   :  { %v2016_v31 = vrot.slane %v1955_v56, 7  ;;  %v2296_v59 = vrot.slane %v2235_v35, 1  ;;  %v4831_v41 = vpop.f32.mrb[133].mxu1  ;;  %v4899_v24 = vpop.f32.mrb[185].mxu0 }
 0x3ba   :  { %v1958_v46 = vpop.f32.mrb[134].mxu1  ;;  %v2238_v38 = vpop.f32.mrb[186].mxu0 }
 0x3bb   :  { %v2039_v57 = vsel %vm1747_vm2, %v2015_v33, %v2016_v31  ;;  %v2320_v12 = vsel %vm2308_vm4, %v2295_v21, %v2296_v59  ;;  %v2017_v49 = vrot.slane %v1958_v46, 7  ;;  %v2297_v30 = vrot.slane %v2238_v38, 1  ;;  %v4832_v50 = vpop.f32.mrb[135].mxu1  ;;  %v4900_v63 = vpop.f32.mrb[187].mxu0 }
 0x3bc   :  { %v2068_v27 = vadd.f32 %v2039_v57, %v6750_v32  ;;  %v7013_v2 = vadd.f32 %v2320_v12, %v2067_v26  ;;  %v5373_v32 = vld [vmem:[#allocation16 + $0x28] sm:$0xff]  }
 0x3bd   :  { %v2038_v51 = vsel %vm1747_vm2, %v2016_v31, %v2017_v49  ;;  %v2319_v33 = vsel %vm2308_vm4, %v2296_v59, %v2297_v30  ;;  %5106 = vmatmul.mubr.bf16.gmra.mrb[240].mxu1 %v6237_v3  ;;  %5136 = vmatpush3.bf16.msra.mxu0 %v5373_v32  ;;  %v5374_v63 = vld [vmem:[#allocation19 + $0x28] sm:$0xff]  }
 0x3be   :  { %v2069_v21 = vadd.f32 %v2038_v51, %v6763_v36  ;;  %v7021_v15 = vadd.f32 %v2319_v33, %v2068_v27  ;;  %5109 = vmatprep.mubr.msk.bf16.mxu1 %vm5698_vm0, %v7686_v18  ;;  %5137 = vmatprep.subr.bf16.mxu0 %v7686_v18 }
 0x3bf   :  { %5204 = vmatpush3.bf16.msra.mxu1 %v5374_v63 }
 0x3c0   :  { %v1963_v34 = vpop.f32.mrb[136].mxu1  ;;  %v2243_v1 = vpop.f32.mrb[188].mxu0  ;;  %5205 = vmatprep.subr.bf16.mxu1 %v7686_v18 }
 0x3c1   :  { %v2018_v26 = vrot.slane %v1963_v34, 7  ;;  %v2298_v56 = vrot.slane %v2243_v1, 1  ;;  %v4835_v35 = vpop.f32.mrb[137].mxu1  ;;  %v4903_v55 = vpop.f32.mrb[189].mxu0 }
 0x3c2   :  { %v1966_v10 = vpop.f32.mrb[138].mxu1  ;;  %v2246_v31 = vpop.f32.mrb[190].mxu0 }
 0x3c3   :  { %v2037_v3 = vsel %vm1747_vm2, %v2017_v49, %v2018_v26  ;;  %v2318_v36 = vsel %vm2308_vm4, %v2297_v30, %v2298_v56  ;;  %v2019_v59 = vrot.slane %v1966_v10, 7  ;;  %v2299_v41 = vrot.slane %v2246_v31, 1  ;;  %v4836_v24 = vpop.f32.mrb[139].mxu1  ;;  %v4904_v46 = vpop.f32.mrb[191].mxu0 }
 0x3c4   :  { %v2070_v38 = vadd.f32 %v2037_v3, %v6770_v22  ;;  %v7031_v57 = vadd.f32 %v2318_v36, %v2069_v21 }
 0x3c5   :  { %v2036_v12 = vsel %vm1747_vm2, %v2018_v26, %v2019_v59  ;;  %v2317_v50 = vsel %vm2308_vm4, %v2298_v56, %v2299_v41  ;;  %5110 = vmatmul.mubr.bf16.gmra.mrb[244].mxu1 %v6247_v16 }
 0x3c6   :  { %v2071_v49 = vadd.f32 %v2036_v12, %v6783_v19  ;;  %v7039_v30 = vadd.f32 %v2317_v50, %v2070_v38  ;;  %5113 = vmatprep.mubr.msk.bf16.mxu1 %vm5698_vm0, %v7686_v18  ;;  %v5376_v38 = vld [vmem:[#allocation19 + $0x30] sm:$0xff]  }
 0x3c7   :  { %5206 = vmatpush3.bf16.msra.mxu1 %v5376_v38 }
 0x3c8   :  { %v1971_v27 = vpop.f32.mrb[140].mxu1  ;;  %v2251_v22 = vpop.f32.mrb[192].mxu0  ;;  %5207 = vmatprep.subr.bf16.mxu1 %v7686_v18 }
 0x3c9   :  { %v2020_v51 = vrot.slane %v1971_v27, 7  ;;  %v2300_v33 = vrot.slane %v2251_v22, 1  ;;  %v4839_v21 = vpop.f32.mrb[141].mxu1  ;;  %v4907_v34 = vpop.f32.mrb[193].mxu0 }
 0x3ca   :  { %v1974_v1 = vpop.f32.mrb[142].mxu1  ;;  %v2254_v32 = vpop.f32.mrb[194].mxu0 }
 0x3cb   :  { %v2035_v16 = vsel %vm1747_vm2, %v2019_v59, %v2020_v51  ;;  %v2316_v19 = vsel %vm2308_vm4, %v2299_v41, %v2300_v33  ;;  %v2021_v26 = vrot.slane %v1974_v1, 7  ;;  %v2301_v56 = vrot.slane %v2254_v32, 1  ;;  %v4840_v35 = vpop.f32.mrb[143].mxu1  ;;  %v4908_v55 = vpop.f32.mrb[195].mxu0 }
 0x3cc   :  { %v2072_v10 = vadd.f32 %v2035_v16, %v6790_v23  ;;  %v7049_v31 = vadd.f32 %v2316_v19, %v2071_v49  ;;  %v5375_v23 = vld [vmem:[#allocation16 + $0x30] sm:$0xff]  }
 0x3cd   :  { %v2034_v3 = vsel %vm1747_vm2, %v2020_v51, %v2021_v26  ;;  %v2315_v36 = vsel %vm2308_vm4, %v2300_v33, %v2301_v56  ;;  %5114 = vmatmul.mubr.bf16.gmra.mrb[248].mxu1 %v6257_v43  ;;  %5138 = vmatpush3.bf16.msra.mxu0 %v5375_v23 }
 0x3ce   :  { %v2073_v59 = vadd.f32 %v2034_v3, %v6803_v48  ;;  %v7057_v24 = vadd.f32 %v2315_v36, %v2072_v10  ;;  %5117 = vmatprep.mubr.msk.bf16.mxu1 %vm5698_vm0, %v7686_v18  ;;  %5139 = vmatprep.subr.bf16.mxu0 %v7686_v18 }
 0x3d0   :  { %v1979_v41 = vpop.f32.mrb[144].mxu1  ;;  %v2259_v46 = vpop.f32.mrb[196].mxu0 }
 0x3d1   :  { %v2022_v12 = vrot.slane %v1979_v41, 7  ;;  %v2302_v50 = vrot.slane %v2259_v46, 1  ;;  %v4843_v49 = vpop.f32.mrb[145].mxu1  ;;  %v4911_v63 = vpop.f32.mrb[197].mxu0 }
 0x3d2   :  { %v1982_v27 = vpop.f32.mrb[146].mxu1  ;;  %v2262_v22 = vpop.f32.mrb[198].mxu0 }
 0x3d3   :  { %v2033_v43 = vsel %vm1747_vm2, %v2021_v26, %v2022_v12  ;;  %v2314_v48 = vsel %vm2308_vm4, %v2301_v56, %v2302_v50  ;;  %v2023_v51 = vrot.slane %v1982_v27, 7  ;;  %v2303_v33 = vrot.slane %v2262_v22, 1  ;;  %v4844_v21 = vpop.f32.mrb[147].mxu1  ;;  %v4912_v34 = vpop.f32.mrb[199].mxu0 }
 0x3d4   :  { %v2074_v1 = vadd.f32 %v2033_v43, %v6810_v42  ;;  %v7068_v32 = vadd.f32 %v2314_v48, %v2073_v59 }
 0x3d5   :  { %v2032_v16 = vsel %vm1747_vm2, %v2022_v12, %v2023_v51  ;;  %v2313_v19 = vsel %vm2308_vm4, %v2302_v50, %v2303_v33  ;;  %5118 = vmatmul.mubr.bf16.gmra.mrb[252].mxu1 %v6267_v60 }
 0x3d6   :  { %v2075_v26 = vadd.f32 %v2032_v16, %v6823_v28  ;;  %v7076_v56 = vadd.f32 %v2313_v19, %v2074_v1  ;;  %5121 = vmatprep.mubr.msk.bf16.mxu1 %vm5698_vm0, %v7686_v18 }
 0x3d8   :  { %v1987_v35 = vpop.f32.mrb[148].mxu1  ;;  %v2267_v55 = vpop.f32.mrb[200].mxu0 }
 0x3d9   :  { %v2024_v42 = vrot.slane %v1987_v35, 7  ;;  %v2304_v10 = vrot.slane %v2267_v55, 1  ;;  %v4847_v3 = vpop.f32.mrb[149].mxu1  ;;  %v4915_v36 = vpop.f32.mrb[201].mxu0 }
 0x3da   :  { %v1990_v59 = vpop.f32.mrb[150].mxu1  ;;  %v2270_v41 = vpop.f32.mrb[202].mxu0 }
 0x3db   :  { %v2031_v46 = vsel %vm1747_vm2, %v2023_v51, %v2024_v42  ;;  %v2312_v60 = vsel %vm2308_vm4, %v2303_v33, %v2304_v10  ;;  %v2025_v28 = vrot.slane %v1990_v59, 7  ;;  %v2305_v23 = vrot.slane %v2270_v41, 1  ;;  %v4848_v38 = vpop.f32.mrb[151].mxu1  ;;  %v4916_v12 = vpop.f32.mrb[203].mxu0  ;;  %v5378_v33 = vld [vmem:[#allocation19 + $0x38] sm:$0xff]  }
 0x3dc   :  { %v2076_v50 = vadd.f32 %v2031_v46, %v6830_v9  ;;  %v7085_v49 = vadd.f32 %v2312_v60, %v2075_v26  ;;  %v5377_v9 = vld [vmem:[#allocation16 + $0x38] sm:$0xff]   ;;  %5208 = vmatpush3.bf16.msra.mxu1 %v5378_v33  ;;  %v2282_v59 = vrot.slane %v6880_v39, 1 }
 0x3dd   :  { %v2030_v63 = vsel %vm1747_vm2, %v2024_v42, %v2025_v28  ;;  %v2311_v27 = vsel %vm2308_vm4, %v2304_v10, %v2305_v23  ;;  %5122 = vmatmul.mubr.bf16.gmra.mrb[0].mxu1 %v6277_v5  ;;  %5140 = vmatpush3.bf16.msra.mxu0 %v5377_v9 }
 0x3de   :  { %v2077_v22 = vadd.f32 %v2030_v63, %v6843_v45  ;;  %v7093_v43 = vadd.f32 %v2311_v27, %v2076_v50  ;;  %5209 = vmatprep.mubr.msk.bf16.mxu1 %vm5698_vm0, %v7686_v18  ;;  %v2333_v58 = vsel %vm2308_vm4, %v2282_v59, %v2283_v53 }
 0x3e0   :  { %v1995_v48 = vpop.f32.mrb[152].mxu1  ;;  %v2275_v51 = vpop.f32.mrb[204].mxu0 }
 0x3e1   :  { %v2026_v21 = vrot.slane %v1995_v48, 7  ;;  %v2306_v34 = vrot.slane %v2275_v51, 1  ;;  %v4851_v1 = vpop.f32.mrb[153].mxu1  ;;  %v4919_v16 = vpop.f32.mrb[205].mxu0 }
 0x3e2   :  { %v1998_v19 = vpop.f32.mrb[154].mxu1  ;;  %v2278_v26 = vpop.f32.mrb[206].mxu0 }
 0x3e3   :  { %v2029_v5 = vsel %vm1747_vm2, %v2025_v28, %v2026_v21  ;;  %v2310_v45 = vsel %vm2308_vm4, %v2305_v23, %v2306_v34  ;;  %v2027_v35 = vrot.slane %v1998_v19, 7  ;;  %v2307_v55 = vrot.slane %v2278_v26, 1  ;;  %v4852_v42 = vpop.f32.mrb[155].mxu1  ;;  %v4920_v10 = vpop.f32.mrb[207].mxu0 }
 0x3e4   :  { %v2078_v3 = vadd.f32 %v2029_v5, %v6850_v20  ;;  %v7102_v36 = vadd.f32 %v2310_v45, %v2077_v22 }
 0x3e5   :  { %v2028_v41 = vsel %vm1747_vm2, %v2026_v21, %v2027_v35  ;;  %v2053_v46 = vsel %vm1747_vm2, %v2027_v35, %v2002_v61  ;;  %v2309_v60 = vsel %vm2308_vm4, %v2306_v34, %v2307_v55  ;;  %5210 = vmatmul.mubr.bf16.vlgmr.msra.gmra.mrb[4].mxu1 %v5985_v62  ;;  %v2334_v39 = vsel %vm2308_vm4, %v2307_v55, %v2282_v59 }
 0x3e6   :  { %v2054_v28 = vadd.f32 %v2053_v46, %v6876_v52  ;;  %v2079_v20 = vadd.f32 %v2028_v41, %v6870_v13  ;;  %v7116_v23 = vadd.f32 %v2309_v60, %v2078_v3  ;;  %5213 = vmatprep.mubr.msk.bf16.mxu1 %vm5698_vm0, %v7686_v18 }
 0x3e8   :  { %v2360_v61 = vadd.f32 %v2334_v39, %v2079_v20  ;;  %v7126_v38 = vpop.f32.mrb[156].mxu1  ;;  %v7128_v62 = vpop.f32.mrb[208].mxu0  ;;  %v2335_v52 = vadd.f32 %v2333_v58, %v2054_v28  ;;  %v7689_v20 = vld [vmem:[#allocation36_spill] sm:$0xff] }
 0x3e9   :  { %v4939_v13 = vpop.f32.mrb[157].mxu1  ;;  %v5007_v12 = vpop.f32.mrb[209].mxu0  ;;  %v2563_v25 = vrot.slane %v7126_v38, 1  ;;  %v2843_v27 = vrot.slane %v7128_v62, 2 }
 0x3ea   :  { %v2463_v50 = vpop.f32.mrb[158].mxu1  ;;  %v2743_v63 = vpop.f32.mrb[210].mxu0 }
 0x3eb   :  { %v2564_v53 = vrot.slane %v2463_v50, 1  ;;  %v2844_v22 = vrot.slane %v2743_v63, 2  ;;  %v4940_v48 = vpop.f32.mrb[159].mxu1  ;;  %v5008_v51 = vpop.f32.mrb[211].mxu0 }
 0x3ed   :  { %v2613_v9 = vsel %vm2308_vm4, %v2563_v25, %v2564_v53  ;;  %v2894_v33 = vsel %vm2869_vm5, %v2843_v27, %v2844_v22  ;;  %5214 = vmatmul.mubr.bf16.gmra.mrb[8].mxu1 %v5990_v4 }
 0x3ee   :  { %v2640_v21 = vadd.f32 %v2613_v9, %v2360_v61  ;;  %5217 = vmatprep.mubr.msk.bf16.mxu1 %vm5698_vm0, %v7686_v18 }
 0x3f0   :  { %v7144_v34 = vadd.f32 %v2894_v33, %v2640_v21  ;;  %v2468_v1 = vpop.f32.mrb[160].mxu1  ;;  %v2748_v16 = vpop.f32.mrb[212].mxu0 }
 0x3f1   :  { %v2565_v19 = vrot.slane %v2468_v1, 1  ;;  %v2845_v26 = vrot.slane %v2748_v16, 2  ;;  %v4943_v5 = vpop.f32.mrb[161].mxu1  ;;  %v5011_v45 = vpop.f32.mrb[213].mxu0 }
 0x3f2   :  { %v2471_v35 = vpop.f32.mrb[162].mxu1  ;;  %v2751_v55 = vpop.f32.mrb[214].mxu0  ;;  %v7690_v5 = vld [vmem:[#allocation37_spill] sm:$0xff] }
 0x3f3   :  { %v2612_v42 = vsel %vm2308_vm4, %v2564_v53, %v2565_v19  ;;  %v2893_v4 = vsel %vm2869_vm5, %v2844_v22, %v2845_v26  ;;  %v2566_v10 = vrot.slane %v2471_v35, 1  ;;  %v2846_v3 = vrot.slane %v2751_v55, 2  ;;  %v4944_v59 = vpop.f32.mrb[163].mxu1  ;;  %v5012_v41 = vpop.f32.mrb[215].mxu0 }
 0x3f4   :  { %v2615_v46 = vadd.f32 %v2612_v42, %v2335_v52 }
 0x3f5   :  { %v2611_v60 = vsel %vm2308_vm4, %v2565_v19, %v2566_v10  ;;  %v2892_v28 = vsel %vm2869_vm5, %v2845_v26, %v2846_v3  ;;  %5218 = vmatmul.mubr.bf16.gmra.mrb[12].mxu1 %v7689_v20 }
 0x3f6   :  { %v7155_v58 = vadd.f32 %v2893_v4, %v2615_v46  ;;  %v2616_v39 = vadd.f32 %v2611_v60, %v6903_v11  ;;  %5221 = vmatprep.mubr.msk.bf16.mxu1 %vm5698_vm0, %v7686_v18 }
 0x3f8   :  { %v7160_v61 = vadd.f32 %v2892_v28, %v2616_v39  ;;  %v2476_v13 = vpop.f32.mrb[164].mxu1  ;;  %v2756_v12 = vpop.f32.mrb[216].mxu0 }
 0x3f9   :  { %v2567_v52 = vrot.slane %v2476_v13, 1  ;;  %v2847_v50 = vrot.slane %v2756_v12, 2  ;;  %v4947_v63 = vpop.f32.mrb[165].mxu1  ;;  %v5015_v53 = vpop.f32.mrb[217].mxu0 }
 0x3fa   :  { %v2479_v22 = vpop.f32.mrb[166].mxu1  ;;  %v2759_v48 = vpop.f32.mrb[218].mxu0  ;;  %v7691_v63 = vld [vmem:[#allocation38_spill] sm:$0xff] }
 0x3fb   :  { %v2610_v51 = vsel %vm2308_vm4, %v2566_v10, %v2567_v52  ;;  %v2891_v9 = vsel %vm2869_vm5, %v2846_v3, %v2847_v50  ;;  %v2568_v11 = vrot.slane %v2479_v22, 1  ;;  %v2848_v33 = vrot.slane %v2759_v48, 2  ;;  %v4948_v21 = vpop.f32.mrb[167].mxu1  ;;  %v5016_v1 = vpop.f32.mrb[219].mxu0 }
 0x3fc   :  { %v2617_v16 = vadd.f32 %v2610_v51, %v6911_v7 }
 0x3fd   :  { %v2609_v19 = vsel %vm2308_vm4, %v2567_v52, %v2568_v11  ;;  %v2890_v26 = vsel %vm2869_vm5, %v2847_v50, %v2848_v33  ;;  %5222 = vmatmul.mubr.bf16.gmra.mrb[16].mxu1 %v7690_v5 }
 0x3fe   :  { %v7172_v45 = vadd.f32 %v2891_v9, %v2617_v16  ;;  %v2618_v35 = vadd.f32 %v2609_v19, %v6922_v44  ;;  %5225 = vmatprep.mubr.msk.bf16.mxu1 %vm5698_vm0, %v7686_v18 }
 0x400   :  { %v7177_v55 = vadd.f32 %v2890_v26, %v2618_v35  ;;  %v2484_v42 = vpop.f32.mrb[168].mxu1  ;;  %v2764_v4 = vpop.f32.mrb[220].mxu0 }
 0x401   :  { %v2569_v7 = vrot.slane %v2484_v42, 1  ;;  %v2849_v10 = vrot.slane %v2764_v4, 2  ;;  %v4951_v3 = vpop.f32.mrb[169].mxu1  ;;  %v5019_v59 = vpop.f32.mrb[221].mxu0 }
 0x402   :  { %v2487_v41 = vpop.f32.mrb[170].mxu1  ;;  %v2767_v46 = vpop.f32.mrb[222].mxu0  ;;  %v7692_v3 = vld [vmem:[#allocation39_spill] sm:$0xff] }
 0x403   :  { %v2608_v60 = vsel %vm2308_vm4, %v2568_v11, %v2569_v7  ;;  %v2889_v28 = vsel %vm2869_vm5, %v2848_v33, %v2849_v10  ;;  %v2570_v44 = vrot.slane %v2487_v41, 1  ;;  %v2850_v20 = vrot.slane %v2767_v46, 2  ;;  %v4952_v39 = vpop.f32.mrb[171].mxu1  ;;  %v5020_v13 = vpop.f32.mrb[223].mxu0 }
 0x404   :  { %v2619_v12 = vadd.f32 %v2608_v60, %v6930_v37 }
 0x405   :  { %v2607_v52 = vsel %vm2308_vm4, %v2569_v7, %v2570_v44  ;;  %v2888_v50 = vsel %vm2869_vm5, %v2849_v10, %v2850_v20  ;;  %5226 = vmatmul.mubr.bf16.gmra.mrb[20].mxu1 %v7691_v63 }
 0x406   :  { %v7189_v53 = vadd.f32 %v2889_v28, %v2619_v12  ;;  %v2620_v22 = vadd.f32 %v2607_v52, %v6939_v6  ;;  %5229 = vmatprep.mubr.msk.bf16.mxu1 %vm5698_vm0, %v7686_v18 }
 0x408   :  { %v7194_v48 = vadd.f32 %v2888_v50, %v2620_v22  ;;  %v2492_v51 = vpop.f32.mrb[172].mxu1  ;;  %v2772_v9 = vpop.f32.mrb[224].mxu0 }
 0x409   :  { %v2571_v37 = vrot.slane %v2492_v51, 1  ;;  %v2851_v11 = vrot.slane %v2772_v9, 2  ;;  %v4955_v33 = vpop.f32.mrb[173].mxu1  ;;  %v5023_v21 = vpop.f32.mrb[225].mxu0 }
 0x40a   :  { %v2495_v1 = vpop.f32.mrb[174].mxu1  ;;  %v2775_v16 = vpop.f32.mrb[226].mxu0  ;;  %v7693_v33 = vld [vmem:[#allocation40_spill] sm:$0xff] }
 0x40b   :  { %v2606_v19 = vsel %vm2308_vm4, %v2570_v44, %v2571_v37  ;;  %v2887_v26 = vsel %vm2869_vm5, %v2850_v20, %v2851_v11  ;;  %v2572_v6 = vrot.slane %v2495_v1, 1  ;;  %v2852_v5 = vrot.slane %v2775_v16, 2  ;;  %v4956_v35 = vpop.f32.mrb[175].mxu1  ;;  %v5024_v42 = vpop.f32.mrb[227].mxu0 }
 0x40c   :  { %v2621_v4 = vadd.f32 %v2606_v19, %v6947_v54 }
 0x40d   :  { %v2605_v7 = vsel %vm2308_vm4, %v2571_v37, %v2572_v6  ;;  %v2886_v10 = vsel %vm2869_vm5, %v2851_v11, %v2852_v5  ;;  %5230 = vmatmul.mubr.bf16.gmra.mrb[24].mxu1 %v7692_v3 }
 0x40e   :  { %v7206_v59 = vadd.f32 %v2887_v26, %v2621_v4  ;;  %v2622_v41 = vadd.f32 %v2605_v7, %v6958_v40  ;;  %5233 = vmatprep.mubr.msk.bf16.mxu1 %vm5698_vm0, %v7686_v18 }
 0x410   :  { %v7211_v46 = vadd.f32 %v2886_v10, %v2622_v41  ;;  %v2500_v60 = vpop.f32.mrb[176].mxu1  ;;  %v2780_v28 = vpop.f32.mrb[228].mxu0 }
 0x411   :  { %v2573_v54 = vrot.slane %v2500_v60, 1  ;;  %v2853_v44 = vrot.slane %v2780_v28, 2  ;;  %v4959_v20 = vpop.f32.mrb[177].mxu1  ;;  %v5027_v39 = vpop.f32.mrb[229].mxu0 }
 0x412   :  { %v2503_v13 = vpop.f32.mrb[178].mxu1  ;;  %v2783_v12 = vpop.f32.mrb[230].mxu0  ;;  %v7694_v20 = vld [vmem:[#allocation41_spill] sm:$0xff] }
 0x413   :  { %v2604_v52 = vsel %vm2308_vm4, %v2572_v6, %v2573_v54  ;;  %v2885_v50 = vsel %vm2869_vm5, %v2852_v5, %v2853_v44  ;;  %v2574_v40 = vrot.slane %v2503_v13, 1  ;;  %v2854_v63 = vrot.slane %v2783_v12, 2  ;;  %v4960_v22 = vpop.f32.mrb[179].mxu1  ;;  %v5028_v51 = vpop.f32.mrb[231].mxu0 }
 0x414   :  { %v2623_v9 = vadd.f32 %v2604_v52, %v6966_v14 }
 0x415   :  { %v2603_v37 = vsel %vm2308_vm4, %v2573_v54, %v2574_v40  ;;  %v2884_v11 = vsel %vm2869_vm5, %v2853_v44, %v2854_v63  ;;  %5234 = vmatmul.mubr.bf16.gmra.mrb[28].mxu1 %v7693_v33 }
 0x416   :  { %v7223_v21 = vadd.f32 %v2885_v50, %v2623_v9  ;;  %v2624_v1 = vadd.f32 %v2603_v37, %v6977_v0  ;;  %5237 = vmatprep.mubr.msk.bf16.mxu1 %vm5698_vm0, %v7686_v18 }
 0x418   :  { %v7228_v16 = vadd.f32 %v2884_v11, %v2624_v1  ;;  %v2508_v19 = vpop.f32.mrb[180].mxu1  ;;  %v2788_v26 = vpop.f32.mrb[232].mxu0 }
 0x419   :  { %v2575_v14 = vrot.slane %v2508_v19, 1  ;;  %v2855_v6 = vrot.slane %v2788_v26, 2  ;;  %v4963_v5 = vpop.f32.mrb[181].mxu1  ;;  %v5031_v35 = vpop.f32.mrb[233].mxu0 }
 0x41a   :  { %v2511_v42 = vpop.f32.mrb[182].mxu1  ;;  %v2791_v4 = vpop.f32.mrb[234].mxu0  ;;  %v7695_v5 = vld [vmem:[#allocation31_spill] sm:$0xff] }
 0x41b   :  { %v2602_v7 = vsel %vm2308_vm4, %v2574_v40, %v2575_v14  ;;  %v2883_v10 = vsel %vm2869_vm5, %v2854_v63, %v2855_v6  ;;  %v2576_v0 = vrot.slane %v2511_v42, 1  ;;  %v2856_v3 = vrot.slane %v2791_v4, 2  ;;  %v4964_v41 = vpop.f32.mrb[183].mxu1  ;;  %v5032_v60 = vpop.f32.mrb[235].mxu0 }
 0x41c   :  { %v2625_v28 = vadd.f32 %v2602_v7, %v6985_v17 }
 0x41d   :  { %v2601_v54 = vsel %vm2308_vm4, %v2575_v14, %v2576_v0  ;;  %v2882_v44 = vsel %vm2869_vm5, %v2855_v6, %v2856_v3  ;;  %5238 = vmatmul.mubr.bf16.gmra.mrb[32].mxu1 %v7694_v20 }
 0x41e   :  { %v7240_v39 = vadd.f32 %v2883_v10, %v2625_v28  ;;  %v2626_v13 = vadd.f32 %v2601_v54, %v6994_v8  ;;  %5241 = vmatprep.mubr.msk.bf16.mxu1 %vm5698_vm0, %v7686_v18 }
 0x420   :  { %v7245_v12 = vadd.f32 %v2882_v44, %v2626_v13  ;;  %v2516_v52 = vpop.f32.mrb[184].mxu1  ;;  %v2796_v50 = vpop.f32.mrb[236].mxu0 }
 0x421   :  { %v2577_v17 = vrot.slane %v2516_v52, 1  ;;  %v2857_v40 = vrot.slane %v2796_v50, 2  ;;  %v4967_v63 = vpop.f32.mrb[185].mxu1  ;;  %v5035_v22 = vpop.f32.mrb[237].mxu0 }
 0x422   :  { %v2519_v51 = vpop.f32.mrb[186].mxu1  ;;  %v2799_v9 = vpop.f32.mrb[238].mxu0  ;;  %v7696_v63 = vld [vmem:[#allocation32_spill] sm:$0xff] }
 0x423   :  { %v2600_v37 = vsel %vm2308_vm4, %v2576_v0, %v2577_v17  ;;  %v2881_v11 = vsel %vm2869_vm5, %v2856_v3, %v2857_v40  ;;  %v2578_v8 = vrot.slane %v2519_v51, 1  ;;  %v2858_v33 = vrot.slane %v2799_v9, 2  ;;  %v4968_v1 = vpop.f32.mrb[187].mxu1  ;;  %v5036_v19 = vpop.f32.mrb[239].mxu0 }
 0x424   :  { %v2627_v26 = vadd.f32 %v2600_v37, %v7002_v29 }
 0x425   :  { %v2599_v14 = vsel %vm2308_vm4, %v2577_v17, %v2578_v8  ;;  %v2880_v6 = vsel %vm2869_vm5, %v2857_v40, %v2858_v33  ;;  %5242 = vmatmul.mubr.bf16.gmra.mrb[36].mxu1 %v7695_v5 }
 0x426   :  { %v7257_v35 = vadd.f32 %v2881_v11, %v2627_v26  ;;  %v2628_v42 = vadd.f32 %v2599_v14, %v7013_v2  ;;  %5245 = vmatprep.mubr.msk.bf16.mxu1 %vm5698_vm0, %v7686_v18 }
 0x428   :  { %v7262_v4 = vadd.f32 %v2880_v6, %v2628_v42  ;;  %v2524_v7 = vpop.f32.mrb[188].mxu1  ;;  %v2804_v10 = vpop.f32.mrb[240].mxu0 }
 0x429   :  { %v2579_v29 = vrot.slane %v2524_v7, 1  ;;  %v2859_v0 = vrot.slane %v2804_v10, 2  ;;  %v4971_v3 = vpop.f32.mrb[189].mxu1  ;;  %v5039_v41 = vpop.f32.mrb[241].mxu0 }
 0x42a   :  { %v2527_v60 = vpop.f32.mrb[190].mxu1  ;;  %v2807_v28 = vpop.f32.mrb[242].mxu0  ;;  %v7697_v3 = vld [vmem:[#allocation33_spill] sm:$0xff] }
 0x42b   :  { %v2598_v54 = vsel %vm2308_vm4, %v2578_v8, %v2579_v29  ;;  %v2879_v44 = vsel %vm2869_vm5, %v2858_v33, %v2859_v0  ;;  %v2580_v2 = vrot.slane %v2527_v60, 1  ;;  %v2860_v20 = vrot.slane %v2807_v28, 2  ;;  %v4972_v13 = vpop.f32.mrb[191].mxu1  ;;  %v5040_v52 = vpop.f32.mrb[243].mxu0 }
 0x42c   :  { %v2629_v50 = vadd.f32 %v2598_v54, %v7021_v15 }
 0x42d   :  { %v2597_v17 = vsel %vm2308_vm4, %v2579_v29, %v2580_v2  ;;  %v2878_v40 = vsel %vm2869_vm5, %v2859_v0, %v2860_v20  ;;  %5246 = vmatmul.mubr.bf16.gmra.mrb[40].mxu1 %v7696_v63 }
 0x42e   :  { %v7274_v22 = vadd.f32 %v2879_v44, %v2629_v50  ;;  %v2630_v51 = vadd.f32 %v2597_v17, %v7031_v57  ;;  %5249 = vmatprep.mubr.msk.bf16.mxu1 %vm5698_vm0, %v7686_v18 }
 0x430   :  { %v7279_v9 = vadd.f32 %v2878_v40, %v2630_v51  ;;  %v2532_v37 = vpop.f32.mrb[192].mxu1  ;;  %v2812_v11 = vpop.f32.mrb[244].mxu0 }
 0x431   :  { %v2581_v15 = vrot.slane %v2532_v37, 1  ;;  %v2861_v8 = vrot.slane %v2812_v11, 2  ;;  %v4975_v33 = vpop.f32.mrb[193].mxu1  ;;  %v5043_v1 = vpop.f32.mrb[245].mxu0 }
 0x432   :  { %v2535_v19 = vpop.f32.mrb[194].mxu1  ;;  %v2815_v26 = vpop.f32.mrb[246].mxu0  ;;  %v7698_v33 = vld [vmem:[#allocation34_spill] sm:$0xff] }
 0x433   :  { %v2596_v14 = vsel %vm2308_vm4, %v2580_v2, %v2581_v15  ;;  %v2877_v6 = vsel %vm2869_vm5, %v2860_v20, %v2861_v8  ;;  %v2582_v57 = vrot.slane %v2535_v19, 1  ;;  %v2862_v5 = vrot.slane %v2815_v26, 2  ;;  %v4976_v42 = vpop.f32.mrb[195].mxu1  ;;  %v5044_v7 = vpop.f32.mrb[247].mxu0 }
 0x434   :  { %v2631_v10 = vadd.f32 %v2596_v14, %v7039_v30 }
 0x435   :  { %v2595_v29 = vsel %vm2308_vm4, %v2581_v15, %v2582_v57  ;;  %v2876_v0 = vsel %vm2869_vm5, %v2861_v8, %v2862_v5  ;;  %5250 = vmatmul.mubr.bf16.gmra.mrb[44].mxu1 %v7697_v3 }
 0x436   :  { %v7291_v41 = vadd.f32 %v2877_v6, %v2631_v10  ;;  %v2632_v60 = vadd.f32 %v2595_v29, %v7049_v31  ;;  %5253 = vmatprep.mubr.msk.bf16.mxu1 %vm5698_vm0, %v7686_v18 }
 0x438   :  { %v7296_v28 = vadd.f32 %v2876_v0, %v2632_v60  ;;  %v2540_v54 = vpop.f32.mrb[196].mxu1  ;;  %v2820_v44 = vpop.f32.mrb[248].mxu0 }
 0x439   :  { %v2583_v30 = vrot.slane %v2540_v54, 1  ;;  %v2863_v2 = vrot.slane %v2820_v44, 2  ;;  %v4979_v20 = vpop.f32.mrb[197].mxu1  ;;  %v5047_v13 = vpop.f32.mrb[249].mxu0 }
 0x43a   :  { %v2543_v52 = vpop.f32.mrb[198].mxu1  ;;  %v2823_v50 = vpop.f32.mrb[250].mxu0  ;;  %v7699_v20 = vld [vmem:[#allocation35_spill] sm:$0xff] }
 0x43b   :  { %v2594_v17 = vsel %vm2308_vm4, %v2582_v57, %v2583_v30  ;;  %v2875_v40 = vsel %vm2869_vm5, %v2862_v5, %v2863_v2  ;;  %v2584_v31 = vrot.slane %v2543_v52, 1  ;;  %v2864_v63 = vrot.slane %v2823_v50, 2  ;;  %v4980_v51 = vpop.f32.mrb[199].mxu1  ;;  %v5048_v37 = vpop.f32.mrb[251].mxu0 }
 0x43c   :  { %v2633_v11 = vadd.f32 %v2594_v17, %v7057_v24 }
 0x43d   :  { %v2593_v15 = vsel %vm2308_vm4, %v2583_v30, %v2584_v31  ;;  %v2874_v8 = vsel %vm2869_vm5, %v2863_v2, %v2864_v63  ;;  %5254 = vmatmul.mubr.bf16.gmra.mrb[48].mxu1 %v7698_v33 }
 0x43e   :  { %v7308_v1 = vadd.f32 %v2875_v40, %v2633_v11  ;;  %v2634_v19 = vadd.f32 %v2593_v15, %v7068_v32  ;;  %5257 = vmatprep.mubr.msk.bf16.mxu1 %vm5698_vm0, %v7686_v18 }
 0x440   :  { %v7313_v26 = vadd.f32 %v2874_v8, %v2634_v19  ;;  %v2548_v14 = vpop.f32.mrb[200].mxu1  ;;  %v2828_v6 = vpop.f32.mrb[252].mxu0 }
 0x441   :  { %v2585_v24 = vrot.slane %v2548_v14, 1  ;;  %v2865_v57 = vrot.slane %v2828_v6, 2  ;;  %v4983_v5 = vpop.f32.mrb[201].mxu1  ;;  %v5051_v42 = vpop.f32.mrb[253].mxu0 }
 0x442   :  { %v2551_v7 = vpop.f32.mrb[202].mxu1  ;;  %v2831_v10 = vpop.f32.mrb[254].mxu0 }
 0x443   :  { %v2592_v29 = vsel %vm2308_vm4, %v2584_v31, %v2585_v24  ;;  %v2873_v0 = vsel %vm2869_vm5, %v2864_v63, %v2865_v57  ;;  %v2586_v32 = vrot.slane %v2551_v7, 1  ;;  %v2866_v3 = vrot.slane %v2831_v10, 2  ;;  %v4984_v60 = vpop.f32.mrb[203].mxu1  ;;  %v5052_v54 = vpop.f32.mrb[255].mxu0 }
 0x444   :  { %v2635_v44 = vadd.f32 %v2592_v29, %v7076_v56 }
 0x445   :  { %v2591_v30 = vsel %vm2308_vm4, %v2585_v24, %v2586_v32  ;;  %v2872_v2 = vsel %vm2869_vm5, %v2865_v57, %v2866_v3  ;;  %5258 = vmatmul.mubr.bf16.gmra.mrb[52].mxu1 %v7699_v20 }
 0x446   :  { %v7325_v13 = vadd.f32 %v2873_v0, %v2635_v44  ;;  %v2636_v52 = vadd.f32 %v2591_v30, %v7085_v49 }
 0x448   :  { %v7328_v50 = vadd.f32 %v2872_v2, %v2636_v52  ;;  %v2556_v17 = vpop.f32.mrb[204].mxu1  ;;  %v2836_v40 = vpop.f32.mrb[0].mxu0 }
 0x449   :  { %v2587_v31 = vrot.slane %v2556_v17, 1  ;;  %v2867_v63 = vrot.slane %v2836_v40, 2  ;;  %v4987_v51 = vpop.f32.mrb[205].mxu1  ;;  %v5055_v56 = vpop.f32.mrb[1].mxu0  ;;  %v7369_v40 = vld [vmem:[#allocation14] ss:$0 sm:$0xff] }
 0x44a   :  { %v2559_v37 = vpop.f32.mrb[206].mxu1  ;;  %v2839_v11 = vpop.f32.mrb[2].mxu0 }
 0x44b   :  { %v2590_v15 = vsel %vm2308_vm4, %v2586_v32, %v2587_v31  ;;  %v2871_v8 = vsel %vm2869_vm5, %v2866_v3, %v2867_v63  ;;  %v2588_v33 = vrot.slane %v2559_v37, 1  ;;  %v2868_v19 = vrot.slane %v2839_v11, 2  ;;  %v4988_v14 = vpop.f32.mrb[207].mxu1  ;;  %v5056_v49 = vpop.f32.mrb[3].mxu0 }
 0x44c   :  { %v2637_v6 = vadd.f32 %v2590_v15, %v7093_v43 }
 0x44d   :  { %v2589_v24 = vsel %vm2308_vm4, %v2587_v31, %v2588_v33  ;;  %v2614_v57 = vsel %vm2308_vm4, %v2588_v33, %v2563_v25  ;;  %v2870_v5 = vsel %vm2869_vm5, %v2867_v63, %v2868_v19  ;;  %v2895_v42 = vsel %vm2869_vm5, %v2868_v19, %v2843_v27 }
 0x44e   :  { %v7347_v7 = vadd.f32 %v2871_v8, %v2637_v6  ;;  %v2638_v43 = vadd.f32 %v2589_v24, %v7102_v36  ;;  %v2639_v10 = vadd.f32 %v2614_v57, %v7116_v23 }
 0x450   :  { %v7351_v29 = vadd.f32 %v2870_v5, %v2638_v43  ;;  %v7353_v38 = vadd.f32 %v2895_v42, %v2639_v10  ;;  %v7355_v0 = vpop.f32.mrb[208].mxu1 }
 0x451   :  { %v5075_v25 = vpop.f32.mrb[209].mxu1  ;;  %v3124_v62 = vrot.slane %v7355_v0, 3 }
 0x452   :  { %v3024_v32 = vpop.f32.mrb[210].mxu1 }
 0x453   :  { %v3125_v3 = vrot.slane %v3024_v32, 3  ;;  %v5076_v27 = vpop.f32.mrb[211].mxu1 }
 0x455   :  { %v3175_v36 = vsel %vm3150_vm6, %v3124_v62, %v3125_v3 }
 0x456   :  { %v7364_v23 = vadd.f32 %v3175_v36, %v7144_v34 }
 0x458   :  { %v3029_v60 = vpop.f32.mrb[212].mxu1 }
 0x459   :  { %v3126_v54 = vrot.slane %v3029_v60, 3  ;;  %v5079_v44 = vpop.f32.mrb[213].mxu1 }
 0x45a   :  { %v3032_v30 = vpop.f32.mrb[214].mxu1 }
 0x45b   :  { %v3174_v2 = vsel %vm3150_vm6, %v3125_v3, %v3126_v54  ;;  %v3127_v20 = vrot.slane %v3032_v30, 3  ;;  %v5080_v52 = vpop.f32.mrb[215].mxu1 }
 0x45c   :  { %v3177_v17 = vadd.f32 %v3174_v2, %v7155_v58 }
 0x45d   :  { %v3173_v31 = vsel %vm3150_vm6, %v3126_v54, %v3127_v20 }
 0x45e   :  { %v3210_v63 = vadd.f32 %v7369_v40, %v3177_v17  ;;  %v3178_v34 = vadd.f32 %v3173_v31, %v7160_v61 }
 0x460   :  { %v3211_v51 = vadd.f32 %v7369_v40, %v3178_v34  ;;  %v3037_v56 = vpop.f32.mrb[216].mxu1  ;;  %v3236_v15 = vmax.f32 %v3210_v63, 0.0 }
 0x461   :  { %v3128_v37 = vrot.slane %v3037_v56, 3  ;;  %v5083_v11 = vpop.f32.mrb[217].mxu1 }
 0x462   :  { %v3237_v8 = vmax.f32 %v3211_v51, 0.0  ;;  %v3040_v33 = vpop.f32.mrb[218].mxu1 }
 0x463   :  { %v3172_v58 = vsel %vm3150_vm6, %v3127_v20, %v3128_v37  ;;  %v3129_v19 = vrot.slane %v3040_v33, 3  ;;  %v5084_v14 = vpop.f32.mrb[219].mxu1 }
 0x464   :  { %v3262_v49 = vpack.c.bf16 %v3237_v8, %v3236_v15  ;;  %v3179_v6 = vadd.f32 %v3172_v58, %v7172_v45 }
 0x465   :  { %v3171_v24 = vsel %vm3150_vm6, %v3128_v37, %v3129_v19 }
 0x466   :  { %v3212_v61 = vadd.f32 %v7369_v40, %v3179_v6  ;;  %v3180_v57 = vadd.f32 %v3171_v24, %v7177_v55  ;;  %5142 = vmatmul.mubr.bf16.vlgmr.msra.gmra.mrb[4].mxu0 %v3262_v49 }
 0x467   :  { %5145 = vmatprep.mubr.msk.bf16.mxu0 %vm5698_vm0, %v7686_v18 }
 0x468   :  { %v3213_v5 = vadd.f32 %v7369_v40, %v3180_v57  ;;  %v3045_v42 = vpop.f32.mrb[220].mxu1  ;;  %v3238_v25 = vmax.f32 %v3212_v61, 0.0 }
 0x469   :  { %v3130_v43 = vrot.slane %v3045_v42, 3  ;;  %v5087_v10 = vpop.f32.mrb[221].mxu1 }
 0x46a   :  { %v3239_v32 = vmax.f32 %v3213_v5, 0.0  ;;  %v3048_v3 = vpop.f32.mrb[222].mxu1 }
 0x46b   :  { %v3170_v45 = vsel %vm3150_vm6, %v3129_v19, %v3130_v43  ;;  %v3131_v27 = vrot.slane %v3048_v3, 3  ;;  %v5088_v36 = vpop.f32.mrb[223].mxu1 }
 0x46c   :  { %v3263_v60 = vpack.c.bf16 %v3239_v32, %v3238_v25  ;;  %v3181_v55 = vadd.f32 %v3170_v45, %v7189_v53 }
 0x46d   :  { %v3169_v54 = vsel %vm3150_vm6, %v3130_v43, %v3131_v27 }
 0x46e   :  { %v3214_v44 = vadd.f32 %v7369_v40, %v3181_v55  ;;  %v3182_v30 = vadd.f32 %v3169_v54, %v7194_v48  ;;  %5146 = vmatmul.mubr.bf16.gmra.mrb[8].mxu0 %v3263_v60 }
 0x46f   :  { %5149 = vmatprep.mubr.msk.bf16.mxu0 %vm5698_vm0, %v7686_v18 }
 0x470   :  { %v3215_v2 = vadd.f32 %v7369_v40, %v3182_v30  ;;  %v3053_v20 = vpop.f32.mrb[224].mxu1  ;;  %v3240_v31 = vmax.f32 %v3214_v44, 0.0 }
 0x471   :  { %v3132_v52 = vrot.slane %v3053_v20, 3  ;;  %v5091_v17 = vpop.f32.mrb[225].mxu1 }
 0x472   :  { %v3241_v63 = vmax.f32 %v3215_v2, 0.0  ;;  %v3056_v34 = vpop.f32.mrb[226].mxu1 }
 0x473   :  { %v3168_v53 = vsel %vm3150_vm6, %v3131_v27, %v3132_v52  ;;  %v3133_v51 = vrot.slane %v3056_v34, 3  ;;  %v5092_v56 = vpop.f32.mrb[227].mxu1 }
 0x474   :  { %v3264_v37 = vpack.c.bf16 %v3241_v63, %v3240_v31  ;;  %v3183_v48 = vadd.f32 %v3168_v53, %v7206_v59 }
 0x475   :  { %v3167_v11 = vsel %vm3150_vm6, %v3132_v52, %v3133_v51 }
 0x476   :  { %v3216_v15 = vadd.f32 %v7369_v40, %v3183_v48  ;;  %v3184_v8 = vadd.f32 %v3167_v11, %v7211_v46  ;;  %5150 = vmatmul.mubr.bf16.gmra.mrb[12].mxu0 %v3264_v37 }
 0x477   :  { %5153 = vmatprep.mubr.msk.bf16.mxu0 %vm5698_vm0, %v7686_v18 }
 0x478   :  { %v3217_v33 = vadd.f32 %v7369_v40, %v3184_v8  ;;  %v3061_v58 = vpop.f32.mrb[228].mxu1  ;;  %v3242_v49 = vmax.f32 %v3216_v15, 0.0 }
 0x479   :  { %v3134_v19 = vrot.slane %v3061_v58, 3  ;;  %v5095_v14 = vpop.f32.mrb[229].mxu1 }
 0x47a   :  { %v3243_v6 = vmax.f32 %v3217_v33, 0.0  ;;  %v3064_v24 = vpop.f32.mrb[230].mxu1 }
 0x47b   :  { %v3166_v59 = vsel %vm3150_vm6, %v3133_v51, %v3134_v19  ;;  %v3135_v61 = vrot.slane %v3064_v24, 3  ;;  %v5096_v57 = vpop.f32.mrb[231].mxu1 }
 0x47c   :  { %v3265_v5 = vpack.c.bf16 %v3243_v6, %v3242_v49  ;;  %v3185_v46 = vadd.f32 %v3166_v59, %v7223_v21 }
 0x47d   :  { %v3165_v42 = vsel %vm3150_vm6, %v3134_v19, %v3135_v61 }
 0x47e   :  { %v3218_v43 = vadd.f32 %v7369_v40, %v3185_v46  ;;  %v3186_v10 = vadd.f32 %v3165_v42, %v7228_v16  ;;  %5154 = vmatmul.mubr.bf16.gmra.mrb[16].mxu0 %v3265_v5 }
 0x47f   :  { %5157 = vmatprep.mubr.msk.bf16.mxu0 %vm5698_vm0, %v7686_v18 }
 0x480   :  { %v3219_v25 = vadd.f32 %v7369_v40, %v3186_v10  ;;  %v3069_v32 = vpop.f32.mrb[232].mxu1  ;;  %v3244_v27 = vmax.f32 %v3218_v43, 0.0 }
 0x481   :  { %v3136_v3 = vrot.slane %v3069_v32, 3  ;;  %v5099_v45 = vpop.f32.mrb[233].mxu1 }
 0x482   :  { %v3245_v36 = vmax.f32 %v3219_v25, 0.0  ;;  %v3072_v60 = vpop.f32.mrb[234].mxu1 }
 0x483   :  { %v3164_v21 = vsel %vm3150_vm6, %v3135_v61, %v3136_v3  ;;  %v3137_v55 = vrot.slane %v3072_v60, 3  ;;  %v5100_v54 = vpop.f32.mrb[235].mxu1 }
 0x484   :  { %v3266_v44 = vpack.c.bf16 %v3245_v36, %v3244_v27  ;;  %v3187_v16 = vadd.f32 %v3164_v21, %v7240_v39 }
 0x485   :  { %v3163_v30 = vsel %vm3150_vm6, %v3136_v3, %v3137_v55 }
 0x486   :  { %v3220_v2 = vadd.f32 %v7369_v40, %v3187_v16  ;;  %v3188_v20 = vadd.f32 %v3163_v30, %v7245_v12  ;;  %5158 = vmatmul.mubr.bf16.gmra.mrb[20].mxu0 %v3266_v44 }
 0x487   :  { %5161 = vmatprep.mubr.msk.bf16.mxu0 %vm5698_vm0, %v7686_v18 }
 0x488   :  { %v3221_v52 = vadd.f32 %v7369_v40, %v3188_v20  ;;  %v3077_v17 = vpop.f32.mrb[236].mxu1  ;;  %v3246_v34 = vmax.f32 %v3220_v2, 0.0 }
 0x489   :  { %v3138_v31 = vrot.slane %v3077_v17, 3  ;;  %v5103_v63 = vpop.f32.mrb[237].mxu1 }
 0x48a   :  { %v3247_v53 = vmax.f32 %v3221_v52, 0.0  ;;  %v3080_v51 = vpop.f32.mrb[238].mxu1 }
 0x48b   :  { %v3162_v39 = vsel %vm3150_vm6, %v3137_v55, %v3138_v31  ;;  %v3139_v56 = vrot.slane %v3080_v51, 3  ;;  %v5104_v37 = vpop.f32.mrb[239].mxu1 }
 0x48c   :  { %v3267_v48 = vpack.c.bf16 %v3247_v53, %v3246_v34  ;;  %v3189_v12 = vadd.f32 %v3162_v39, %v7257_v35 }
 0x48d   :  { %v3161_v11 = vsel %vm3150_vm6, %v3138_v31, %v3139_v56 }
 0x48e   :  { %v3222_v15 = vadd.f32 %v7369_v40, %v3189_v12  ;;  %v3190_v8 = vadd.f32 %v3161_v11, %v7262_v4  ;;  %5162 = vmatmul.mubr.bf16.gmra.mrb[24].mxu0 %v3267_v48 }
 0x48f   :  { %5165 = vmatprep.mubr.msk.bf16.mxu0 %vm5698_vm0, %v7686_v18 }
 0x490   :  { %v3223_v33 = vadd.f32 %v7369_v40, %v3190_v8  ;;  %v3085_v58 = vpop.f32.mrb[240].mxu1  ;;  %v3248_v49 = vmax.f32 %v3222_v15, 0.0 }
 0x491   :  { %v3140_v19 = vrot.slane %v3085_v58, 3  ;;  %v5107_v14 = vpop.f32.mrb[241].mxu1 }
 0x492   :  { %v3249_v6 = vmax.f32 %v3223_v33, 0.0  ;;  %v3088_v24 = vpop.f32.mrb[242].mxu1 }
 0x493   :  { %v3160_v35 = vsel %vm3150_vm6, %v3139_v56, %v3140_v19  ;;  %v3141_v59 = vrot.slane %v3088_v24, 3  ;;  %v5108_v61 = vpop.f32.mrb[243].mxu1 }
 0x494   :  { %v3268_v57 = vpack.c.bf16 %v3249_v6, %v3248_v49  ;;  %v3191_v4 = vadd.f32 %v3160_v35, %v7274_v22 }
 0x495   :  { %v3159_v5 = vsel %vm3150_vm6, %v3140_v19, %v3141_v59 }
 0x496   :  { %v3224_v46 = vadd.f32 %v7369_v40, %v3191_v4  ;;  %v3192_v42 = vadd.f32 %v3159_v5, %v7279_v9  ;;  %5166 = vmatmul.mubr.bf16.gmra.mrb[28].mxu0 %v3268_v57 }
 0x497   :  { %5169 = vmatprep.mubr.msk.bf16.mxu0 %vm5698_vm0, %v7686_v18 }
 0x498   :  { %v3225_v43 = vadd.f32 %v7369_v40, %v3192_v42  ;;  %v3093_v10 = vpop.f32.mrb[244].mxu1  ;;  %v3250_v3 = vmax.f32 %v3224_v46, 0.0 }
 0x499   :  { %v3142_v25 = vrot.slane %v3093_v10, 3  ;;  %v5111_v32 = vpop.f32.mrb[245].mxu1 }
 0x49a   :  { %v3251_v45 = vmax.f32 %v3225_v43, 0.0  ;;  %v3096_v27 = vpop.f32.mrb[246].mxu1 }
 0x49b   :  { %v3158_v22 = vsel %vm3150_vm6, %v3141_v59, %v3142_v25  ;;  %v3143_v36 = vrot.slane %v3096_v27, 3  ;;  %v5112_v60 = vpop.f32.mrb[247].mxu1 }
 0x49c   :  { %v3269_v21 = vpack.c.bf16 %v3251_v45, %v3250_v3  ;;  %v3193_v9 = vadd.f32 %v3158_v22, %v7291_v41  ;;  %v3235_v3 = vadd.f32 %v7369_v40, %v7364_v23 }
 0x49d   :  { %v3157_v55 = vsel %vm3150_vm6, %v3142_v25, %v3143_v36 }
 0x49e   :  { %v3226_v54 = vadd.f32 %v7369_v40, %v3193_v9  ;;  %v3194_v44 = vadd.f32 %v3157_v55, %v7296_v28  ;;  %5170 = vmatmul.mubr.bf16.gmra.mrb[32].mxu0 %v3269_v21 }
 0x49f   :  { %5173 = vmatprep.mubr.msk.bf16.mxu0 %vm5698_vm0, %v7686_v18 }
 0x4a0   :  { %v3227_v16 = vadd.f32 %v7369_v40, %v3194_v44  ;;  %v3101_v30 = vpop.f32.mrb[248].mxu1  ;;  %v3252_v52 = vmax.f32 %v3226_v54, 0.0 }
 0x4a1   :  { %v3144_v2 = vrot.slane %v3101_v30, 3  ;;  %v5115_v20 = vpop.f32.mrb[249].mxu1 }
 0x4a2   :  { %v3253_v17 = vmax.f32 %v3227_v16, 0.0  ;;  %v3104_v31 = vpop.f32.mrb[250].mxu1 }
 0x4a3   :  { %v3156_v41 = vsel %vm3150_vm6, %v3143_v36, %v3144_v2  ;;  %v3145_v63 = vrot.slane %v3104_v31, 3  ;;  %v5116_v34 = vpop.f32.mrb[251].mxu1 }
 0x4a4   :  { %v3270_v53 = vpack.c.bf16 %v3253_v17, %v3252_v52  ;;  %v3195_v28 = vadd.f32 %v3156_v41, %v7308_v1 }
 0x4a5   :  { %v3155_v51 = vsel %vm3150_vm6, %v3144_v2, %v3145_v63 }
 0x4a6   :  { %v3228_v39 = vadd.f32 %v7369_v40, %v3195_v28  ;;  %v3196_v56 = vadd.f32 %v3155_v51, %v7313_v26  ;;  %5174 = vmatmul.mubr.bf16.gmra.mrb[36].mxu0 %v3270_v53 }
 0x4a7   :  { %5177 = vmatprep.mubr.msk.bf16.mxu0 %vm5698_vm0, %v7686_v18 }
 0x4a8   :  { %v3229_v37 = vadd.f32 %v7369_v40, %v3196_v56  ;;  %v3109_v48 = vpop.f32.mrb[252].mxu1  ;;  %v3254_v15 = vmax.f32 %v3228_v39, 0.0 }
 0x4a9   :  { %v3146_v12 = vrot.slane %v3109_v48, 3  ;;  %v5119_v11 = vpop.f32.mrb[253].mxu1 }
 0x4aa   :  { %v3255_v8 = vmax.f32 %v3229_v37, 0.0  ;;  %v3112_v33 = vpop.f32.mrb[254].mxu1 }
 0x4ab   :  { %v3154_v1 = vsel %vm3150_vm6, %v3145_v63, %v3146_v12  ;;  %v3147_v58 = vrot.slane %v3112_v33, 3  ;;  %v5120_v19 = vpop.f32.mrb[255].mxu1 }
 0x4ac   :  { %v3271_v14 = vpack.c.bf16 %v3255_v8, %v3254_v15  ;;  %v3197_v26 = vadd.f32 %v3154_v1, %v7325_v13 }
 0x4ad   :  { %v3153_v49 = vsel %vm3150_vm6, %v3146_v12, %v3147_v58 }
 0x4ae   :  { %v3230_v6 = vadd.f32 %v7369_v40, %v3197_v26  ;;  %v3198_v24 = vadd.f32 %v3153_v49, %v7328_v50  ;;  %5178 = vmatmul.mubr.bf16.gmra.mrb[40].mxu0 %v3271_v14 }
 0x4af   :  { %5181 = vmatprep.mubr.msk.bf16.mxu0 %vm5698_vm0, %v7686_v18 }
 0x4b0   :  { %v3231_v35 = vadd.f32 %v7369_v40, %v3198_v24  ;;  %v3117_v59 = vpop.f32.mrb[0].mxu1  ;;  %v3256_v4 = vmax.f32 %v3230_v6, 0.0 }
 0x4b1   :  { %v3148_v61 = vrot.slane %v3117_v59, 3  ;;  %v5123_v57 = vpop.f32.mrb[1].mxu1 }
 0x4b2   :  { %v3257_v5 = vmax.f32 %v3231_v35, 0.0  ;;  %v3120_v46 = vpop.f32.mrb[2].mxu1 }
 0x4b3   :  { %v3152_v13 = vsel %vm3150_vm6, %v3147_v58, %v3148_v61  ;;  %v3149_v42 = vrot.slane %v3120_v46, 3  ;;  %v5124_v43 = vpop.f32.mrb[3].mxu1 }
 0x4b4   :  { %v3272_v10 = vpack.c.bf16 %v3257_v5, %v3256_v4  ;;  %v3199_v50 = vadd.f32 %v3152_v13, %v7347_v7 }
 0x4b5   :  { %v3151_v25 = vsel %vm3150_vm6, %v3148_v61, %v3149_v42  ;;  %v3176_v32 = vsel %vm3150_vm6, %v3149_v42, %v3124_v62  ;;  %v3261_v62 = vmax.f32 %v3235_v3, 0.0  ;;  %v7548_v3 = vld [vmem:[#allocation17] ss:$0 sm:$0xff] }
 0x4b6   :  { %v3232_v45 = vadd.f32 %v7369_v40, %v3199_v50  ;;  %v3200_v27 = vadd.f32 %v3151_v25, %v7351_v29  ;;  %v3201_v22 = vadd.f32 %v3176_v32, %v7353_v38  ;;  %5182 = vmatmul.mubr.bf16.gmra.mrb[44].mxu0 %v3272_v10 }
 0x4b7   :  { %5185 = vmatprep.mubr.msk.bf16.mxu0 %vm5698_vm0, %v7686_v18 }
 0x4b8   :  { %v3233_v7 = vadd.f32 %v7369_v40, %v3200_v27  ;;  %v3234_v0 = vadd.f32 %v7369_v40, %v3201_v22  ;;  %v7494_v36 = vpop.f32.mrb[4].mxu1  ;;  %v3258_v60 = vmax.f32 %v3232_v45, 0.0 }
 0x4b9   :  { %v5211_v47 = vpop.f32.mrb[5].mxu1 }
 0x4ba   :  { %v3259_v23 = vmax.f32 %v3233_v7, 0.0  ;;  %v3260_v21 = vmax.f32 %v3234_v0, 0.0  ;;  %v7496_v9 = vpop.f32.mrb[6].mxu1 }
 0x4bb   :  { %v5212_v29 = vpop.f32.mrb[7].mxu1 }
 0x4bc   :  { %v3273_v55 = vpack.c.bf16 %v3259_v23, %v3258_v60  ;;  %v3274_v38 = vpack.c.bf16 %v3261_v62, %v3260_v21  ;;  %v7553_v60 = vld [vmem:[#allocation20] ss:$0 sm:$0xff] }
 0x4be   :  { %5186 = vmatmul.mubr.bf16.gmra.mrb[48].mxu0 %v3273_v55 }
 0x4bf   :  { %5189 = vmatprep.mubr.msk.bf16.mxu0 %vm5698_vm0, %v7686_v18 }
 0x4c0   :  { %v7500_v54 = vpop.f32.mrb[8].mxu1 }
 0x4c1   :  { %v5215_v44 = vpop.f32.mrb[9].mxu1 }
 0x4c2   :  { %v7502_v40 = vpop.f32.mrb[10].mxu1 }
 0x4c3   :  { %v5216_v16 = vpop.f32.mrb[11].mxu1 }
 0x4c6   :  { %5190 = vmatmul.mubr.bf16.gmra.mrb[52].mxu0 %v3274_v38 }
 0x4c8   :  { %v7504_v30 = vpop.f32.mrb[12].mxu1 }
 0x4c9   :  { %v5219_v2 = vpop.f32.mrb[13].mxu1 }
 0x4ca   :  { %v7506_v20 = vpop.f32.mrb[14].mxu1 }
 0x4cb   :  { %v5220_v52 = vpop.f32.mrb[15].mxu1 }
 0x4d0   :  { %v7508_v17 = vpop.f32.mrb[16].mxu1 }
 0x4d1   :  { %v5223_v31 = vpop.f32.mrb[17].mxu1 }
 0x4d2   :  { %v7510_v41 = vpop.f32.mrb[18].mxu1 }
 0x4d3   :  { %v5224_v63 = vpop.f32.mrb[19].mxu1 }
 0x4d8   :  { %v7512_v18 = vpop.f32.mrb[20].mxu1 }
 0x4d9   :  { %v5227_v34 = vpop.f32.mrb[21].mxu1 }
 0x4da   :  { %v7514_v53 = vpop.f32.mrb[22].mxu1 }
 0x4db   :  { %v5228_v28 = vpop.f32.mrb[23].mxu1 }
 0x4e0   :  { %v7516_v51 = vpop.f32.mrb[24].mxu1 }
 0x4e1   :  { %v5231_v39 = vpop.f32.mrb[25].mxu1 }
 0x4e2   :  { %v7518_v56 = vpop.f32.mrb[26].mxu1 }
 0x4e3   :  { %v5232_v37 = vpop.f32.mrb[27].mxu1 }
 0x4e8   :  { %v7520_v48 = vpop.f32.mrb[28].mxu1 }
 0x4e9   :  { %v5235_v12 = vpop.f32.mrb[29].mxu1 }
 0x4ea   :  { %v7522_v11 = vpop.f32.mrb[30].mxu1 }
 0x4eb   :  { %v5236_v15 = vpop.f32.mrb[31].mxu1 }
 0x4f0   :  { %v7524_v8 = vpop.f32.mrb[32].mxu1 }
 0x4f1   :  { %v5239_v33 = vpop.f32.mrb[33].mxu1 }
 0x4f2   :  { %v7526_v1 = vpop.f32.mrb[34].mxu1 }
 0x4f3   :  { %v5240_v58 = vpop.f32.mrb[35].mxu1 }
 0x4f8   :  { %v7528_v19 = vpop.f32.mrb[36].mxu1 }
 0x4f9   :  { %v5243_v14 = vpop.f32.mrb[37].mxu1 }
 0x4fa   :  { %v7530_v26 = vpop.f32.mrb[38].mxu1 }
 0x4fb   :  { %v5244_v49 = vpop.f32.mrb[39].mxu1 }
 0x500   :  { %v7532_v6 = vpop.f32.mrb[40].mxu1 }
 0x501   :  { %v5247_v24 = vpop.f32.mrb[41].mxu1 }
 0x502   :  { %v7534_v35 = vpop.f32.mrb[42].mxu1 }
 0x503   :  { %v5248_v59 = vpop.f32.mrb[43].mxu1 }
 0x508   :  { %v7536_v61 = vpop.f32.mrb[44].mxu1 }
 0x509   :  { %v5251_v57 = vpop.f32.mrb[45].mxu1 }
 0x50a   :  { %v7538_v4 = vpop.f32.mrb[46].mxu1 }
 0x50b   :  { %v5252_v5 = vpop.f32.mrb[47].mxu1 }
 0x510   :  { %v7540_v46 = vpop.f32.mrb[48].mxu1 }
 0x511   :  { %v5255_v13 = vpop.f32.mrb[49].mxu1 }
 0x512   :  { %v7542_v42 = vpop.f32.mrb[50].mxu1 }
 0x513   :  { %v5256_v43 = vpop.f32.mrb[51].mxu1 }
 0x518   :  { %v7544_v10 = vpop.f32.mrb[52].mxu1 }
 0x519   :  { %v5259_v50 = vpop.f32.mrb[53].mxu1 }
 0x51a   :  { %v7546_v25 = vpop.f32.mrb[54].mxu1 }
 0x51b   :  { %v5260_v32 = vpop.f32.mrb[55].mxu1 }
 0x539   :  { %v3380_v45 = vpop.f32.mrb[4].mxu0 }
 0x53a   :  { %v3381_v27 = vadd.f32 %v7548_v3, %v3380_v45  ;;  %v5143_v22 = vpop.f32.mrb[5].mxu0 }
 0x53b   :  { %v3383_v7 = vpop.f32.mrb[6].mxu0 }
 0x53c   :  { %v3684_v0 = vadd.f32 %v7494_v36, %v3381_v27  ;;  %v3384_v47 = vadd.f32 %v7548_v3, %v3383_v7  ;;  %v5144_v62 = vpop.f32.mrb[7].mxu0 }
 0x53e   :  { %v3685_v23 = vadd.f32 %v7496_v9, %v3384_v47  ;;  %v3717_v21 = vadd.f32 %v7553_v60, %v3684_v0 }
 0x540   :  { %v3718_v29 = vadd.f32 %v7553_v60, %v3685_v23 }
 0x541   :  { %v3388_v55 = vpop.f32.mrb[8].mxu0 }
 0x542   :  { %v4107_v38 = vpack.c.bf16 %v3718_v29, %v3717_v21  ;;  %v3389_v44 = vadd.f32 %v7548_v3, %v3388_v55  ;;  %v5147_v16 = vpop.f32.mrb[9].mxu0 }
 0x543   :  { %v3391_v2 = vpop.f32.mrb[10].mxu0 }
 0x544   :  { %4108 = vst [vmem:[#allocation22] sm:$0xff] %v4107_v38   ;;  %v3686_v36 = vadd.f32 %v7500_v54, %v3389_v44  ;;  %v3392_v52 = vadd.f32 %v7548_v3, %v3391_v2  ;;  %v5148_v31 = vpop.f32.mrb[11].mxu0 }
 0x546   :  { %v3687_v63 = vadd.f32 %v7502_v40, %v3392_v52  ;;  %v3719_v9 = vadd.f32 %v7553_v60, %v3686_v36 }
 0x548   :  { %v3720_v34 = vadd.f32 %v7553_v60, %v3687_v63 }
 0x549   :  { %v3396_v28 = vpop.f32.mrb[12].mxu0 }
 0x54a   :  { %v4112_v39 = vpack.c.bf16 %v3720_v34, %v3719_v9  ;;  %v3397_v37 = vadd.f32 %v7548_v3, %v3396_v28  ;;  %v5151_v12 = vpop.f32.mrb[13].mxu0 }
 0x54b   :  { %v3399_v15 = vpop.f32.mrb[14].mxu0 }
 0x54c   :  { %4181 = vst [vmem:[#allocation22 + $0x8] sm:$0xff] %v4112_v39   ;;  %v3688_v33 = vadd.f32 %v7504_v30, %v3397_v37  ;;  %v3400_v54 = vadd.f32 %v7548_v3, %v3399_v15  ;;  %v5152_v58 = vpop.f32.mrb[15].mxu0 }
 0x54e   :  { %v3689_v14 = vadd.f32 %v7506_v20, %v3400_v54  ;;  %v3721_v40 = vadd.f32 %v7553_v60, %v3688_v33 }
 0x550   :  { %v3722_v49 = vadd.f32 %v7553_v60, %v3689_v14 }
 0x551   :  { %v3404_v24 = vpop.f32.mrb[16].mxu0 }
 0x552   :  { %v4117_v59 = vpack.c.bf16 %v3722_v49, %v3721_v40  ;;  %v3405_v57 = vadd.f32 %v7548_v3, %v3404_v24  ;;  %v5155_v5 = vpop.f32.mrb[17].mxu0 }
 0x553   :  { %v3407_v13 = vpop.f32.mrb[18].mxu0 }
 0x554   :  { %4182 = vst [vmem:[#allocation22 + $0x10] sm:$0xff] %v4117_v59   ;;  %v3690_v43 = vadd.f32 %v7508_v17, %v3405_v57  ;;  %v3408_v30 = vadd.f32 %v7548_v3, %v3407_v13  ;;  %v5156_v50 = vpop.f32.mrb[19].mxu0 }
 0x556   :  { %v3691_v32 = vadd.f32 %v7510_v41, %v3408_v30  ;;  %v3723_v20 = vadd.f32 %v7553_v60, %v3690_v43 }
 0x558   :  { %v3724_v45 = vadd.f32 %v7553_v60, %v3691_v32 }
 0x559   :  { %v3412_v27 = vpop.f32.mrb[20].mxu0 }
 0x55a   :  { %v4122_v22 = vpack.c.bf16 %v3724_v45, %v3723_v20  ;;  %v3413_v7 = vadd.f32 %v7548_v3, %v3412_v27  ;;  %v5159_v0 = vpop.f32.mrb[21].mxu0 }
 0x55b   :  { %v3415_v47 = vpop.f32.mrb[22].mxu0 }
 0x55c   :  { %4183 = vst [vmem:[#allocation22 + $0x18] sm:$0xff] %v4122_v22   ;;  %v3692_v62 = vadd.f32 %v7512_v18, %v3413_v7  ;;  %v3416_v17 = vadd.f32 %v7548_v3, %v3415_v47  ;;  %v5160_v23 = vpop.f32.mrb[23].mxu0 }
 0x55e   :  { %v3693_v21 = vadd.f32 %v7514_v53, %v3416_v17  ;;  %v3725_v41 = vadd.f32 %v7553_v60, %v3692_v62 }
 0x560   :  { %v3726_v29 = vadd.f32 %v7553_v60, %v3693_v21 }
 0x561   :  { %v3420_v55 = vpop.f32.mrb[24].mxu0 }
 0x562   :  { %v4127_v38 = vpack.c.bf16 %v3726_v29, %v3725_v41  ;;  %v3421_v44 = vadd.f32 %v7548_v3, %v3420_v55  ;;  %v5163_v16 = vpop.f32.mrb[25].mxu0 }
 0x563   :  { %v3423_v2 = vpop.f32.mrb[26].mxu0 }
 0x564   :  { %4184 = vst [vmem:[#allocation22 + $0x20] sm:$0xff] %v4127_v38   ;;  %v3694_v36 = vadd.f32 %v7516_v51, %v3421_v44  ;;  %v3424_v18 = vadd.f32 %v7548_v3, %v3423_v2  ;;  %v5164_v52 = vpop.f32.mrb[27].mxu0 }
 0x566   :  { %v3695_v31 = vadd.f32 %v7518_v56, %v3424_v18  ;;  %v3727_v53 = vadd.f32 %v7553_v60, %v3694_v36 }
 0x568   :  { %v3728_v63 = vadd.f32 %v7553_v60, %v3695_v31 }
 0x569   :  { %v3428_v9 = vpop.f32.mrb[28].mxu0 }
 0x56a   :  { %v4132_v34 = vpack.c.bf16 %v3728_v63, %v3727_v53  ;;  %v3429_v28 = vadd.f32 %v7548_v3, %v3428_v9  ;;  %v5167_v39 = vpop.f32.mrb[29].mxu0 }
 0x56b   :  { %v3431_v37 = vpop.f32.mrb[30].mxu0 }
 0x56c   :  { %4185 = vst [vmem:[#allocation22 + $0x28] sm:$0xff] %v4132_v34   ;;  %v3696_v12 = vadd.f32 %v7520_v48, %v3429_v28  ;;  %v3432_v51 = vadd.f32 %v7548_v3, %v3431_v37  ;;  %v5168_v15 = vpop.f32.mrb[31].mxu0 }
 0x56e   :  { %v3697_v33 = vadd.f32 %v7522_v11, %v3432_v51  ;;  %v3729_v56 = vadd.f32 %v7553_v60, %v3696_v12 }
 0x570   :  { %v3730_v54 = vadd.f32 %v7553_v60, %v3697_v33 }
 0x571   :  { %v3436_v58 = vpop.f32.mrb[32].mxu0 }
 0x572   :  { %v4137_v14 = vpack.c.bf16 %v3730_v54, %v3729_v56  ;;  %v3437_v40 = vadd.f32 %v7548_v3, %v3436_v58  ;;  %v5171_v49 = vpop.f32.mrb[33].mxu0 }
 0x573   :  { %v3439_v24 = vpop.f32.mrb[34].mxu0 }
 0x574   :  { %4186 = vst [vmem:[#allocation22 + $0x30] sm:$0xff] %v4137_v14   ;;  %v3698_v59 = vadd.f32 %v7524_v8, %v3437_v40  ;;  %v3440_v48 = vadd.f32 %v7548_v3, %v3439_v24  ;;  %v5172_v57 = vpop.f32.mrb[35].mxu0 }
 0x576   :  { %v3699_v5 = vadd.f32 %v7526_v1, %v3440_v48  ;;  %v3731_v11 = vadd.f32 %v7553_v60, %v3698_v59 }
 0x578   :  { %v3732_v13 = vadd.f32 %v7553_v60, %v3699_v5 }
 0x579   :  { %v3444_v43 = vpop.f32.mrb[36].mxu0 }
 0x57a   :  { %v4142_v30 = vpack.c.bf16 %v3732_v13, %v3731_v11  ;;  %v3445_v50 = vadd.f32 %v7548_v3, %v3444_v43  ;;  %v5175_v32 = vpop.f32.mrb[37].mxu0 }
 0x57b   :  { %v3447_v20 = vpop.f32.mrb[38].mxu0 }
 0x57c   :  { %4187 = vst [vmem:[#allocation22 + $0x38] sm:$0xff] %v4142_v30   ;;  %v3700_v45 = vadd.f32 %v7528_v19, %v3445_v50  ;;  %v3448_v8 = vadd.f32 %v7548_v3, %v3447_v20  ;;  %v5176_v27 = vpop.f32.mrb[39].mxu0 }
 0x57e   :  { %v3701_v22 = vadd.f32 %v7530_v26, %v3448_v8  ;;  %v3733_v1 = vadd.f32 %v7553_v60, %v3700_v45 }
 0x580   :  { %v3734_v7 = vadd.f32 %v7553_v60, %v3701_v22 }
 0x581   :  { %v3452_v0 = vpop.f32.mrb[40].mxu0 }
 0x582   :  { %v4147_v47 = vpack.c.bf16 %v3734_v7, %v3733_v1  ;;  %v3453_v62 = vadd.f32 %v7548_v3, %v3452_v0  ;;  %v5179_v17 = vpop.f32.mrb[41].mxu0 }
 0x583   :  { %v3455_v23 = vpop.f32.mrb[42].mxu0 }
 0x584   :  { %4188 = vst [vmem:[#allocation22 + $0x40] sm:$0xff] %v4147_v47   ;;  %v3702_v21 = vadd.f32 %v7532_v6, %v3453_v62  ;;  %v3456_v19 = vadd.f32 %v7548_v3, %v3455_v23  ;;  %v5180_v41 = vpop.f32.mrb[43].mxu0 }
 0x586   :  { %v3703_v29 = vadd.f32 %v7534_v35, %v3456_v19  ;;  %v3735_v26 = vadd.f32 %v7553_v60, %v3702_v21 }
 0x588   :  { %v3736_v55 = vadd.f32 %v7553_v60, %v3703_v29 }
 0x589   :  { %v3460_v38 = vpop.f32.mrb[44].mxu0 }
 0x58a   :  { %v4152_v44 = vpack.c.bf16 %v3736_v55, %v3735_v26  ;;  %v3461_v16 = vadd.f32 %v7548_v3, %v3460_v38  ;;  %v5183_v2 = vpop.f32.mrb[45].mxu0 }
 0x58b   :  { %v3463_v36 = vpop.f32.mrb[46].mxu0 }
 0x58c   :  { %4189 = vst [vmem:[#allocation22 + $0x48] sm:$0xff] %v4152_v44   ;;  %v3704_v18 = vadd.f32 %v7536_v61, %v3461_v16  ;;  %v3464_v6 = vadd.f32 %v7548_v3, %v3463_v36  ;;  %v5184_v52 = vpop.f32.mrb[47].mxu0 }
 0x58e   :  { %v3705_v31 = vadd.f32 %v7538_v4, %v3464_v6  ;;  %v3737_v35 = vadd.f32 %v7553_v60, %v3704_v18 }
 0x590   :  { %v3738_v53 = vadd.f32 %v7553_v60, %v3705_v31 }
 0x591   :  { %v3468_v63 = vpop.f32.mrb[48].mxu0 }
 0x592   :  { %v4157_v9 = vpack.c.bf16 %v3738_v53, %v3737_v35  ;;  %v3469_v34 = vadd.f32 %v7548_v3, %v3468_v63  ;;  %v5187_v28 = vpop.f32.mrb[49].mxu0 }
 0x593   :  { %v3471_v39 = vpop.f32.mrb[50].mxu0 }
 0x594   :  { %4190 = vst [vmem:[#allocation22 + $0x50] sm:$0xff] %v4157_v9   ;;  %v3706_v37 = vadd.f32 %v7540_v46, %v3469_v34  ;;  %v3472_v61 = vadd.f32 %v7548_v3, %v3471_v39  ;;  %v5188_v12 = vpop.f32.mrb[51].mxu0 }
 0x596   :  { %v3707_v51 = vadd.f32 %v7542_v42, %v3472_v61  ;;  %v3739_v4 = vadd.f32 %v7553_v60, %v3706_v37 }
 0x598   :  { %v3740_v15 = vadd.f32 %v7553_v60, %v3707_v51 }
 0x599   :  { %v3476_v33 = vpop.f32.mrb[52].mxu0 }
 0x59a   :  { %v4162_v56 = vpack.c.bf16 %v3740_v15, %v3739_v4  ;;  %v3477_v54 = vadd.f32 %v7548_v3, %v3476_v33  ;;  %v5191_v58 = vpop.f32.mrb[53].mxu0 }
 0x59b   :  { %v3479_v14 = vpop.f32.mrb[54].mxu0 }
 0x59c   :  { %4191 = vst [vmem:[#allocation22 + $0x58] sm:$0xff] %v4162_v56   ;;  %v3708_v40 = vadd.f32 %v7544_v10, %v3477_v54  ;;  %v3480_v46 = vadd.f32 %v7548_v3, %v3479_v14  ;;  %v5192_v49 = vpop.f32.mrb[55].mxu0 }
 0x59e   :  { %v3709_v24 = vadd.f32 %v7546_v25, %v3480_v46  ;;  %v3741_v42 = vadd.f32 %v7553_v60, %v3708_v40 }
 0x5a0   :  { %v3742_v59 = vadd.f32 %v7553_v60, %v3709_v24 }
 0x5a2   :  { %v4167_v48 = vpack.c.bf16 %v3742_v59, %v3741_v42 }
 0x5a4   :  { %4192 = vst [vmem:[#allocation22 + $0x60] sm:$0xff] %v4167_v48  }
 0x5a5   :  { %5654 = shalt.err (!%p5651_p2)
}
 0x5a6   :  { %s5655_s15 = scalar_lea.hbm %s7657_s12, 1664 }
 0x5a7   :  { %p5656_p3 = scmp.ne.s32.totalorder %s7657_s12, %s5655_s15  ;;  %p5659_p4 = scmp.lt.u32.totalorder %s5655_s15, %s7657_s12 }
 0x5a9   :  { %p5661_p5 = pnand %p5659_p4, %p5656_p3 }
 0x5ab   :  { %5664 = shalt.err (!%p5661_p5)
}
 0x5ac   :  { %3886 = dma.vmem_to_hbm [thread:$0]  %s3881_s6, 1664, %s7657_s12, [#allocation4], %s5682_s13, %s5682_s13, %s5683_s14  }
 0x5ad   :  { %5679 = dma.done.wait [#allocation4], 1664  }
 0x5ae   :  { %5680 = vsyncadd [#allocation4], 4294965632 }
 0x5af   :  { %3890 = vsyncpa [#allocation3], 1 }
 0x5b0   :  { %3891 = vsyncpa [#allocation6], 1 }
 0x5b1   :  { %3892 = vsyncpa [#allocation9], 1 }
 0x5b2   :  { %3893 = vsyncpa [#allocation12], 1 }
 0x5b3   :  { %3894 = vsyncpa [#allocation15], 1 }
 0x5b4   :  { %3895 = vsyncpa [#allocation18], 1 }
 0x5b5   :  { %3896 = vsyncpa [#allocation21], 1 }
 0x5b6   :  { %3897 = vsyncpa [#allocation4], 1 }

</bundles_post_ra>
